<compile_context>
chip_gen: v7x
topology: tpu7x:2x2x1
jax: 0.10.0
libtpu: 0.0.40
codegen_flags: <defaults>
</compile_context>

<pallas_src>
import math

import jax
import jax.numpy as jnp
from jax.experimental import pallas as pl
from jax.experimental.pallas import tpu as pltpu

# ---- hyper-params ------------------------------------------------------------
D_MODEL = 32
NHEAD = 4
HEAD_DIM = D_MODEL // NHEAD
DIM_FF = 64            # == 2 * D_MODEL (lets W1/b1 share slabs with the packed [wq|wk])
NUM_LAYERS = 2
EPS = 1e-5

S_TGT = 8              # number of object queries
S_MEM = 16             # memory (encoder output) length
BATCH = 2

# vec_d slab per-layer layout (all (1, D_MODEL) row vectors)
V_BV_S, V_BO_S = 0, 1
V_BQ_C, V_BK_C, V_BV_C, V_BO_C = 2, 3, 4, 5
V_G1, V_B1, V_G2, V_B2, V_G3, V_B3 = 6, 7, 8, 9, 10, 11
V_B2F = 12
VEC_PER_LAYER = 13


# ---- shared math helpers -----------------------------------------------------
def _layer_norm(x, g, b):
    mu = jnp.mean(x, axis=-1, keepdims=True)
    var = jnp.mean(jnp.square(x - mu), axis=-1, keepdims=True)
    return (x - mu) * jax.lax.rsqrt(var + EPS) * g + b


# ---- in-kernel multi-head attention (batch folded, block-diagonal head trick) --
def _attention(q, k, v, sq, sk, wo, bo, head_mask, q_mask):
    """q: (BATCH*sq, D); k, v: (BATCH*sk, D); masks: (NHEAD, 1, D) head-column selectors
    (q_mask is pre-scaled by 1/sqrt(HEAD_DIM))."""
    q3 = q.reshape(BATCH, sq, D_MODEL)
    k3 = k.reshape(BATCH, sk, D_MODEL)
    v3 = v.reshape(BATCH, sk, D_MODEL)

    # (B, NHEAD*sq, D): sublane block h holds Q masked to head h's columns.
    # Contraction runs over the full D (K=32) - masked-out columns contribute zero -
    # so no per-head lane slicing / relayout is needed anywhere.
    qb = jnp.concatenate([q3 * q_mask[h] for h in range(NHEAD)], axis=1)

    s = jnp.einsum('bqd,bkd->bqk', qb, k3, preferred_element_type=jnp.float32)
    s = s - jnp.max(s, axis=-1, keepdims=True)
    p = jnp.exp(s)
    p = p / jnp.sum(p, axis=-1, keepdims=True)          # exact softmax denominator

    o = jnp.einsum('bqk,bkd->bqd', p, v3, preferred_element_type=jnp.float32)

    # Recombine heads: head h's valid columns live in sublane block h of `o`.
    c = o[:, 0:sq, :] * head_mask[0]
    for h in range(1, NHEAD):
        c = c + o[:, h * sq:(h + 1) * sq, :] * head_mask[h]
    c = c.reshape(BATCH * sq, D_MODEL)

    return jnp.dot(c, wo, preferred_element_type=jnp.float32) + bo


# ---- fused Pallas kernel: all layers + final LayerNorm -------------------------
def fused_decoder_kernel(tgt_ref, mem_ref, qpos_ref, pos_ref, mask_ref,
                         wdd_ref, wd64_ref, w64d_ref, b64_ref, vec_ref,
                         out_ref):
    head_mask = mask_ref[...]                                  # (H, 1, D)
    q_mask = head_mask * (1.0 / math.sqrt(HEAD_DIM))           # scale folded into Q mask

    def stack_batch(ref):      # (S, B, D) -> (B*S, D), batch-major rows
        return jnp.concatenate([ref[:, b, :] for b in range(BATCH)], axis=0)

    x = stack_batch(tgt_ref)                                   # (B*S_TGT, D)
    qp = stack_batch(qpos_ref)                                 # (B*S_TGT, D)
    mem = stack_batch(mem_ref)                                 # (B*S_MEM, D)
    mk = mem + stack_batch(pos_ref)                            # memory + pos (keys)

    for l in range(NUM_LAYERS):
        wv_s, wo_s = wdd_ref[l * 6 + 0], wdd_ref[l * 6 + 1]
        wq_c, wk_c = wdd_ref[l * 6 + 2], wdd_ref[l * 6 + 3]
        wv_c, wo_c = wdd_ref[l * 6 + 4], wdd_ref[l * 6 + 5]
        wqk_s, w1 = wd64_ref[l * 2 + 0], wd64_ref[l * 2 + 1]
        bqk_s, b1 = b64_ref[l * 2 + 0], b64_ref[l * 2 + 1]
        w2 = w64d_ref[l]
        vec = lambda j, l=l: vec_ref[l * VEC_PER_LAYER + j]

        # ---- self-attention: q = k = x + query_pos, value = x ------------------
        xq = x + qp
        qk = jnp.dot(xq, wqk_s, preferred_element_type=jnp.float32) + bqk_s   # (rows, 2D)
        vs = jnp.dot(x, wv_s, preferred_element_type=jnp.float32) + vec(V_BV_S)
        sa = _attention(qk[:, :D_MODEL], qk[:, D_MODEL:], vs, S_TGT, S_TGT,
                        wo_s, vec(V_BO_S), head_mask, q_mask)
        x = _layer_norm(x + sa, vec(V_G1), vec(V_B1))

        # ---- cross-attention: q = x + query_pos, k = memory + pos, v = memory --
        qc = jnp.dot(x + qp, wq_c, preferred_element_type=jnp.float32) + vec(V_BQ_C)
        kc = jnp.dot(mk, wk_c, preferred_element_type=jnp.float32) + vec(V_BK_C)
        vc = jnp.dot(mem, wv_c, preferred_element_type=jnp.float32) + vec(V_BV_C)
        ca = _attention(qc, kc, vc, S_TGT, S_MEM,
                        wo_c, vec(V_BO_C), head_mask, q_mask)
        x = _layer_norm(x + ca, vec(V_G2), vec(V_B2))

        # ---- feed-forward (ReLU) ------------------------------------------------
        hdn = jnp.maximum(jnp.dot(x, w1, preferred_element_type=jnp.float32) + b1, 0.0)
        y = jnp.dot(hdn, w2, preferred_element_type=jnp.float32) + vec(V_B2F)
        x = _layer_norm(x + y, vec(V_G3), vec(V_B3))

    # ---- final LayerNorm, stored directly in the (1, S_TGT, BATCH, D) layout ----
    g = vec_ref[NUM_LAYERS * VEC_PER_LAYER + 0]
    be = vec_ref[NUM_LAYERS * VEC_PER_LAYER + 1]
    y = _layer_norm(x, g, be)                                  # (B*S_TGT, D)
    for b in range(BATCH):
        out_ref[0, :, b, :] = y[b * S_TGT:(b + 1) * S_TGT, :]


# ---- wrapper -------------------------------------------------------------------
def transformer_decoder_forward(tgt_sbd, memory_sbd, pos_sbd, query_pos_sbd, packed):
    """Mirrors TransformerDecoder.forward (return_intermediate=False, masks=None)."""
    head_mask, w_dd, w_d64, w_64d, b_64, vec_d = packed
    operands = (tgt_sbd, memory_sbd, query_pos_sbd, pos_sbd, head_mask,
                w_dd, w_d64, w_64d, b_64, vec_d)
    vmem = pltpu.MemorySpace.VMEM
    return pl.pallas_call(
        fused_decoder_kernel,
        out_shape=jax.ShapeDtypeStruct((1, S_TGT, BATCH, D_MODEL), jnp.float32),
        in_specs=[pl.BlockSpec(memory_space=vmem) for _ in operands],
        out_specs=pl.BlockSpec(memory_space=vmem),
    )(*operands)


# ---- pure-JAX reference (independent formulation: per-head slices, exact softmax)
def _ref_mha(q_in, k_in, v_in, wq, bq, wk, bk, wv, bv, wo, bo):
    scale = 1.0 / math.sqrt(HEAD_DIM)
    q = (q_in @ wq + bq) * scale
    k = k_in @ wk + bk
    v = v_in @ wv + bv
    heads = []
    for h in range(NHEAD):
        sl = slice(h * HEAD_DIM, (h + 1) * HEAD_DIM)
        s = q[:, sl] @ k[:, sl].T
        p = jax.nn.softmax(s, axis=-1)
        heads.append(p @ v[:, sl])
    return jnp.concatenate(heads, axis=-1) @ wo + bo


def _ref_layer(x, mem, qpos, pos, lp):
    (sa_wq, sa_bq, sa_wk, sa_bk, sa_wv, sa_bv, sa_wo, sa_bo,
     ca_wq, ca_bq, ca_wk, ca_bk, ca_wv, ca_bv, ca_wo, ca_bo,
     n1g, n1b, n2g, n2b, n3g, n3b,
     w1, b1, w2, b2) = lp
    qk = x + qpos
    x = _layer_norm(x + _ref_mha(qk, qk, x, sa_wq, sa_bq, sa_wk, sa_bk,
                                 sa_wv, sa_bv, sa_wo, sa_bo), n1g, n1b)
    x = _layer_norm(x + _ref_mha(x + qpos, mem + pos, mem, ca_wq, ca_bq, ca_wk, ca_bk,
                                 ca_wv, ca_bv, ca_wo, ca_bo), n2g, n2b)
    h = jnp.maximum(x @ w1 + b1, 0.0)
    x = _layer_norm(x + (h @ w2 + b2), n3g, n3b)
    return x


def reference_forward(tgt_sbd, memory_sbd, pos_sbd, query_pos_sbd,
                      layer_params, norm_params):
    cols = []
    for b in range(tgt_sbd.shape[1]):
        x = tgt_sbd[:, b, :]
        mem = memory_sbd[:, b, :]
        qp = query_pos_sbd[:, b, :]
        ps = pos_sbd[:, b, :]
        for lp in layer_params:
            x = _ref_layer(x, mem, qp, ps, lp)
        g, be = norm_params
        cols.append(_layer_norm(x, g, be))
    return jnp.stack(cols, axis=1)[None]          # (1, S_TGT, B, D)


# ---- deterministic parameter construction & packing ----------------------------
def make_layer_params(key):
    keys = iter(jax.random.split(key, 32))

    def lin(in_dim, out_dim):
        bound = 1.0 / math.sqrt(in_dim)
        w = jax.random.uniform(next(keys), (in_dim, out_dim), jnp.float32, -bound, bound)
        b = jax.random.uniform(next(keys), (1, out_dim), jnp.float32, -bound, bound)
        return w, b

    def ln():
        return jnp.ones((1, D_MODEL), jnp.float32), jnp.zeros((1, D_MODEL), jnp.float32)

    sa_wq, sa_bq = lin(D_MODEL, D_MODEL)
    sa_wk, sa_bk = lin(D_MODEL, D_MODEL)
    sa_wv, sa_bv = lin(D_MODEL, D_MODEL)
    sa_wo, sa_bo = lin(D_MODEL, D_MODEL)
    ca_wq, ca_bq = lin(D_MODEL, D_MODEL)
    ca_wk, ca_bk = lin(D_MODEL, D_MODEL)
    ca_wv, ca_bv = lin(D_MODEL, D_MODEL)
    ca_wo, ca_bo = lin(D_MODEL, D_MODEL)
    n1g, n1b = ln()
    n2g, n2b = ln()
    n3g, n3b = ln()
    w1, b1 = lin(D_MODEL, DIM_FF)
    w2, b2 = lin(DIM_FF, D_MODEL)
    return (sa_wq, sa_bq, sa_wk, sa_bk, sa_wv, sa_bv, sa_wo, sa_bo,
            ca_wq, ca_bq, ca_wk, ca_bk, ca_wv, ca_bv, ca_wo, ca_bo,
            n1g, n1b, n2g, n2b, n3g, n3b,
            w1, b1, w2, b2)


def pack_params(layer_params, norm_params):
    """Pack per-layer weights into a few stacked slabs (one DMA each)."""
    w_dd, w_d64, w_64d, b_64, vec_d = [], [], [], [], []
    for lp in layer_params:
        (sa_wq, sa_bq, sa_wk, sa_bk, sa_wv, sa_bv, sa_wo, sa_bo,
         ca_wq, ca_bq, ca_wk, ca_bk, ca_wv, ca_bv, ca_wo, ca_bo,
         n1g, n1b, n2g, n2b, n3g, n3b,
         w1, b1, w2, b2) = lp
        w_dd += [sa_wv, sa_wo, ca_wq, ca_wk, ca_wv, ca_wo]
        # self-attn q/k share their input (x + query_pos): pack along the lane dim.
        w_d64 += [jnp.concatenate([sa_wq, sa_wk], axis=1), w1]       # (D, 64) each
        b_64 += [jnp.concatenate([sa_bq, sa_bk], axis=1), b1]        # (1, 64) each
        w_64d.append(w2)                                             # (FF, D)
        vec_d += [sa_bv, sa_bo, ca_bq, ca_bk, ca_bv, ca_bo,
                  n1g, n1b, n2g, n2b, n3g, n3b, b2]                  # 13 x (1, D)
    vec_d += list(norm_params)                                       # final gamma, beta
    # (H, 1, D) 0/1 selector of each head's columns (block-diagonal attention trick).
    head_mask = (jnp.arange(D_MODEL)[None, None, :] // HEAD_DIM
                 == jnp.arange(NHEAD)[:, None, None]).astype(jnp.float32)
    return (head_mask,
            jnp.stack(w_dd),    # (L*6, D, D)
            jnp.stack(w_d64),   # (L*2, D, 64)
            jnp.stack(w_64d),   # (L,   FF, D)
            jnp.stack(b_64),    # (L*2, 1, 64)
            jnp.stack(vec_d))   # (L*13+2, 1, D)


if __name__ == "__main__":
    key = jax.random.PRNGKey(0)
    k_tgt, k_mem, k_pos, k_qpos, k_params = jax.random.split(key, 5)

    # tgt / query_pos: (num_queries, batch, d_model); memory / pos: (hw, batch, d_model)
    tgt = jax.random.normal(k_tgt, (S_TGT, BATCH, D_MODEL), jnp.float32)
    memory = jax.random.normal(k_mem, (S_MEM, BATCH, D_MODEL), jnp.float32)
    pos = jax.random.normal(k_pos, (S_MEM, BATCH, D_MODEL), jnp.float32)
    query_pos = jax.random.normal(k_qpos, (S_TGT, BATCH, D_MODEL), jnp.float32)

    layer_keys = jax.random.split(k_params, NUM_LAYERS)
    layer_params = [make_layer_params(k) for k in layer_keys]
    norm_params = (jnp.ones((1, D_MODEL), jnp.float32),
                   jnp.zeros((1, D_MODEL), jnp.float32))

    packed = pack_params(layer_params, norm_params)

    out = transformer_decoder_forward(tgt, memory, pos, query_pos, packed)
    out = jax.block_until_ready(out)

    ref = reference_forward(tgt, memory, pos, query_pos, layer_params, norm_params)
    assert out.shape == (1, S_TGT, BATCH, D_MODEL), out.shape
    err = float(jnp.max(jnp.abs(out - ref)))
    # Softmax is exact now; remaining difference is MXU-vs-XLA f32 matmul precision,
    # so 1e-2 on LayerNorm-scaled O(1) outputs is a comfortable but meaningful bound.
    assert err < 1e-2, err
    print("KERNEL_OK")
</pallas_src>

<mosaic_0001>
module attributes {stable_mosaic.version = 11 : i64} {
  func.func @fused_decoder_kernel(%arg0: memref<8x2x32xf32, #tpu.memory_space<vmem>>, %arg1: memref<16x2x32xf32, #tpu.memory_space<vmem>>, %arg2: memref<8x2x32xf32, #tpu.memory_space<vmem>>, %arg3: memref<16x2x32xf32, #tpu.memory_space<vmem>>, %arg4: memref<4x1x32xf32, #tpu.memory_space<vmem>>, %arg5: memref<12x32x32xf32, #tpu.memory_space<vmem>>, %arg6: memref<4x32x64xf32, #tpu.memory_space<vmem>>, %arg7: memref<2x64x32xf32, #tpu.memory_space<vmem>>, %arg8: memref<4x1x64xf32, #tpu.memory_space<vmem>>, %arg9: memref<28x1x32xf32, #tpu.memory_space<vmem>>, %arg10: memref<1x8x2x32xf32, #tpu.memory_space<vmem>>) attributes {dimension_semantics = [], scalar_prefetch = 0 : i64, scratch_operands = 0 : i64, tpu.core_type = #tpu.core_type<tc>} {
    %c0 = arith.constant 0 : index
    %c0_0 = arith.constant 0 : index
    %c0_1 = arith.constant 0 : index
    %0 = vector.load %arg4[%c0, %c0_0, %c0_1] : memref<4x1x32xf32, #tpu.memory_space<vmem>>, vector<4x1x32xf32>
    %cst = arith.constant 0.353553385 : f32
    %1 = vector.broadcast %cst : f32 to vector<4x1x32xf32>
    %2 = arith.mulf %0, %1 : vector<4x1x32xf32>
    %c0_2 = arith.constant 0 : index
    %c0_3 = arith.constant 0 : index
    %c0_4 = arith.constant 0 : index
    %3 = vector.load %arg0[%c0_2, %c0_3, %c0_4] : memref<8x2x32xf32, #tpu.memory_space<vmem>>, vector<8x1x32xf32>
    %4 = vector.shape_cast %3 : vector<8x1x32xf32> to vector<8x32xf32>
    %c0_5 = arith.constant 0 : index
    %c1 = arith.constant 1 : index
    %c0_6 = arith.constant 0 : index
    %5 = vector.load %arg0[%c0_5, %c1, %c0_6] : memref<8x2x32xf32, #tpu.memory_space<vmem>>, vector<8x1x32xf32>
    %6 = vector.shape_cast %5 : vector<8x1x32xf32> to vector<8x32xf32>
    %7 = tpu.concatenate %4, %6 in 0 : vector<8x32xf32>, vector<8x32xf32> -> vector<16x32xf32>
    %c0_7 = arith.constant 0 : index
    %c0_8 = arith.constant 0 : index
    %c0_9 = arith.constant 0 : index
    %8 = vector.load %arg2[%c0_7, %c0_8, %c0_9] : memref<8x2x32xf32, #tpu.memory_space<vmem>>, vector<8x1x32xf32>
    %9 = vector.shape_cast %8 : vector<8x1x32xf32> to vector<8x32xf32>
    %c0_10 = arith.constant 0 : index
    %c1_11 = arith.constant 1 : index
    %c0_12 = arith.constant 0 : index
    %10 = vector.load %arg2[%c0_10, %c1_11, %c0_12] : memref<8x2x32xf32, #tpu.memory_space<vmem>>, vector<8x1x32xf32>
    %11 = vector.shape_cast %10 : vector<8x1x32xf32> to vector<8x32xf32>
    %12 = tpu.concatenate %9, %11 in 0 : vector<8x32xf32>, vector<8x32xf32> -> vector<16x32xf32>
    %c0_13 = arith.constant 0 : index
    %c0_14 = arith.constant 0 : index
    %c0_15 = arith.constant 0 : index
    %13 = vector.load %arg1[%c0_13, %c0_14, %c0_15] : memref<16x2x32xf32, #tpu.memory_space<vmem>>, vector<16x1x32xf32>
    %14 = vector.shape_cast %13 : vector<16x1x32xf32> to vector<16x32xf32>
    %c0_16 = arith.constant 0 : index
    %c1_17 = arith.constant 1 : index
    %c0_18 = arith.constant 0 : index
    %15 = vector.load %arg1[%c0_16, %c1_17, %c0_18] : memref<16x2x32xf32, #tpu.memory_space<vmem>>, vector<16x1x32xf32>
    %16 = vector.shape_cast %15 : vector<16x1x32xf32> to vector<16x32xf32>
    %17 = tpu.concatenate %14, %16 in 0 : vector<16x32xf32>, vector<16x32xf32> -> vector<32x32xf32>
    %c0_19 = arith.constant 0 : index
    %c0_20 = arith.constant 0 : index
    %c0_21 = arith.constant 0 : index
    %18 = vector.load %arg3[%c0_19, %c0_20, %c0_21] : memref<16x2x32xf32, #tpu.memory_space<vmem>>, vector<16x1x32xf32>
    %19 = vector.shape_cast %18 : vector<16x1x32xf32> to vector<16x32xf32>
    %c0_22 = arith.constant 0 : index
    %c1_23 = arith.constant 1 : index
    %c0_24 = arith.constant 0 : index
    %20 = vector.load %arg3[%c0_22, %c1_23, %c0_24] : memref<16x2x32xf32, #tpu.memory_space<vmem>>, vector<16x1x32xf32>
    %21 = vector.shape_cast %20 : vector<16x1x32xf32> to vector<16x32xf32>
    %22 = tpu.concatenate %19, %21 in 0 : vector<16x32xf32>, vector<16x32xf32> -> vector<32x32xf32>
    %23 = arith.addf %17, %22 : vector<32x32xf32>
    %c0_25 = arith.constant 0 : index
    %c0_26 = arith.constant 0 : index
    %c0_27 = arith.constant 0 : index
    %24 = vector.load %arg5[%c0_25, %c0_26, %c0_27] : memref<12x32x32xf32, #tpu.memory_space<vmem>>, vector<1x32x32xf32>
    %25 = vector.shape_cast %24 : vector<1x32x32xf32> to vector<32x32xf32>
    %c1_28 = arith.constant 1 : index
    %c0_29 = arith.constant 0 : index
    %c0_30 = arith.constant 0 : index
    %26 = vector.load %arg5[%c1_28, %c0_29, %c0_30] : memref<12x32x32xf32, #tpu.memory_space<vmem>>, vector<1x32x32xf32>
    %27 = vector.shape_cast %26 : vector<1x32x32xf32> to vector<32x32xf32>
    %c2 = arith.constant 2 : index
    %c0_31 = arith.constant 0 : index
    %c0_32 = arith.constant 0 : index
    %28 = vector.load %arg5[%c2, %c0_31, %c0_32] : memref<12x32x32xf32, #tpu.memory_space<vmem>>, vector<1x32x32xf32>
    %29 = vector.shape_cast %28 : vector<1x32x32xf32> to vector<32x32xf32>
    %c3 = arith.constant 3 : index
    %c0_33 = arith.constant 0 : index
    %c0_34 = arith.constant 0 : index
    %30 = vector.load %arg5[%c3, %c0_33, %c0_34] : memref<12x32x32xf32, #tpu.memory_space<vmem>>, vector<1x32x32xf32>
    %31 = vector.shape_cast %30 : vector<1x32x32xf32> to vector<32x32xf32>
    %c4 = arith.constant 4 : index
    %c0_35 = arith.constant 0 : index
    %c0_36 = arith.constant 0 : index
    %32 = vector.load %arg5[%c4, %c0_35, %c0_36] : memref<12x32x32xf32, #tpu.memory_space<vmem>>, vector<1x32x32xf32>
    %33 = vector.shape_cast %32 : vector<1x32x32xf32> to vector<32x32xf32>
    %c5 = arith.constant 5 : index
    %c0_37 = arith.constant 0 : index
    %c0_38 = arith.constant 0 : index
    %34 = vector.load %arg5[%c5, %c0_37, %c0_38] : memref<12x32x32xf32, #tpu.memory_space<vmem>>, vector<1x32x32xf32>
    %35 = vector.shape_cast %34 : vector<1x32x32xf32> to vector<32x32xf32>
    %c0_39 = arith.constant 0 : index
    %c0_40 = arith.constant 0 : index
    %c0_41 = arith.constant 0 : index
    %36 = vector.load %arg6[%c0_39, %c0_40, %c0_41] : memref<4x32x64xf32, #tpu.memory_space<vmem>>, vector<1x32x64xf32>
    %37 = vector.shape_cast %36 : vector<1x32x64xf32> to vector<32x64xf32>
    %c1_42 = arith.constant 1 : index
    %c0_43 = arith.constant 0 : index
    %c0_44 = arith.constant 0 : index
    %38 = vector.load %arg6[%c1_42, %c0_43, %c0_44] : memref<4x32x64xf32, #tpu.memory_space<vmem>>, vector<1x32x64xf32>
    %39 = vector.shape_cast %38 : vector<1x32x64xf32> to vector<32x64xf32>
    %c0_45 = arith.constant 0 : index
    %c0_46 = arith.constant 0 : index
    %c0_47 = arith.constant 0 : index
    %40 = vector.load %arg8[%c0_45, %c0_46, %c0_47] : memref<4x1x64xf32, #tpu.memory_space<vmem>>, vector<1x1x64xf32>
    %41 = vector.shape_cast %40 : vector<1x1x64xf32> to vector<1x64xf32>
    %c1_48 = arith.constant 1 : index
    %c0_49 = arith.constant 0 : index
    %c0_50 = arith.constant 0 : index
    %42 = vector.load %arg8[%c1_48, %c0_49, %c0_50] : memref<4x1x64xf32, #tpu.memory_space<vmem>>, vector<1x1x64xf32>
    %43 = vector.shape_cast %42 : vector<1x1x64xf32> to vector<1x64xf32>
    %c0_51 = arith.constant 0 : index
    %c0_52 = arith.constant 0 : index
    %c0_53 = arith.constant 0 : index
    %44 = vector.load %arg7[%c0_51, %c0_52, %c0_53] : memref<2x64x32xf32, #tpu.memory_space<vmem>>, vector<1x64x32xf32>
    %45 = vector.shape_cast %44 : vector<1x64x32xf32> to vector<64x32xf32>
    %46 = arith.addf %7, %12 : vector<16x32xf32>
    %cst_54 = arith.constant dense<0.000000e+00> : vector<16x64xf32>
    %47 = tpu.matmul %46, %37, %cst_54 {dimension_numbers = #tpu.dot_dimension_numbers<[1], [0], [0], [1], [0, 0, 1, 1], [], []>} : vector<16x32xf32>, vector<32x64xf32>, vector<16x64xf32> -> vector<16x64xf32>
    %48 = vector.broadcast %41 : vector<1x64xf32> to vector<16x64xf32>
    %49 = arith.addf %47, %48 : vector<16x64xf32>
    %cst_55 = arith.constant dense<0.000000e+00> : vector<16x32xf32>
    %50 = tpu.matmul %7, %25, %cst_55 {dimension_numbers = #tpu.dot_dimension_numbers<[1], [0], [0], [1], [0, 0, 1, 1], [], []>} : vector<16x32xf32>, vector<32x32xf32>, vector<16x32xf32> -> vector<16x32xf32>
    %c0_56 = arith.constant 0 : index
    %c0_57 = arith.constant 0 : index
    %c0_58 = arith.constant 0 : index
    %51 = vector.load %arg9[%c0_56, %c0_57, %c0_58] : memref<28x1x32xf32, #tpu.memory_space<vmem>>, vector<1x1x32xf32>
    %52 = vector.shape_cast %51 : vector<1x1x32xf32> to vector<1x32xf32>
    %53 = vector.broadcast %52 : vector<1x32xf32> to vector<16x32xf32>
    %54 = arith.addf %50, %53 : vector<16x32xf32>
    %55 = vector.extract_strided_slice %49 {offsets = [0, 0], sizes = [16, 32], strides = [1, 1]} : vector<16x64xf32> to vector<16x32xf32>
    %56 = vector.extract_strided_slice %49 {offsets = [0, 32], sizes = [16, 32], strides = [1, 1]} : vector<16x64xf32> to vector<16x32xf32>
    %c1_59 = arith.constant 1 : index
    %c0_60 = arith.constant 0 : index
    %c0_61 = arith.constant 0 : index
    %57 = vector.load %arg9[%c1_59, %c0_60, %c0_61] : memref<28x1x32xf32, #tpu.memory_space<vmem>>, vector<1x1x32xf32>
    %58 = vector.shape_cast %57 : vector<1x1x32xf32> to vector<1x32xf32>
    %59 = vector.shape_cast %55 : vector<16x32xf32> to vector<2x8x32xf32>
    %60 = vector.shape_cast %56 : vector<16x32xf32> to vector<2x8x32xf32>
    %61 = vector.shape_cast %54 : vector<16x32xf32> to vector<2x8x32xf32>
    %62 = vector.extract_strided_slice %2 {offsets = [0, 0, 0], sizes = [1, 1, 32], strides = [1, 1, 1]} : vector<4x1x32xf32> to vector<1x1x32xf32>
    %63 = vector.shape_cast %62 : vector<1x1x32xf32> to vector<1x32xf32>
    %64 = vector.shape_cast %63 : vector<1x32xf32> to vector<1x1x32xf32>
    %65 = vector.broadcast %64 : vector<1x1x32xf32> to vector<2x8x32xf32>
    %66 = arith.mulf %59, %65 : vector<2x8x32xf32>
    %67 = vector.extract_strided_slice %2 {offsets = [1, 0, 0], sizes = [1, 1, 32], strides = [1, 1, 1]} : vector<4x1x32xf32> to vector<1x1x32xf32>
    %68 = vector.shape_cast %67 : vector<1x1x32xf32> to vector<1x32xf32>
    %69 = vector.shape_cast %68 : vector<1x32xf32> to vector<1x1x32xf32>
    %70 = vector.broadcast %69 : vector<1x1x32xf32> to vector<2x8x32xf32>
    %71 = arith.mulf %59, %70 : vector<2x8x32xf32>
    %72 = vector.extract_strided_slice %2 {offsets = [2, 0, 0], sizes = [1, 1, 32], strides = [1, 1, 1]} : vector<4x1x32xf32> to vector<1x1x32xf32>
    %73 = vector.shape_cast %72 : vector<1x1x32xf32> to vector<1x32xf32>
    %74 = vector.shape_cast %73 : vector<1x32xf32> to vector<1x1x32xf32>
    %75 = vector.broadcast %74 : vector<1x1x32xf32> to vector<2x8x32xf32>
    %76 = arith.mulf %59, %75 : vector<2x8x32xf32>
    %77 = vector.extract_strided_slice %2 {offsets = [3, 0, 0], sizes = [1, 1, 32], strides = [1, 1, 1]} : vector<4x1x32xf32> to vector<1x1x32xf32>
    %78 = vector.shape_cast %77 : vector<1x1x32xf32> to vector<1x32xf32>
    %79 = vector.shape_cast %78 : vector<1x32xf32> to vector<1x1x32xf32>
    %80 = vector.broadcast %79 : vector<1x1x32xf32> to vector<2x8x32xf32>
    %81 = arith.mulf %59, %80 : vector<2x8x32xf32>
    %82 = tpu.concatenate %66, %71, %76, %81 in 1 : vector<2x8x32xf32>, vector<2x8x32xf32>, vector<2x8x32xf32>, vector<2x8x32xf32> -> vector<2x32x32xf32>
    "tpu.trace_start"() <{level = 10 : i32, message = "bqd,bkd->bqk"}> : () -> ()
    %cst_62 = arith.constant dense<0.000000e+00> : vector<2x32x8xf32>
    %83 = tpu.matmul %82, %60, %cst_62 {dimension_numbers = #tpu.dot_dimension_numbers<[2], [2], [1], [1], [0, 0, 0, 1, 1, 1], [0], [0]>} : vector<2x32x32xf32>, vector<2x8x32xf32>, vector<2x32x8xf32> -> vector<2x32x8xf32>
    "tpu.trace_stop"() : () -> ()
    %cst_63 = arith.constant dense<0xFF800000> : vector<2x32xf32>
    %84 = vector.multi_reduction <maximumf>, %83, %cst_63 [2] : vector<2x32x8xf32> to vector<2x32xf32>
    %85 = vector.shape_cast %84 : vector<2x32xf32> to vector<2x32x1xf32>
    %86 = vector.broadcast %85 : vector<2x32x1xf32> to vector<2x32x8xf32>
    %87 = arith.subf %83, %86 : vector<2x32x8xf32>
    %88 = math.exp %87 : vector<2x32x8xf32>
    %cst_64 = arith.constant dense<0.000000e+00> : vector<2x32xf32>
    %89 = vector.multi_reduction <add>, %88, %cst_64 [2] : vector<2x32x8xf32> to vector<2x32xf32>
    %90 = vector.shape_cast %89 : vector<2x32xf32> to vector<2x32x1xf32>
    %91 = vector.broadcast %90 : vector<2x32x1xf32> to vector<2x32x8xf32>
    %92 = arith.divf %88, %91 : vector<2x32x8xf32>
    "tpu.trace_start"() <{level = 10 : i32, message = "bqk,bkd->bqd"}> : () -> ()
    %cst_65 = arith.constant dense<0.000000e+00> : vector<2x32x32xf32>
    %93 = tpu.matmul %92, %61, %cst_65 {dimension_numbers = #tpu.dot_dimension_numbers<[2], [1], [1], [2], [0, 0, 0, 1, 1, 2], [0], [0]>} : vector<2x32x8xf32>, vector<2x8x32xf32>, vector<2x32x32xf32> -> vector<2x32x32xf32>
    "tpu.trace_stop"() : () -> ()
    %94 = vector.extract_strided_slice %93 {offsets = [0, 0, 0], sizes = [2, 8, 32], strides = [1, 1, 1]} : vector<2x32x32xf32> to vector<2x8x32xf32>
    %95 = vector.extract_strided_slice %0 {offsets = [0, 0, 0], sizes = [1, 1, 32], strides = [1, 1, 1]} : vector<4x1x32xf32> to vector<1x1x32xf32>
    %96 = vector.shape_cast %95 : vector<1x1x32xf32> to vector<1x32xf32>
    %97 = vector.shape_cast %96 : vector<1x32xf32> to vector<1x1x32xf32>
    %98 = vector.broadcast %97 : vector<1x1x32xf32> to vector<2x8x32xf32>
    %99 = arith.mulf %94, %98 : vector<2x8x32xf32>
    %100 = vector.extract_strided_slice %93 {offsets = [0, 8, 0], sizes = [2, 8, 32], strides = [1, 1, 1]} : vector<2x32x32xf32> to vector<2x8x32xf32>
    %101 = vector.extract_strided_slice %0 {offsets = [1, 0, 0], sizes = [1, 1, 32], strides = [1, 1, 1]} : vector<4x1x32xf32> to vector<1x1x32xf32>
    %102 = vector.shape_cast %101 : vector<1x1x32xf32> to vector<1x32xf32>
    %103 = vector.shape_cast %102 : vector<1x32xf32> to vector<1x1x32xf32>
    %104 = vector.broadcast %103 : vector<1x1x32xf32> to vector<2x8x32xf32>
    %105 = arith.mulf %100, %104 : vector<2x8x32xf32>
    %106 = arith.addf %99, %105 : vector<2x8x32xf32>
    %107 = vector.extract_strided_slice %93 {offsets = [0, 16, 0], sizes = [2, 8, 32], strides = [1, 1, 1]} : vector<2x32x32xf32> to vector<2x8x32xf32>
    %108 = vector.extract_strided_slice %0 {offsets = [2, 0, 0], sizes = [1, 1, 32], strides = [1, 1, 1]} : vector<4x1x32xf32> to vector<1x1x32xf32>
    %109 = vector.shape_cast %108 : vector<1x1x32xf32> to vector<1x32xf32>
    %110 = vector.shape_cast %109 : vector<1x32xf32> to vector<1x1x32xf32>
    %111 = vector.broadcast %110 : vector<1x1x32xf32> to vector<2x8x32xf32>
    %112 = arith.mulf %107, %111 : vector<2x8x32xf32>
    %113 = arith.addf %106, %112 : vector<2x8x32xf32>
    %114 = vector.extract_strided_slice %93 {offsets = [0, 24, 0], sizes = [2, 8, 32], strides = [1, 1, 1]} : vector<2x32x32xf32> to vector<2x8x32xf32>
    %115 = vector.extract_strided_slice %0 {offsets = [3, 0, 0], sizes = [1, 1, 32], strides = [1, 1, 1]} : vector<4x1x32xf32> to vector<1x1x32xf32>
    %116 = vector.shape_cast %115 : vector<1x1x32xf32> to vector<1x32xf32>
    %117 = vector.shape_cast %116 : vector<1x32xf32> to vector<1x1x32xf32>
    %118 = vector.broadcast %117 : vector<1x1x32xf32> to vector<2x8x32xf32>
    %119 = arith.mulf %114, %118 : vector<2x8x32xf32>
    %120 = arith.addf %113, %119 : vector<2x8x32xf32>
    %121 = vector.shape_cast %120 : vector<2x8x32xf32> to vector<16x32xf32>
    %cst_66 = arith.constant dense<0.000000e+00> : vector<16x32xf32>
    %122 = tpu.matmul %121, %27, %cst_66 {dimension_numbers = #tpu.dot_dimension_numbers<[1], [0], [0], [1], [0, 0, 1, 1], [], []>} : vector<16x32xf32>, vector<32x32xf32>, vector<16x32xf32> -> vector<16x32xf32>
    %123 = vector.broadcast %58 : vector<1x32xf32> to vector<16x32xf32>
    %124 = arith.addf %122, %123 : vector<16x32xf32>
    %125 = arith.addf %7, %124 : vector<16x32xf32>
    %c6 = arith.constant 6 : index
    %c0_67 = arith.constant 0 : index
    %c0_68 = arith.constant 0 : index
    %126 = vector.load %arg9[%c6, %c0_67, %c0_68] : memref<28x1x32xf32, #tpu.memory_space<vmem>>, vector<1x1x32xf32>
    %127 = vector.shape_cast %126 : vector<1x1x32xf32> to vector<1x32xf32>
    %c7 = arith.constant 7 : index
    %c0_69 = arith.constant 0 : index
    %c0_70 = arith.constant 0 : index
    %128 = vector.load %arg9[%c7, %c0_69, %c0_70] : memref<28x1x32xf32, #tpu.memory_space<vmem>>, vector<1x1x32xf32>
    %129 = vector.shape_cast %128 : vector<1x1x32xf32> to vector<1x32xf32>
    %cst_71 = arith.constant dense<0.000000e+00> : vector<16xf32>
    %130 = vector.multi_reduction <add>, %125, %cst_71 [1] : vector<16x32xf32> to vector<16xf32>
    %131 = vector.shape_cast %130 : vector<16xf32> to vector<16x1xf32>
    %cst_72 = arith.constant 3.200000e+01 : f32
    %132 = vector.broadcast %cst_72 : f32 to vector<16x1xf32>
    %133 = arith.divf %131, %132 : vector<16x1xf32>
    %134 = vector.broadcast %133 : vector<16x1xf32> to vector<16x32xf32>
    %135 = arith.subf %125, %134 : vector<16x32xf32>
    %136 = arith.mulf %135, %135 : vector<16x32xf32>
    %cst_73 = arith.constant dense<0.000000e+00> : vector<16xf32>
    %137 = vector.multi_reduction <add>, %136, %cst_73 [1] : vector<16x32xf32> to vector<16xf32>
    %138 = vector.shape_cast %137 : vector<16xf32> to vector<16x1xf32>
    %cst_74 = arith.constant 3.200000e+01 : f32
    %139 = vector.broadcast %cst_74 : f32 to vector<16x1xf32>
    %140 = arith.divf %138, %139 : vector<16x1xf32>
    %141 = vector.broadcast %133 : vector<16x1xf32> to vector<16x32xf32>
    %142 = arith.subf %125, %141 : vector<16x32xf32>
    %cst_75 = arith.constant 9.99999974E-6 : f32
    %143 = vector.broadcast %cst_75 : f32 to vector<16x1xf32>
    %144 = arith.addf %140, %143 : vector<16x1xf32>
    %145 = math.rsqrt %144 : vector<16x1xf32>
    %146 = vector.broadcast %145 : vector<16x1xf32> to vector<16x32xf32>
    %147 = arith.mulf %142, %146 : vector<16x32xf32>
    %148 = vector.broadcast %127 : vector<1x32xf32> to vector<16x32xf32>
    %149 = arith.mulf %147, %148 : vector<16x32xf32>
    %150 = vector.broadcast %129 : vector<1x32xf32> to vector<16x32xf32>
    %151 = arith.addf %149, %150 : vector<16x32xf32>
    %152 = arith.addf %151, %12 : vector<16x32xf32>
    %cst_76 = arith.constant dense<0.000000e+00> : vector<16x32xf32>
    %153 = tpu.matmul %152, %29, %cst_76 {dimension_numbers = #tpu.dot_dimension_numbers<[1], [0], [0], [1], [0, 0, 1, 1], [], []>} : vector<16x32xf32>, vector<32x32xf32>, vector<16x32xf32> -> vector<16x32xf32>
    %c2_77 = arith.constant 2 : index
    %c0_78 = arith.constant 0 : index
    %c0_79 = arith.constant 0 : index
    %154 = vector.load %arg9[%c2_77, %c0_78, %c0_79] : memref<28x1x32xf32, #tpu.memory_space<vmem>>, vector<1x1x32xf32>
    %155 = vector.shape_cast %154 : vector<1x1x32xf32> to vector<1x32xf32>
    %156 = vector.broadcast %155 : vector<1x32xf32> to vector<16x32xf32>
    %157 = arith.addf %153, %156 : vector<16x32xf32>
    %cst_80 = arith.constant dense<0.000000e+00> : vector<32x32xf32>
    %158 = tpu.matmul %23, %31, %cst_80 {dimension_numbers = #tpu.dot_dimension_numbers<[1], [0], [0], [1], [0, 0, 1, 1], [], []>} : vector<32x32xf32>, vector<32x32xf32>, vector<32x32xf32> -> vector<32x32xf32>
    %c3_81 = arith.constant 3 : index
    %c0_82 = arith.constant 0 : index
    %c0_83 = arith.constant 0 : index
    %159 = vector.load %arg9[%c3_81, %c0_82, %c0_83] : memref<28x1x32xf32, #tpu.memory_space<vmem>>, vector<1x1x32xf32>
    %160 = vector.shape_cast %159 : vector<1x1x32xf32> to vector<1x32xf32>
    %161 = vector.broadcast %160 : vector<1x32xf32> to vector<32x32xf32>
    %162 = arith.addf %158, %161 : vector<32x32xf32>
    %cst_84 = arith.constant dense<0.000000e+00> : vector<32x32xf32>
    %163 = tpu.matmul %17, %33, %cst_84 {dimension_numbers = #tpu.dot_dimension_numbers<[1], [0], [0], [1], [0, 0, 1, 1], [], []>} : vector<32x32xf32>, vector<32x32xf32>, vector<32x32xf32> -> vector<32x32xf32>
    %c4_85 = arith.constant 4 : index
    %c0_86 = arith.constant 0 : index
    %c0_87 = arith.constant 0 : index
    %164 = vector.load %arg9[%c4_85, %c0_86, %c0_87] : memref<28x1x32xf32, #tpu.memory_space<vmem>>, vector<1x1x32xf32>
    %165 = vector.shape_cast %164 : vector<1x1x32xf32> to vector<1x32xf32>
    %166 = vector.broadcast %165 : vector<1x32xf32> to vector<32x32xf32>
    %167 = arith.addf %163, %166 : vector<32x32xf32>
    %c5_88 = arith.constant 5 : index
    %c0_89 = arith.constant 0 : index
    %c0_90 = arith.constant 0 : index
    %168 = vector.load %arg9[%c5_88, %c0_89, %c0_90] : memref<28x1x32xf32, #tpu.memory_space<vmem>>, vector<1x1x32xf32>
    %169 = vector.shape_cast %168 : vector<1x1x32xf32> to vector<1x32xf32>
    %170 = vector.shape_cast %157 : vector<16x32xf32> to vector<2x8x32xf32>
    %171 = vector.shape_cast %162 : vector<32x32xf32> to vector<2x16x32xf32>
    %172 = vector.shape_cast %167 : vector<32x32xf32> to vector<2x16x32xf32>
    %173 = vector.extract_strided_slice %2 {offsets = [0, 0, 0], sizes = [1, 1, 32], strides = [1, 1, 1]} : vector<4x1x32xf32> to vector<1x1x32xf32>
    %174 = vector.shape_cast %173 : vector<1x1x32xf32> to vector<1x32xf32>
    %175 = vector.shape_cast %174 : vector<1x32xf32> to vector<1x1x32xf32>
    %176 = vector.broadcast %175 : vector<1x1x32xf32> to vector<2x8x32xf32>
    %177 = arith.mulf %170, %176 : vector<2x8x32xf32>
    %178 = vector.extract_strided_slice %2 {offsets = [1, 0, 0], sizes = [1, 1, 32], strides = [1, 1, 1]} : vector<4x1x32xf32> to vector<1x1x32xf32>
    %179 = vector.shape_cast %178 : vector<1x1x32xf32> to vector<1x32xf32>
    %180 = vector.shape_cast %179 : vector<1x32xf32> to vector<1x1x32xf32>
    %181 = vector.broadcast %180 : vector<1x1x32xf32> to vector<2x8x32xf32>
    %182 = arith.mulf %170, %181 : vector<2x8x32xf32>
    %183 = vector.extract_strided_slice %2 {offsets = [2, 0, 0], sizes = [1, 1, 32], strides = [1, 1, 1]} : vector<4x1x32xf32> to vector<1x1x32xf32>
    %184 = vector.shape_cast %183 : vector<1x1x32xf32> to vector<1x32xf32>
    %185 = vector.shape_cast %184 : vector<1x32xf32> to vector<1x1x32xf32>
    %186 = vector.broadcast %185 : vector<1x1x32xf32> to vector<2x8x32xf32>
    %187 = arith.mulf %170, %186 : vector<2x8x32xf32>
    %188 = vector.extract_strided_slice %2 {offsets = [3, 0, 0], sizes = [1, 1, 32], strides = [1, 1, 1]} : vector<4x1x32xf32> to vector<1x1x32xf32>
    %189 = vector.shape_cast %188 : vector<1x1x32xf32> to vector<1x32xf32>
    %190 = vector.shape_cast %189 : vector<1x32xf32> to vector<1x1x32xf32>
    %191 = vector.broadcast %190 : vector<1x1x32xf32> to vector<2x8x32xf32>
    %192 = arith.mulf %170, %191 : vector<2x8x32xf32>
    %193 = tpu.concatenate %177, %182, %187, %192 in 1 : vector<2x8x32xf32>, vector<2x8x32xf32>, vector<2x8x32xf32>, vector<2x8x32xf32> -> vector<2x32x32xf32>
    "tpu.trace_start"() <{level = 10 : i32, message = "bqd,bkd->bqk"}> : () -> ()
    %cst_91 = arith.constant dense<0.000000e+00> : vector<2x32x16xf32>
    %194 = tpu.matmul %193, %171, %cst_91 {dimension_numbers = #tpu.dot_dimension_numbers<[2], [2], [1], [1], [0, 0, 0, 1, 1, 1], [0], [0]>} : vector<2x32x32xf32>, vector<2x16x32xf32>, vector<2x32x16xf32> -> vector<2x32x16xf32>
    "tpu.trace_stop"() : () -> ()
    %cst_92 = arith.constant dense<0xFF800000> : vector<2x32xf32>
    %195 = vector.multi_reduction <maximumf>, %194, %cst_92 [2] : vector<2x32x16xf32> to vector<2x32xf32>
    %196 = vector.shape_cast %195 : vector<2x32xf32> to vector<2x32x1xf32>
    %197 = vector.broadcast %196 : vector<2x32x1xf32> to vector<2x32x16xf32>
    %198 = arith.subf %194, %197 : vector<2x32x16xf32>
    %199 = math.exp %198 : vector<2x32x16xf32>
    %cst_93 = arith.constant dense<0.000000e+00> : vector<2x32xf32>
    %200 = vector.multi_reduction <add>, %199, %cst_93 [2] : vector<2x32x16xf32> to vector<2x32xf32>
    %201 = vector.shape_cast %200 : vector<2x32xf32> to vector<2x32x1xf32>
    %202 = vector.broadcast %201 : vector<2x32x1xf32> to vector<2x32x16xf32>
    %203 = arith.divf %199, %202 : vector<2x32x16xf32>
    "tpu.trace_start"() <{level = 10 : i32, message = "bqk,bkd->bqd"}> : () -> ()
    %cst_94 = arith.constant dense<0.000000e+00> : vector<2x32x32xf32>
    %204 = tpu.matmul %203, %172, %cst_94 {dimension_numbers = #tpu.dot_dimension_numbers<[2], [1], [1], [2], [0, 0, 0, 1, 1, 2], [0], [0]>} : vector<2x32x16xf32>, vector<2x16x32xf32>, vector<2x32x32xf32> -> vector<2x32x32xf32>
    "tpu.trace_stop"() : () -> ()
    %205 = vector.extract_strided_slice %204 {offsets = [0, 0, 0], sizes = [2, 8, 32], strides = [1, 1, 1]} : vector<2x32x32xf32> to vector<2x8x32xf32>
    %206 = vector.extract_strided_slice %0 {offsets = [0, 0, 0], sizes = [1, 1, 32], strides = [1, 1, 1]} : vector<4x1x32xf32> to vector<1x1x32xf32>
    %207 = vector.shape_cast %206 : vector<1x1x32xf32> to vector<1x32xf32>
    %208 = vector.shape_cast %207 : vector<1x32xf32> to vector<1x1x32xf32>
    %209 = vector.broadcast %208 : vector<1x1x32xf32> to vector<2x8x32xf32>
    %210 = arith.mulf %205, %209 : vector<2x8x32xf32>
    %211 = vector.extract_strided_slice %204 {offsets = [0, 8, 0], sizes = [2, 8, 32], strides = [1, 1, 1]} : vector<2x32x32xf32> to vector<2x8x32xf32>
    %212 = vector.extract_strided_slice %0 {offsets = [1, 0, 0], sizes = [1, 1, 32], strides = [1, 1, 1]} : vector<4x1x32xf32> to vector<1x1x32xf32>
    %213 = vector.shape_cast %212 : vector<1x1x32xf32> to vector<1x32xf32>
    %214 = vector.shape_cast %213 : vector<1x32xf32> to vector<1x1x32xf32>
    %215 = vector.broadcast %214 : vector<1x1x32xf32> to vector<2x8x32xf32>
    %216 = arith.mulf %211, %215 : vector<2x8x32xf32>
    %217 = arith.addf %210, %216 : vector<2x8x32xf32>
    %218 = vector.extract_strided_slice %204 {offsets = [0, 16, 0], sizes = [2, 8, 32], strides = [1, 1, 1]} : vector<2x32x32xf32> to vector<2x8x32xf32>
    %219 = vector.extract_strided_slice %0 {offsets = [2, 0, 0], sizes = [1, 1, 32], strides = [1, 1, 1]} : vector<4x1x32xf32> to vector<1x1x32xf32>
    %220 = vector.shape_cast %219 : vector<1x1x32xf32> to vector<1x32xf32>
    %221 = vector.shape_cast %220 : vector<1x32xf32> to vector<1x1x32xf32>
    %222 = vector.broadcast %221 : vector<1x1x32xf32> to vector<2x8x32xf32>
    %223 = arith.mulf %218, %222 : vector<2x8x32xf32>
    %224 = arith.addf %217, %223 : vector<2x8x32xf32>
    %225 = vector.extract_strided_slice %204 {offsets = [0, 24, 0], sizes = [2, 8, 32], strides = [1, 1, 1]} : vector<2x32x32xf32> to vector<2x8x32xf32>
    %226 = vector.extract_strided_slice %0 {offsets = [3, 0, 0], sizes = [1, 1, 32], strides = [1, 1, 1]} : vector<4x1x32xf32> to vector<1x1x32xf32>
    %227 = vector.shape_cast %226 : vector<1x1x32xf32> to vector<1x32xf32>
    %228 = vector.shape_cast %227 : vector<1x32xf32> to vector<1x1x32xf32>
    %229 = vector.broadcast %228 : vector<1x1x32xf32> to vector<2x8x32xf32>
    %230 = arith.mulf %225, %229 : vector<2x8x32xf32>
    %231 = arith.addf %224, %230 : vector<2x8x32xf32>
    %232 = vector.shape_cast %231 : vector<2x8x32xf32> to vector<16x32xf32>
    %cst_95 = arith.constant dense<0.000000e+00> : vector<16x32xf32>
    %233 = tpu.matmul %232, %35, %cst_95 {dimension_numbers = #tpu.dot_dimension_numbers<[1], [0], [0], [1], [0, 0, 1, 1], [], []>} : vector<16x32xf32>, vector<32x32xf32>, vector<16x32xf32> -> vector<16x32xf32>
    %234 = vector.broadcast %169 : vector<1x32xf32> to vector<16x32xf32>
    %235 = arith.addf %233, %234 : vector<16x32xf32>
    %236 = arith.addf %151, %235 : vector<16x32xf32>
    %c8 = arith.constant 8 : index
    %c0_96 = arith.constant 0 : index
    %c0_97 = arith.constant 0 : index
    %237 = vector.load %arg9[%c8, %c0_96, %c0_97] : memref<28x1x32xf32, #tpu.memory_space<vmem>>, vector<1x1x32xf32>
    %238 = vector.shape_cast %237 : vector<1x1x32xf32> to vector<1x32xf32>
    %c9 = arith.constant 9 : index
    %c0_98 = arith.constant 0 : index
    %c0_99 = arith.constant 0 : index
    %239 = vector.load %arg9[%c9, %c0_98, %c0_99] : memref<28x1x32xf32, #tpu.memory_space<vmem>>, vector<1x1x32xf32>
    %240 = vector.shape_cast %239 : vector<1x1x32xf32> to vector<1x32xf32>
    %cst_100 = arith.constant dense<0.000000e+00> : vector<16xf32>
    %241 = vector.multi_reduction <add>, %236, %cst_100 [1] : vector<16x32xf32> to vector<16xf32>
    %242 = vector.shape_cast %241 : vector<16xf32> to vector<16x1xf32>
    %cst_101 = arith.constant 3.200000e+01 : f32
    %243 = vector.broadcast %cst_101 : f32 to vector<16x1xf32>
    %244 = arith.divf %242, %243 : vector<16x1xf32>
    %245 = vector.broadcast %244 : vector<16x1xf32> to vector<16x32xf32>
    %246 = arith.subf %236, %245 : vector<16x32xf32>
    %247 = arith.mulf %246, %246 : vector<16x32xf32>
    %cst_102 = arith.constant dense<0.000000e+00> : vector<16xf32>
    %248 = vector.multi_reduction <add>, %247, %cst_102 [1] : vector<16x32xf32> to vector<16xf32>
    %249 = vector.shape_cast %248 : vector<16xf32> to vector<16x1xf32>
    %cst_103 = arith.constant 3.200000e+01 : f32
    %250 = vector.broadcast %cst_103 : f32 to vector<16x1xf32>
    %251 = arith.divf %249, %250 : vector<16x1xf32>
    %252 = vector.broadcast %244 : vector<16x1xf32> to vector<16x32xf32>
    %253 = arith.subf %236, %252 : vector<16x32xf32>
    %cst_104 = arith.constant 9.99999974E-6 : f32
    %254 = vector.broadcast %cst_104 : f32 to vector<16x1xf32>
    %255 = arith.addf %251, %254 : vector<16x1xf32>
    %256 = math.rsqrt %255 : vector<16x1xf32>
    %257 = vector.broadcast %256 : vector<16x1xf32> to vector<16x32xf32>
    %258 = arith.mulf %253, %257 : vector<16x32xf32>
    %259 = vector.broadcast %238 : vector<1x32xf32> to vector<16x32xf32>
    %260 = arith.mulf %258, %259 : vector<16x32xf32>
    %261 = vector.broadcast %240 : vector<1x32xf32> to vector<16x32xf32>
    %262 = arith.addf %260, %261 : vector<16x32xf32>
    %cst_105 = arith.constant dense<0.000000e+00> : vector<16x64xf32>
    %263 = tpu.matmul %262, %39, %cst_105 {dimension_numbers = #tpu.dot_dimension_numbers<[1], [0], [0], [1], [0, 0, 1, 1], [], []>} : vector<16x32xf32>, vector<32x64xf32>, vector<16x64xf32> -> vector<16x64xf32>
    %264 = vector.broadcast %43 : vector<1x64xf32> to vector<16x64xf32>
    %265 = arith.addf %263, %264 : vector<16x64xf32>
    %cst_106 = arith.constant 0.000000e+00 : f32
    %266 = vector.broadcast %cst_106 : f32 to vector<16x64xf32>
    %267 = arith.maximumf %265, %266 : vector<16x64xf32>
    %cst_107 = arith.constant dense<0.000000e+00> : vector<16x32xf32>
    %268 = tpu.matmul %267, %45, %cst_107 {dimension_numbers = #tpu.dot_dimension_numbers<[1], [0], [0], [1], [0, 0, 1, 1], [], []>} : vector<16x64xf32>, vector<64x32xf32>, vector<16x32xf32> -> vector<16x32xf32>
    %c12 = arith.constant 12 : index
    %c0_108 = arith.constant 0 : index
    %c0_109 = arith.constant 0 : index
    %269 = vector.load %arg9[%c12, %c0_108, %c0_109] : memref<28x1x32xf32, #tpu.memory_space<vmem>>, vector<1x1x32xf32>
    %270 = vector.shape_cast %269 : vector<1x1x32xf32> to vector<1x32xf32>
    %271 = vector.broadcast %270 : vector<1x32xf32> to vector<16x32xf32>
    %272 = arith.addf %268, %271 : vector<16x32xf32>
    %273 = arith.addf %262, %272 : vector<16x32xf32>
    %c10 = arith.constant 10 : index
    %c0_110 = arith.constant 0 : index
    %c0_111 = arith.constant 0 : index
    %274 = vector.load %arg9[%c10, %c0_110, %c0_111] : memref<28x1x32xf32, #tpu.memory_space<vmem>>, vector<1x1x32xf32>
    %275 = vector.shape_cast %274 : vector<1x1x32xf32> to vector<1x32xf32>
    %c11 = arith.constant 11 : index
    %c0_112 = arith.constant 0 : index
    %c0_113 = arith.constant 0 : index
    %276 = vector.load %arg9[%c11, %c0_112, %c0_113] : memref<28x1x32xf32, #tpu.memory_space<vmem>>, vector<1x1x32xf32>
    %277 = vector.shape_cast %276 : vector<1x1x32xf32> to vector<1x32xf32>
    %cst_114 = arith.constant dense<0.000000e+00> : vector<16xf32>
    %278 = vector.multi_reduction <add>, %273, %cst_114 [1] : vector<16x32xf32> to vector<16xf32>
    %279 = vector.shape_cast %278 : vector<16xf32> to vector<16x1xf32>
    %cst_115 = arith.constant 3.200000e+01 : f32
    %280 = vector.broadcast %cst_115 : f32 to vector<16x1xf32>
    %281 = arith.divf %279, %280 : vector<16x1xf32>
    %282 = vector.broadcast %281 : vector<16x1xf32> to vector<16x32xf32>
    %283 = arith.subf %273, %282 : vector<16x32xf32>
    %284 = arith.mulf %283, %283 : vector<16x32xf32>
    %cst_116 = arith.constant dense<0.000000e+00> : vector<16xf32>
    %285 = vector.multi_reduction <add>, %284, %cst_116 [1] : vector<16x32xf32> to vector<16xf32>
    %286 = vector.shape_cast %285 : vector<16xf32> to vector<16x1xf32>
    %cst_117 = arith.constant 3.200000e+01 : f32
    %287 = vector.broadcast %cst_117 : f32 to vector<16x1xf32>
    %288 = arith.divf %286, %287 : vector<16x1xf32>
    %289 = vector.broadcast %281 : vector<16x1xf32> to vector<16x32xf32>
    %290 = arith.subf %273, %289 : vector<16x32xf32>
    %cst_118 = arith.constant 9.99999974E-6 : f32
    %291 = vector.broadcast %cst_118 : f32 to vector<16x1xf32>
    %292 = arith.addf %288, %291 : vector<16x1xf32>
    %293 = math.rsqrt %292 : vector<16x1xf32>
    %294 = vector.broadcast %293 : vector<16x1xf32> to vector<16x32xf32>
    %295 = arith.mulf %290, %294 : vector<16x32xf32>
    %296 = vector.broadcast %275 : vector<1x32xf32> to vector<16x32xf32>
    %297 = arith.mulf %295, %296 : vector<16x32xf32>
    %298 = vector.broadcast %277 : vector<1x32xf32> to vector<16x32xf32>
    %299 = arith.addf %297, %298 : vector<16x32xf32>
    %c6_119 = arith.constant 6 : index
    %c0_120 = arith.constant 0 : index
    %c0_121 = arith.constant 0 : index
    %300 = vector.load %arg5[%c6_119, %c0_120, %c0_121] : memref<12x32x32xf32, #tpu.memory_space<vmem>>, vector<1x32x32xf32>
    %301 = vector.shape_cast %300 : vector<1x32x32xf32> to vector<32x32xf32>
    %c7_122 = arith.constant 7 : index
    %c0_123 = arith.constant 0 : index
    %c0_124 = arith.constant 0 : index
    %302 = vector.load %arg5[%c7_122, %c0_123, %c0_124] : memref<12x32x32xf32, #tpu.memory_space<vmem>>, vector<1x32x32xf32>
    %303 = vector.shape_cast %302 : vector<1x32x32xf32> to vector<32x32xf32>
    %c8_125 = arith.constant 8 : index
    %c0_126 = arith.constant 0 : index
    %c0_127 = arith.constant 0 : index
    %304 = vector.load %arg5[%c8_125, %c0_126, %c0_127] : memref<12x32x32xf32, #tpu.memory_space<vmem>>, vector<1x32x32xf32>
    %305 = vector.shape_cast %304 : vector<1x32x32xf32> to vector<32x32xf32>
    %c9_128 = arith.constant 9 : index
    %c0_129 = arith.constant 0 : index
    %c0_130 = arith.constant 0 : index
    %306 = vector.load %arg5[%c9_128, %c0_129, %c0_130] : memref<12x32x32xf32, #tpu.memory_space<vmem>>, vector<1x32x32xf32>
    %307 = vector.shape_cast %306 : vector<1x32x32xf32> to vector<32x32xf32>
    %c10_131 = arith.constant 10 : index
    %c0_132 = arith.constant 0 : index
    %c0_133 = arith.constant 0 : index
    %308 = vector.load %arg5[%c10_131, %c0_132, %c0_133] : memref<12x32x32xf32, #tpu.memory_space<vmem>>, vector<1x32x32xf32>
    %309 = vector.shape_cast %308 : vector<1x32x32xf32> to vector<32x32xf32>
    %c11_134 = arith.constant 11 : index
    %c0_135 = arith.constant 0 : index
    %c0_136 = arith.constant 0 : index
    %310 = vector.load %arg5[%c11_134, %c0_135, %c0_136] : memref<12x32x32xf32, #tpu.memory_space<vmem>>, vector<1x32x32xf32>
    %311 = vector.shape_cast %310 : vector<1x32x32xf32> to vector<32x32xf32>
    %c2_137 = arith.constant 2 : index
    %c0_138 = arith.constant 0 : index
    %c0_139 = arith.constant 0 : index
    %312 = vector.load %arg6[%c2_137, %c0_138, %c0_139] : memref<4x32x64xf32, #tpu.memory_space<vmem>>, vector<1x32x64xf32>
    %313 = vector.shape_cast %312 : vector<1x32x64xf32> to vector<32x64xf32>
    %c3_140 = arith.constant 3 : index
    %c0_141 = arith.constant 0 : index
    %c0_142 = arith.constant 0 : index
    %314 = vector.load %arg6[%c3_140, %c0_141, %c0_142] : memref<4x32x64xf32, #tpu.memory_space<vmem>>, vector<1x32x64xf32>
    %315 = vector.shape_cast %314 : vector<1x32x64xf32> to vector<32x64xf32>
    %c2_143 = arith.constant 2 : index
    %c0_144 = arith.constant 0 : index
    %c0_145 = arith.constant 0 : index
    %316 = vector.load %arg8[%c2_143, %c0_144, %c0_145] : memref<4x1x64xf32, #tpu.memory_space<vmem>>, vector<1x1x64xf32>
    %317 = vector.shape_cast %316 : vector<1x1x64xf32> to vector<1x64xf32>
    %c3_146 = arith.constant 3 : index
    %c0_147 = arith.constant 0 : index
    %c0_148 = arith.constant 0 : index
    %318 = vector.load %arg8[%c3_146, %c0_147, %c0_148] : memref<4x1x64xf32, #tpu.memory_space<vmem>>, vector<1x1x64xf32>
    %319 = vector.shape_cast %318 : vector<1x1x64xf32> to vector<1x64xf32>
    %c1_149 = arith.constant 1 : index
    %c0_150 = arith.constant 0 : index
    %c0_151 = arith.constant 0 : index
    %320 = vector.load %arg7[%c1_149, %c0_150, %c0_151] : memref<2x64x32xf32, #tpu.memory_space<vmem>>, vector<1x64x32xf32>
    %321 = vector.shape_cast %320 : vector<1x64x32xf32> to vector<64x32xf32>
    %322 = arith.addf %299, %12 : vector<16x32xf32>
    %cst_152 = arith.constant dense<0.000000e+00> : vector<16x64xf32>
    %323 = tpu.matmul %322, %313, %cst_152 {dimension_numbers = #tpu.dot_dimension_numbers<[1], [0], [0], [1], [0, 0, 1, 1], [], []>} : vector<16x32xf32>, vector<32x64xf32>, vector<16x64xf32> -> vector<16x64xf32>
    %324 = vector.broadcast %317 : vector<1x64xf32> to vector<16x64xf32>
    %325 = arith.addf %323, %324 : vector<16x64xf32>
    %cst_153 = arith.constant dense<0.000000e+00> : vector<16x32xf32>
    %326 = tpu.matmul %299, %301, %cst_153 {dimension_numbers = #tpu.dot_dimension_numbers<[1], [0], [0], [1], [0, 0, 1, 1], [], []>} : vector<16x32xf32>, vector<32x32xf32>, vector<16x32xf32> -> vector<16x32xf32>
    %c13 = arith.constant 13 : index
    %c0_154 = arith.constant 0 : index
    %c0_155 = arith.constant 0 : index
    %327 = vector.load %arg9[%c13, %c0_154, %c0_155] : memref<28x1x32xf32, #tpu.memory_space<vmem>>, vector<1x1x32xf32>
    %328 = vector.shape_cast %327 : vector<1x1x32xf32> to vector<1x32xf32>
    %329 = vector.broadcast %328 : vector<1x32xf32> to vector<16x32xf32>
    %330 = arith.addf %326, %329 : vector<16x32xf32>
    %331 = vector.extract_strided_slice %325 {offsets = [0, 0], sizes = [16, 32], strides = [1, 1]} : vector<16x64xf32> to vector<16x32xf32>
    %332 = vector.extract_strided_slice %325 {offsets = [0, 32], sizes = [16, 32], strides = [1, 1]} : vector<16x64xf32> to vector<16x32xf32>
    %c14 = arith.constant 14 : index
    %c0_156 = arith.constant 0 : index
    %c0_157 = arith.constant 0 : index
    %333 = vector.load %arg9[%c14, %c0_156, %c0_157] : memref<28x1x32xf32, #tpu.memory_space<vmem>>, vector<1x1x32xf32>
    %334 = vector.shape_cast %333 : vector<1x1x32xf32> to vector<1x32xf32>
    %335 = vector.shape_cast %331 : vector<16x32xf32> to vector<2x8x32xf32>
    %336 = vector.shape_cast %332 : vector<16x32xf32> to vector<2x8x32xf32>
    %337 = vector.shape_cast %330 : vector<16x32xf32> to vector<2x8x32xf32>
    %338 = vector.extract_strided_slice %2 {offsets = [0, 0, 0], sizes = [1, 1, 32], strides = [1, 1, 1]} : vector<4x1x32xf32> to vector<1x1x32xf32>
    %339 = vector.shape_cast %338 : vector<1x1x32xf32> to vector<1x32xf32>
    %340 = vector.shape_cast %339 : vector<1x32xf32> to vector<1x1x32xf32>
    %341 = vector.broadcast %340 : vector<1x1x32xf32> to vector<2x8x32xf32>
    %342 = arith.mulf %335, %341 : vector<2x8x32xf32>
    %343 = vector.extract_strided_slice %2 {offsets = [1, 0, 0], sizes = [1, 1, 32], strides = [1, 1, 1]} : vector<4x1x32xf32> to vector<1x1x32xf32>
    %344 = vector.shape_cast %343 : vector<1x1x32xf32> to vector<1x32xf32>
    %345 = vector.shape_cast %344 : vector<1x32xf32> to vector<1x1x32xf32>
    %346 = vector.broadcast %345 : vector<1x1x32xf32> to vector<2x8x32xf32>
    %347 = arith.mulf %335, %346 : vector<2x8x32xf32>
    %348 = vector.extract_strided_slice %2 {offsets = [2, 0, 0], sizes = [1, 1, 32], strides = [1, 1, 1]} : vector<4x1x32xf32> to vector<1x1x32xf32>
    %349 = vector.shape_cast %348 : vector<1x1x32xf32> to vector<1x32xf32>
    %350 = vector.shape_cast %349 : vector<1x32xf32> to vector<1x1x32xf32>
    %351 = vector.broadcast %350 : vector<1x1x32xf32> to vector<2x8x32xf32>
    %352 = arith.mulf %335, %351 : vector<2x8x32xf32>
    %353 = vector.extract_strided_slice %2 {offsets = [3, 0, 0], sizes = [1, 1, 32], strides = [1, 1, 1]} : vector<4x1x32xf32> to vector<1x1x32xf32>
    %354 = vector.shape_cast %353 : vector<1x1x32xf32> to vector<1x32xf32>
    %355 = vector.shape_cast %354 : vector<1x32xf32> to vector<1x1x32xf32>
    %356 = vector.broadcast %355 : vector<1x1x32xf32> to vector<2x8x32xf32>
    %357 = arith.mulf %335, %356 : vector<2x8x32xf32>
    %358 = tpu.concatenate %342, %347, %352, %357 in 1 : vector<2x8x32xf32>, vector<2x8x32xf32>, vector<2x8x32xf32>, vector<2x8x32xf32> -> vector<2x32x32xf32>
    "tpu.trace_start"() <{level = 10 : i32, message = "bqd,bkd->bqk"}> : () -> ()
    %cst_158 = arith.constant dense<0.000000e+00> : vector<2x32x8xf32>
    %359 = tpu.matmul %358, %336, %cst_158 {dimension_numbers = #tpu.dot_dimension_numbers<[2], [2], [1], [1], [0, 0, 0, 1, 1, 1], [0], [0]>} : vector<2x32x32xf32>, vector<2x8x32xf32>, vector<2x32x8xf32> -> vector<2x32x8xf32>
    "tpu.trace_stop"() : () -> ()
    %cst_159 = arith.constant dense<0xFF800000> : vector<2x32xf32>
    %360 = vector.multi_reduction <maximumf>, %359, %cst_159 [2] : vector<2x32x8xf32> to vector<2x32xf32>
    %361 = vector.shape_cast %360 : vector<2x32xf32> to vector<2x32x1xf32>
    %362 = vector.broadcast %361 : vector<2x32x1xf32> to vector<2x32x8xf32>
    %363 = arith.subf %359, %362 : vector<2x32x8xf32>
    %364 = math.exp %363 : vector<2x32x8xf32>
    %cst_160 = arith.constant dense<0.000000e+00> : vector<2x32xf32>
    %365 = vector.multi_reduction <add>, %364, %cst_160 [2] : vector<2x32x8xf32> to vector<2x32xf32>
    %366 = vector.shape_cast %365 : vector<2x32xf32> to vector<2x32x1xf32>
    %367 = vector.broadcast %366 : vector<2x32x1xf32> to vector<2x32x8xf32>
    %368 = arith.divf %364, %367 : vector<2x32x8xf32>
    "tpu.trace_start"() <{level = 10 : i32, message = "bqk,bkd->bqd"}> : () -> ()
    %cst_161 = arith.constant dense<0.000000e+00> : vector<2x32x32xf32>
    %369 = tpu.matmul %368, %337, %cst_161 {dimension_numbers = #tpu.dot_dimension_numbers<[2], [1], [1], [2], [0, 0, 0, 1, 1, 2], [0], [0]>} : vector<2x32x8xf32>, vector<2x8x32xf32>, vector<2x32x32xf32> -> vector<2x32x32xf32>
    "tpu.trace_stop"() : () -> ()
    %370 = vector.extract_strided_slice %369 {offsets = [0, 0, 0], sizes = [2, 8, 32], strides = [1, 1, 1]} : vector<2x32x32xf32> to vector<2x8x32xf32>
    %371 = vector.extract_strided_slice %0 {offsets = [0, 0, 0], sizes = [1, 1, 32], strides = [1, 1, 1]} : vector<4x1x32xf32> to vector<1x1x32xf32>
    %372 = vector.shape_cast %371 : vector<1x1x32xf32> to vector<1x32xf32>
    %373 = vector.shape_cast %372 : vector<1x32xf32> to vector<1x1x32xf32>
    %374 = vector.broadcast %373 : vector<1x1x32xf32> to vector<2x8x32xf32>
    %375 = arith.mulf %370, %374 : vector<2x8x32xf32>
    %376 = vector.extract_strided_slice %369 {offsets = [0, 8, 0], sizes = [2, 8, 32], strides = [1, 1, 1]} : vector<2x32x32xf32> to vector<2x8x32xf32>
    %377 = vector.extract_strided_slice %0 {offsets = [1, 0, 0], sizes = [1, 1, 32], strides = [1, 1, 1]} : vector<4x1x32xf32> to vector<1x1x32xf32>
    %378 = vector.shape_cast %377 : vector<1x1x32xf32> to vector<1x32xf32>
    %379 = vector.shape_cast %378 : vector<1x32xf32> to vector<1x1x32xf32>
    %380 = vector.broadcast %379 : vector<1x1x32xf32> to vector<2x8x32xf32>
    %381 = arith.mulf %376, %380 : vector<2x8x32xf32>
    %382 = arith.addf %375, %381 : vector<2x8x32xf32>
    %383 = vector.extract_strided_slice %369 {offsets = [0, 16, 0], sizes = [2, 8, 32], strides = [1, 1, 1]} : vector<2x32x32xf32> to vector<2x8x32xf32>
    %384 = vector.extract_strided_slice %0 {offsets = [2, 0, 0], sizes = [1, 1, 32], strides = [1, 1, 1]} : vector<4x1x32xf32> to vector<1x1x32xf32>
    %385 = vector.shape_cast %384 : vector<1x1x32xf32> to vector<1x32xf32>
    %386 = vector.shape_cast %385 : vector<1x32xf32> to vector<1x1x32xf32>
    %387 = vector.broadcast %386 : vector<1x1x32xf32> to vector<2x8x32xf32>
    %388 = arith.mulf %383, %387 : vector<2x8x32xf32>
    %389 = arith.addf %382, %388 : vector<2x8x32xf32>
    %390 = vector.extract_strided_slice %369 {offsets = [0, 24, 0], sizes = [2, 8, 32], strides = [1, 1, 1]} : vector<2x32x32xf32> to vector<2x8x32xf32>
    %391 = vector.extract_strided_slice %0 {offsets = [3, 0, 0], sizes = [1, 1, 32], strides = [1, 1, 1]} : vector<4x1x32xf32> to vector<1x1x32xf32>
    %392 = vector.shape_cast %391 : vector<1x1x32xf32> to vector<1x32xf32>
    %393 = vector.shape_cast %392 : vector<1x32xf32> to vector<1x1x32xf32>
    %394 = vector.broadcast %393 : vector<1x1x32xf32> to vector<2x8x32xf32>
    %395 = arith.mulf %390, %394 : vector<2x8x32xf32>
    %396 = arith.addf %389, %395 : vector<2x8x32xf32>
    %397 = vector.shape_cast %396 : vector<2x8x32xf32> to vector<16x32xf32>
    %cst_162 = arith.constant dense<0.000000e+00> : vector<16x32xf32>
    %398 = tpu.matmul %397, %303, %cst_162 {dimension_numbers = #tpu.dot_dimension_numbers<[1], [0], [0], [1], [0, 0, 1, 1], [], []>} : vector<16x32xf32>, vector<32x32xf32>, vector<16x32xf32> -> vector<16x32xf32>
    %399 = vector.broadcast %334 : vector<1x32xf32> to vector<16x32xf32>
    %400 = arith.addf %398, %399 : vector<16x32xf32>
    %401 = arith.addf %299, %400 : vector<16x32xf32>
    %c19 = arith.constant 19 : index
    %c0_163 = arith.constant 0 : index
    %c0_164 = arith.constant 0 : index
    %402 = vector.load %arg9[%c19, %c0_163, %c0_164] : memref<28x1x32xf32, #tpu.memory_space<vmem>>, vector<1x1x32xf32>
    %403 = vector.shape_cast %402 : vector<1x1x32xf32> to vector<1x32xf32>
    %c20 = arith.constant 20 : index
    %c0_165 = arith.constant 0 : index
    %c0_166 = arith.constant 0 : index
    %404 = vector.load %arg9[%c20, %c0_165, %c0_166] : memref<28x1x32xf32, #tpu.memory_space<vmem>>, vector<1x1x32xf32>
    %405 = vector.shape_cast %404 : vector<1x1x32xf32> to vector<1x32xf32>
    %cst_167 = arith.constant dense<0.000000e+00> : vector<16xf32>
    %406 = vector.multi_reduction <add>, %401, %cst_167 [1] : vector<16x32xf32> to vector<16xf32>
    %407 = vector.shape_cast %406 : vector<16xf32> to vector<16x1xf32>
    %cst_168 = arith.constant 3.200000e+01 : f32
    %408 = vector.broadcast %cst_168 : f32 to vector<16x1xf32>
    %409 = arith.divf %407, %408 : vector<16x1xf32>
    %410 = vector.broadcast %409 : vector<16x1xf32> to vector<16x32xf32>
    %411 = arith.subf %401, %410 : vector<16x32xf32>
    %412 = arith.mulf %411, %411 : vector<16x32xf32>
    %cst_169 = arith.constant dense<0.000000e+00> : vector<16xf32>
    %413 = vector.multi_reduction <add>, %412, %cst_169 [1] : vector<16x32xf32> to vector<16xf32>
    %414 = vector.shape_cast %413 : vector<16xf32> to vector<16x1xf32>
    %cst_170 = arith.constant 3.200000e+01 : f32
    %415 = vector.broadcast %cst_170 : f32 to vector<16x1xf32>
    %416 = arith.divf %414, %415 : vector<16x1xf32>
    %417 = vector.broadcast %409 : vector<16x1xf32> to vector<16x32xf32>
    %418 = arith.subf %401, %417 : vector<16x32xf32>
    %cst_171 = arith.constant 9.99999974E-6 : f32
    %419 = vector.broadcast %cst_171 : f32 to vector<16x1xf32>
    %420 = arith.addf %416, %419 : vector<16x1xf32>
    %421 = math.rsqrt %420 : vector<16x1xf32>
    %422 = vector.broadcast %421 : vector<16x1xf32> to vector<16x32xf32>
    %423 = arith.mulf %418, %422 : vector<16x32xf32>
    %424 = vector.broadcast %403 : vector<1x32xf32> to vector<16x32xf32>
    %425 = arith.mulf %423, %424 : vector<16x32xf32>
    %426 = vector.broadcast %405 : vector<1x32xf32> to vector<16x32xf32>
    %427 = arith.addf %425, %426 : vector<16x32xf32>
    %428 = arith.addf %427, %12 : vector<16x32xf32>
    %cst_172 = arith.constant dense<0.000000e+00> : vector<16x32xf32>
    %429 = tpu.matmul %428, %305, %cst_172 {dimension_numbers = #tpu.dot_dimension_numbers<[1], [0], [0], [1], [0, 0, 1, 1], [], []>} : vector<16x32xf32>, vector<32x32xf32>, vector<16x32xf32> -> vector<16x32xf32>
    %c15 = arith.constant 15 : index
    %c0_173 = arith.constant 0 : index
    %c0_174 = arith.constant 0 : index
    %430 = vector.load %arg9[%c15, %c0_173, %c0_174] : memref<28x1x32xf32, #tpu.memory_space<vmem>>, vector<1x1x32xf32>
    %431 = vector.shape_cast %430 : vector<1x1x32xf32> to vector<1x32xf32>
    %432 = vector.broadcast %431 : vector<1x32xf32> to vector<16x32xf32>
    %433 = arith.addf %429, %432 : vector<16x32xf32>
    %cst_175 = arith.constant dense<0.000000e+00> : vector<32x32xf32>
    %434 = tpu.matmul %23, %307, %cst_175 {dimension_numbers = #tpu.dot_dimension_numbers<[1], [0], [0], [1], [0, 0, 1, 1], [], []>} : vector<32x32xf32>, vector<32x32xf32>, vector<32x32xf32> -> vector<32x32xf32>
    %c16 = arith.constant 16 : index
    %c0_176 = arith.constant 0 : index
    %c0_177 = arith.constant 0 : index
    %435 = vector.load %arg9[%c16, %c0_176, %c0_177] : memref<28x1x32xf32, #tpu.memory_space<vmem>>, vector<1x1x32xf32>
    %436 = vector.shape_cast %435 : vector<1x1x32xf32> to vector<1x32xf32>
    %437 = vector.broadcast %436 : vector<1x32xf32> to vector<32x32xf32>
    %438 = arith.addf %434, %437 : vector<32x32xf32>
    %cst_178 = arith.constant dense<0.000000e+00> : vector<32x32xf32>
    %439 = tpu.matmul %17, %309, %cst_178 {dimension_numbers = #tpu.dot_dimension_numbers<[1], [0], [0], [1], [0, 0, 1, 1], [], []>} : vector<32x32xf32>, vector<32x32xf32>, vector<32x32xf32> -> vector<32x32xf32>
    %c17 = arith.constant 17 : index
    %c0_179 = arith.constant 0 : index
    %c0_180 = arith.constant 0 : index
    %440 = vector.load %arg9[%c17, %c0_179, %c0_180] : memref<28x1x32xf32, #tpu.memory_space<vmem>>, vector<1x1x32xf32>
    %441 = vector.shape_cast %440 : vector<1x1x32xf32> to vector<1x32xf32>
    %442 = vector.broadcast %441 : vector<1x32xf32> to vector<32x32xf32>
    %443 = arith.addf %439, %442 : vector<32x32xf32>
    %c18 = arith.constant 18 : index
    %c0_181 = arith.constant 0 : index
    %c0_182 = arith.constant 0 : index
    %444 = vector.load %arg9[%c18, %c0_181, %c0_182] : memref<28x1x32xf32, #tpu.memory_space<vmem>>, vector<1x1x32xf32>
    %445 = vector.shape_cast %444 : vector<1x1x32xf32> to vector<1x32xf32>
    %446 = vector.shape_cast %433 : vector<16x32xf32> to vector<2x8x32xf32>
    %447 = vector.shape_cast %438 : vector<32x32xf32> to vector<2x16x32xf32>
    %448 = vector.shape_cast %443 : vector<32x32xf32> to vector<2x16x32xf32>
    %449 = vector.extract_strided_slice %2 {offsets = [0, 0, 0], sizes = [1, 1, 32], strides = [1, 1, 1]} : vector<4x1x32xf32> to vector<1x1x32xf32>
    %450 = vector.shape_cast %449 : vector<1x1x32xf32> to vector<1x32xf32>
    %451 = vector.shape_cast %450 : vector<1x32xf32> to vector<1x1x32xf32>
    %452 = vector.broadcast %451 : vector<1x1x32xf32> to vector<2x8x32xf32>
    %453 = arith.mulf %446, %452 : vector<2x8x32xf32>
    %454 = vector.extract_strided_slice %2 {offsets = [1, 0, 0], sizes = [1, 1, 32], strides = [1, 1, 1]} : vector<4x1x32xf32> to vector<1x1x32xf32>
    %455 = vector.shape_cast %454 : vector<1x1x32xf32> to vector<1x32xf32>
    %456 = vector.shape_cast %455 : vector<1x32xf32> to vector<1x1x32xf32>
    %457 = vector.broadcast %456 : vector<1x1x32xf32> to vector<2x8x32xf32>
    %458 = arith.mulf %446, %457 : vector<2x8x32xf32>
    %459 = vector.extract_strided_slice %2 {offsets = [2, 0, 0], sizes = [1, 1, 32], strides = [1, 1, 1]} : vector<4x1x32xf32> to vector<1x1x32xf32>
    %460 = vector.shape_cast %459 : vector<1x1x32xf32> to vector<1x32xf32>
    %461 = vector.shape_cast %460 : vector<1x32xf32> to vector<1x1x32xf32>
    %462 = vector.broadcast %461 : vector<1x1x32xf32> to vector<2x8x32xf32>
    %463 = arith.mulf %446, %462 : vector<2x8x32xf32>
    %464 = vector.extract_strided_slice %2 {offsets = [3, 0, 0], sizes = [1, 1, 32], strides = [1, 1, 1]} : vector<4x1x32xf32> to vector<1x1x32xf32>
    %465 = vector.shape_cast %464 : vector<1x1x32xf32> to vector<1x32xf32>
    %466 = vector.shape_cast %465 : vector<1x32xf32> to vector<1x1x32xf32>
    %467 = vector.broadcast %466 : vector<1x1x32xf32> to vector<2x8x32xf32>
    %468 = arith.mulf %446, %467 : vector<2x8x32xf32>
    %469 = tpu.concatenate %453, %458, %463, %468 in 1 : vector<2x8x32xf32>, vector<2x8x32xf32>, vector<2x8x32xf32>, vector<2x8x32xf32> -> vector<2x32x32xf32>
    "tpu.trace_start"() <{level = 10 : i32, message = "bqd,bkd->bqk"}> : () -> ()
    %cst_183 = arith.constant dense<0.000000e+00> : vector<2x32x16xf32>
    %470 = tpu.matmul %469, %447, %cst_183 {dimension_numbers = #tpu.dot_dimension_numbers<[2], [2], [1], [1], [0, 0, 0, 1, 1, 1], [0], [0]>} : vector<2x32x32xf32>, vector<2x16x32xf32>, vector<2x32x16xf32> -> vector<2x32x16xf32>
    "tpu.trace_stop"() : () -> ()
    %cst_184 = arith.constant dense<0xFF800000> : vector<2x32xf32>
    %471 = vector.multi_reduction <maximumf>, %470, %cst_184 [2] : vector<2x32x16xf32> to vector<2x32xf32>
    %472 = vector.shape_cast %471 : vector<2x32xf32> to vector<2x32x1xf32>
    %473 = vector.broadcast %472 : vector<2x32x1xf32> to vector<2x32x16xf32>
    %474 = arith.subf %470, %473 : vector<2x32x16xf32>
    %475 = math.exp %474 : vector<2x32x16xf32>
    %cst_185 = arith.constant dense<0.000000e+00> : vector<2x32xf32>
    %476 = vector.multi_reduction <add>, %475, %cst_185 [2] : vector<2x32x16xf32> to vector<2x32xf32>
    %477 = vector.shape_cast %476 : vector<2x32xf32> to vector<2x32x1xf32>
    %478 = vector.broadcast %477 : vector<2x32x1xf32> to vector<2x32x16xf32>
    %479 = arith.divf %475, %478 : vector<2x32x16xf32>
    "tpu.trace_start"() <{level = 10 : i32, message = "bqk,bkd->bqd"}> : () -> ()
    %cst_186 = arith.constant dense<0.000000e+00> : vector<2x32x32xf32>
    %480 = tpu.matmul %479, %448, %cst_186 {dimension_numbers = #tpu.dot_dimension_numbers<[2], [1], [1], [2], [0, 0, 0, 1, 1, 2], [0], [0]>} : vector<2x32x16xf32>, vector<2x16x32xf32>, vector<2x32x32xf32> -> vector<2x32x32xf32>
    "tpu.trace_stop"() : () -> ()
    %481 = vector.extract_strided_slice %480 {offsets = [0, 0, 0], sizes = [2, 8, 32], strides = [1, 1, 1]} : vector<2x32x32xf32> to vector<2x8x32xf32>
    %482 = vector.extract_strided_slice %0 {offsets = [0, 0, 0], sizes = [1, 1, 32], strides = [1, 1, 1]} : vector<4x1x32xf32> to vector<1x1x32xf32>
    %483 = vector.shape_cast %482 : vector<1x1x32xf32> to vector<1x32xf32>
    %484 = vector.shape_cast %483 : vector<1x32xf32> to vector<1x1x32xf32>
    %485 = vector.broadcast %484 : vector<1x1x32xf32> to vector<2x8x32xf32>
    %486 = arith.mulf %481, %485 : vector<2x8x32xf32>
    %487 = vector.extract_strided_slice %480 {offsets = [0, 8, 0], sizes = [2, 8, 32], strides = [1, 1, 1]} : vector<2x32x32xf32> to vector<2x8x32xf32>
    %488 = vector.extract_strided_slice %0 {offsets = [1, 0, 0], sizes = [1, 1, 32], strides = [1, 1, 1]} : vector<4x1x32xf32> to vector<1x1x32xf32>
    %489 = vector.shape_cast %488 : vector<1x1x32xf32> to vector<1x32xf32>
    %490 = vector.shape_cast %489 : vector<1x32xf32> to vector<1x1x32xf32>
    %491 = vector.broadcast %490 : vector<1x1x32xf32> to vector<2x8x32xf32>
    %492 = arith.mulf %487, %491 : vector<2x8x32xf32>
    %493 = arith.addf %486, %492 : vector<2x8x32xf32>
    %494 = vector.extract_strided_slice %480 {offsets = [0, 16, 0], sizes = [2, 8, 32], strides = [1, 1, 1]} : vector<2x32x32xf32> to vector<2x8x32xf32>
    %495 = vector.extract_strided_slice %0 {offsets = [2, 0, 0], sizes = [1, 1, 32], strides = [1, 1, 1]} : vector<4x1x32xf32> to vector<1x1x32xf32>
    %496 = vector.shape_cast %495 : vector<1x1x32xf32> to vector<1x32xf32>
    %497 = vector.shape_cast %496 : vector<1x32xf32> to vector<1x1x32xf32>
    %498 = vector.broadcast %497 : vector<1x1x32xf32> to vector<2x8x32xf32>
    %499 = arith.mulf %494, %498 : vector<2x8x32xf32>
    %500 = arith.addf %493, %499 : vector<2x8x32xf32>
    %501 = vector.extract_strided_slice %480 {offsets = [0, 24, 0], sizes = [2, 8, 32], strides = [1, 1, 1]} : vector<2x32x32xf32> to vector<2x8x32xf32>
    %502 = vector.extract_strided_slice %0 {offsets = [3, 0, 0], sizes = [1, 1, 32], strides = [1, 1, 1]} : vector<4x1x32xf32> to vector<1x1x32xf32>
    %503 = vector.shape_cast %502 : vector<1x1x32xf32> to vector<1x32xf32>
    %504 = vector.shape_cast %503 : vector<1x32xf32> to vector<1x1x32xf32>
    %505 = vector.broadcast %504 : vector<1x1x32xf32> to vector<2x8x32xf32>
    %506 = arith.mulf %501, %505 : vector<2x8x32xf32>
    %507 = arith.addf %500, %506 : vector<2x8x32xf32>
    %508 = vector.shape_cast %507 : vector<2x8x32xf32> to vector<16x32xf32>
    %cst_187 = arith.constant dense<0.000000e+00> : vector<16x32xf32>
    %509 = tpu.matmul %508, %311, %cst_187 {dimension_numbers = #tpu.dot_dimension_numbers<[1], [0], [0], [1], [0, 0, 1, 1], [], []>} : vector<16x32xf32>, vector<32x32xf32>, vector<16x32xf32> -> vector<16x32xf32>
    %510 = vector.broadcast %445 : vector<1x32xf32> to vector<16x32xf32>
    %511 = arith.addf %509, %510 : vector<16x32xf32>
    %512 = arith.addf %427, %511 : vector<16x32xf32>
    %c21 = arith.constant 21 : index
    %c0_188 = arith.constant 0 : index
    %c0_189 = arith.constant 0 : index
    %513 = vector.load %arg9[%c21, %c0_188, %c0_189] : memref<28x1x32xf32, #tpu.memory_space<vmem>>, vector<1x1x32xf32>
    %514 = vector.shape_cast %513 : vector<1x1x32xf32> to vector<1x32xf32>
    %c22 = arith.constant 22 : index
    %c0_190 = arith.constant 0 : index
    %c0_191 = arith.constant 0 : index
    %515 = vector.load %arg9[%c22, %c0_190, %c0_191] : memref<28x1x32xf32, #tpu.memory_space<vmem>>, vector<1x1x32xf32>
    %516 = vector.shape_cast %515 : vector<1x1x32xf32> to vector<1x32xf32>
    %cst_192 = arith.constant dense<0.000000e+00> : vector<16xf32>
    %517 = vector.multi_reduction <add>, %512, %cst_192 [1] : vector<16x32xf32> to vector<16xf32>
    %518 = vector.shape_cast %517 : vector<16xf32> to vector<16x1xf32>
    %cst_193 = arith.constant 3.200000e+01 : f32
    %519 = vector.broadcast %cst_193 : f32 to vector<16x1xf32>
    %520 = arith.divf %518, %519 : vector<16x1xf32>
    %521 = vector.broadcast %520 : vector<16x1xf32> to vector<16x32xf32>
    %522 = arith.subf %512, %521 : vector<16x32xf32>
    %523 = arith.mulf %522, %522 : vector<16x32xf32>
    %cst_194 = arith.constant dense<0.000000e+00> : vector<16xf32>
    %524 = vector.multi_reduction <add>, %523, %cst_194 [1] : vector<16x32xf32> to vector<16xf32>
    %525 = vector.shape_cast %524 : vector<16xf32> to vector<16x1xf32>
    %cst_195 = arith.constant 3.200000e+01 : f32
    %526 = vector.broadcast %cst_195 : f32 to vector<16x1xf32>
    %527 = arith.divf %525, %526 : vector<16x1xf32>
    %528 = vector.broadcast %520 : vector<16x1xf32> to vector<16x32xf32>
    %529 = arith.subf %512, %528 : vector<16x32xf32>
    %cst_196 = arith.constant 9.99999974E-6 : f32
    %530 = vector.broadcast %cst_196 : f32 to vector<16x1xf32>
    %531 = arith.addf %527, %530 : vector<16x1xf32>
    %532 = math.rsqrt %531 : vector<16x1xf32>
    %533 = vector.broadcast %532 : vector<16x1xf32> to vector<16x32xf32>
    %534 = arith.mulf %529, %533 : vector<16x32xf32>
    %535 = vector.broadcast %514 : vector<1x32xf32> to vector<16x32xf32>
    %536 = arith.mulf %534, %535 : vector<16x32xf32>
    %537 = vector.broadcast %516 : vector<1x32xf32> to vector<16x32xf32>
    %538 = arith.addf %536, %537 : vector<16x32xf32>
    %cst_197 = arith.constant dense<0.000000e+00> : vector<16x64xf32>
    %539 = tpu.matmul %538, %315, %cst_197 {dimension_numbers = #tpu.dot_dimension_numbers<[1], [0], [0], [1], [0, 0, 1, 1], [], []>} : vector<16x32xf32>, vector<32x64xf32>, vector<16x64xf32> -> vector<16x64xf32>
    %540 = vector.broadcast %319 : vector<1x64xf32> to vector<16x64xf32>
    %541 = arith.addf %539, %540 : vector<16x64xf32>
    %cst_198 = arith.constant 0.000000e+00 : f32
    %542 = vector.broadcast %cst_198 : f32 to vector<16x64xf32>
    %543 = arith.maximumf %541, %542 : vector<16x64xf32>
    %cst_199 = arith.constant dense<0.000000e+00> : vector<16x32xf32>
    %544 = tpu.matmul %543, %321, %cst_199 {dimension_numbers = #tpu.dot_dimension_numbers<[1], [0], [0], [1], [0, 0, 1, 1], [], []>} : vector<16x64xf32>, vector<64x32xf32>, vector<16x32xf32> -> vector<16x32xf32>
    %c25 = arith.constant 25 : index
    %c0_200 = arith.constant 0 : index
    %c0_201 = arith.constant 0 : index
    %545 = vector.load %arg9[%c25, %c0_200, %c0_201] : memref<28x1x32xf32, #tpu.memory_space<vmem>>, vector<1x1x32xf32>
    %546 = vector.shape_cast %545 : vector<1x1x32xf32> to vector<1x32xf32>
    %547 = vector.broadcast %546 : vector<1x32xf32> to vector<16x32xf32>
    %548 = arith.addf %544, %547 : vector<16x32xf32>
    %549 = arith.addf %538, %548 : vector<16x32xf32>
    %c23 = arith.constant 23 : index
    %c0_202 = arith.constant 0 : index
    %c0_203 = arith.constant 0 : index
    %550 = vector.load %arg9[%c23, %c0_202, %c0_203] : memref<28x1x32xf32, #tpu.memory_space<vmem>>, vector<1x1x32xf32>
    %551 = vector.shape_cast %550 : vector<1x1x32xf32> to vector<1x32xf32>
    %c24 = arith.constant 24 : index
    %c0_204 = arith.constant 0 : index
    %c0_205 = arith.constant 0 : index
    %552 = vector.load %arg9[%c24, %c0_204, %c0_205] : memref<28x1x32xf32, #tpu.memory_space<vmem>>, vector<1x1x32xf32>
    %553 = vector.shape_cast %552 : vector<1x1x32xf32> to vector<1x32xf32>
    %cst_206 = arith.constant dense<0.000000e+00> : vector<16xf32>
    %554 = vector.multi_reduction <add>, %549, %cst_206 [1] : vector<16x32xf32> to vector<16xf32>
    %555 = vector.shape_cast %554 : vector<16xf32> to vector<16x1xf32>
    %cst_207 = arith.constant 3.200000e+01 : f32
    %556 = vector.broadcast %cst_207 : f32 to vector<16x1xf32>
    %557 = arith.divf %555, %556 : vector<16x1xf32>
    %558 = vector.broadcast %557 : vector<16x1xf32> to vector<16x32xf32>
    %559 = arith.subf %549, %558 : vector<16x32xf32>
    %560 = arith.mulf %559, %559 : vector<16x32xf32>
    %cst_208 = arith.constant dense<0.000000e+00> : vector<16xf32>
    %561 = vector.multi_reduction <add>, %560, %cst_208 [1] : vector<16x32xf32> to vector<16xf32>
    %562 = vector.shape_cast %561 : vector<16xf32> to vector<16x1xf32>
    %cst_209 = arith.constant 3.200000e+01 : f32
    %563 = vector.broadcast %cst_209 : f32 to vector<16x1xf32>
    %564 = arith.divf %562, %563 : vector<16x1xf32>
    %565 = vector.broadcast %557 : vector<16x1xf32> to vector<16x32xf32>
    %566 = arith.subf %549, %565 : vector<16x32xf32>
    %cst_210 = arith.constant 9.99999974E-6 : f32
    %567 = vector.broadcast %cst_210 : f32 to vector<16x1xf32>
    %568 = arith.addf %564, %567 : vector<16x1xf32>
    %569 = math.rsqrt %568 : vector<16x1xf32>
    %570 = vector.broadcast %569 : vector<16x1xf32> to vector<16x32xf32>
    %571 = arith.mulf %566, %570 : vector<16x32xf32>
    %572 = vector.broadcast %551 : vector<1x32xf32> to vector<16x32xf32>
    %573 = arith.mulf %571, %572 : vector<16x32xf32>
    %574 = vector.broadcast %553 : vector<1x32xf32> to vector<16x32xf32>
    %575 = arith.addf %573, %574 : vector<16x32xf32>
    %c26 = arith.constant 26 : index
    %c0_211 = arith.constant 0 : index
    %c0_212 = arith.constant 0 : index
    %576 = vector.load %arg9[%c26, %c0_211, %c0_212] : memref<28x1x32xf32, #tpu.memory_space<vmem>>, vector<1x1x32xf32>
    %577 = vector.shape_cast %576 : vector<1x1x32xf32> to vector<1x32xf32>
    %c27 = arith.constant 27 : index
    %c0_213 = arith.constant 0 : index
    %c0_214 = arith.constant 0 : index
    %578 = vector.load %arg9[%c27, %c0_213, %c0_214] : memref<28x1x32xf32, #tpu.memory_space<vmem>>, vector<1x1x32xf32>
    %579 = vector.shape_cast %578 : vector<1x1x32xf32> to vector<1x32xf32>
    %cst_215 = arith.constant dense<0.000000e+00> : vector<16xf32>
    %580 = vector.multi_reduction <add>, %575, %cst_215 [1] : vector<16x32xf32> to vector<16xf32>
    %581 = vector.shape_cast %580 : vector<16xf32> to vector<16x1xf32>
    %cst_216 = arith.constant 3.200000e+01 : f32
    %582 = vector.broadcast %cst_216 : f32 to vector<16x1xf32>
    %583 = arith.divf %581, %582 : vector<16x1xf32>
    %584 = vector.broadcast %583 : vector<16x1xf32> to vector<16x32xf32>
    %585 = arith.subf %575, %584 : vector<16x32xf32>
    %586 = arith.mulf %585, %585 : vector<16x32xf32>
    %cst_217 = arith.constant dense<0.000000e+00> : vector<16xf32>
    %587 = vector.multi_reduction <add>, %586, %cst_217 [1] : vector<16x32xf32> to vector<16xf32>
    %588 = vector.shape_cast %587 : vector<16xf32> to vector<16x1xf32>
    %cst_218 = arith.constant 3.200000e+01 : f32
    %589 = vector.broadcast %cst_218 : f32 to vector<16x1xf32>
    %590 = arith.divf %588, %589 : vector<16x1xf32>
    %591 = vector.broadcast %583 : vector<16x1xf32> to vector<16x32xf32>
    %592 = arith.subf %575, %591 : vector<16x32xf32>
    %cst_219 = arith.constant 9.99999974E-6 : f32
    %593 = vector.broadcast %cst_219 : f32 to vector<16x1xf32>
    %594 = arith.addf %590, %593 : vector<16x1xf32>
    %595 = math.rsqrt %594 : vector<16x1xf32>
    %596 = vector.broadcast %595 : vector<16x1xf32> to vector<16x32xf32>
    %597 = arith.mulf %592, %596 : vector<16x32xf32>
    %598 = vector.broadcast %577 : vector<1x32xf32> to vector<16x32xf32>
    %599 = arith.mulf %597, %598 : vector<16x32xf32>
    %600 = vector.broadcast %579 : vector<1x32xf32> to vector<16x32xf32>
    %601 = arith.addf %599, %600 : vector<16x32xf32>
    %602 = vector.extract_strided_slice %601 {offsets = [0, 0], sizes = [8, 32], strides = [1, 1]} : vector<16x32xf32> to vector<8x32xf32>
    %c0_220 = arith.constant 0 : index
    %c0_221 = arith.constant 0 : index
    %c0_222 = arith.constant 0 : index
    %c0_223 = arith.constant 0 : index
    %603 = vector.load %arg10[%c0_220, %c0_221, %c0_222, %c0_223] : memref<1x8x2x32xf32, #tpu.memory_space<vmem>>, vector<1x8x1x32xf32>
    %604 = vector.shape_cast %603 : vector<1x8x1x32xf32> to vector<8x32xf32>
    %605 = vector.shape_cast %602 : vector<8x32xf32> to vector<1x8x1x32xf32>
    tpu.vector_store %arg10[%c0_220, %c0_221, %c0_222, %c0_223], %605 {strides = array<i32>} : memref<1x8x2x32xf32, #tpu.memory_space<vmem>>, vector<1x8x1x32xf32>,
    %606 = vector.extract_strided_slice %601 {offsets = [8, 0], sizes = [8, 32], strides = [1, 1]} : vector<16x32xf32> to vector<8x32xf32>
    %c0_224 = arith.constant 0 : index
    %c0_225 = arith.constant 0 : index
    %c1_226 = arith.constant 1 : index
    %c0_227 = arith.constant 0 : index
    %607 = vector.load %arg10[%c0_224, %c0_225, %c1_226, %c0_227] : memref<1x8x2x32xf32, #tpu.memory_space<vmem>>, vector<1x8x1x32xf32>
    %608 = vector.shape_cast %607 : vector<1x8x1x32xf32> to vector<8x32xf32>
    %609 = vector.shape_cast %606 : vector<8x32xf32> to vector<1x8x1x32xf32>
    tpu.vector_store %arg10[%c0_224, %c0_225, %c1_226, %c0_227], %609 {strides = array<i32>} : memref<1x8x2x32xf32, #tpu.memory_space<vmem>>, vector<1x8x1x32xf32>,
    return
  }
}

</mosaic_0001>

<bundles_post_ra>
// kernel: tpu_custom_call.1
= control target key start
LH: loop header
LB: loop body
LE: loop exit
PB: predicated region body
PF: predicated region fallthrough
CT: control target
= control target key end

     0   :  { %15 = vsyncpa [#allocation3], 0  ;;  %s7176_s0 = inlined_call_operand.hbm [shape: f32[8,2,32], index: 0, kind: input, shape index: {}]   ;;  %s7177_s1 = inlined_call_operand.vmem [shape: f32[16,2,32], index: 1, kind: input, shape index: {}]   ;;  %s7178_s2 = inlined_call_operand.hbm [shape: f32[8,2,32], index: 2, kind: input, shape index: {}]   ;;  %s7179_s3 = inlined_call_operand.vmem [shape: f32[16,2,32], index: 3, kind: input, shape index: {}]   ;;  %s7180_s4 = inlined_call_operand.hbm [shape: f32[4,1,32], index: 4, kind: input, shape index: {}]   ;;  %s7181_s5 = inlined_call_operand.hbm [shape: f32[12,32,32], index: 5, kind: input, shape index: {}]   ;;  %s7182_s6 = inlined_call_operand.vmem [shape: f32[4,32,64], index: 6, kind: input, shape index: {}]   ;;  %s7183_s7 = inlined_call_operand.vmem [shape: f32[2,64,32], index: 7, kind: input, shape index: {}]   ;;  %s7184_s8 = inlined_call_operand.hbm [shape: f32[4,1,64], index: 8, kind: input, shape index: {}]   ;;  %s7185_s9 = inlined_call_operand.vmem [shape: f32[28,1,32], index: 9, kind: input, shape index: {}]   ;;  %s7186_s10 = inlined_call_operand.hbm [shape: f32[1,8,2,32], index: 10, kind: output, shape index: {}]  }
   0x1   :  { %16 = vsyncpa [#allocation6], 0 }
   0x2   :  { %17 = vsyncpa [#allocation9], 0 }
   0x3   :  { %18 = vsyncpa [#allocation4], 0  ;;  %s6102_s13 = smov [#allocation5]   ;;  %s6103_s15 = smov [#allocation8]  }
   0x4   :  { %s38_s14 = sshll.u32 %s6102_s13, 4  ;;  %s64_s16 = sshll.u32 %s6103_s15, 4  ;;  %s39_s14 = int_to_ptr.vmem [resolvable:$true] %s38_s14  ;;  %s6171_s16 = int_to_ptr.vmem [resolvable:$true] %s64_s16 }
   0x5   :  { %s5962_s19 = scalar_lea.hbm %s7178_s2, 256 }
   0x6   :  { %p5963_p0 = scmp.ne.s32.totalorder %s7178_s2, %s5962_s19  ;;  %p5966_p1 = scmp.lt.u32.totalorder %s5962_s19, %s7178_s2 }
   0x8   :  { %p5968_p2 = pnand %p5966_p1, %p5963_p0 }
   0xa   :  { %5971 = shalt.err (!%p5968_p2)
}
   0xb   :  { %s5972_s24 = scalar_lea.vmem %s39_s14, 256  ;;  %p5977_p4 = scmp.lt.s32.totalorder %s39_s14, %s39_s14 }
   0xc   :  { %p5973_p3 = scmp.ne.s32.totalorder %s39_s14, %s5972_s24  ;;  %p5978_p5 = scmp.lt.s32.totalorder %s5972_s24, %s5972_s24 }
   0xe   :  { %p5979_p6 = por %p5978_p5, %p5977_p4 }
  0x10   :  { %p5980_p7 = pnand %p5979_p6, %p5973_p3 }
  0x12   :  { %5983 = shalt.err (!%p5980_p7)
}
  0x13   :  { %s6104_s25 = smov 32   ;;  %s6105_s26 = smov 2  }
  0x14   :  { %44 = dma.hbm_to_vmem [thread:$0]  %s7178_s2, 256, %s39_s14, [#allocation6], %s6104_s25, %s6104_s25, %s6105_s26  }
  0x15   :  { %s5984_s11 = scalar_lea.hbm %s7181_s5, 6144 }
  0x16   :  { %p5985_p8 = scmp.ne.s32.totalorder %s7181_s5, %s5984_s11  ;;  %p5988_p9 = scmp.lt.u32.totalorder %s5984_s11, %s7181_s5 }
  0x18   :  { %p5990_p10 = pnand %p5988_p9, %p5985_p8 }
  0x1a   :  { %5993 = shalt.err (!%p5990_p10)
}
  0x1b   :  { %s5994_s18 = scalar_lea.vmem %s6171_s16, 6144  ;;  %p5999_p12 = scmp.lt.s32.totalorder %s6171_s16, %s6171_s16 }
  0x1c   :  { %p5995_p11 = scmp.ne.s32.totalorder %s6171_s16, %s5994_s18  ;;  %p6000_p13 = scmp.lt.s32.totalorder %s5994_s18, %s5994_s18 }
  0x1e   :  { %p6001_p0 = por %p6000_p13, %p5999_p12 }
  0x20   :  { %p6002_p1 = pnand %p6001_p0, %p5995_p11 }
  0x22   :  { %6005 = shalt.err (!%p6002_p1)
}
  0x23   :  { %s6106_s2 = smov 128   ;;  %s6107_s14 = smov 8  }
  0x24   :  { %70 = dma.hbm_to_vmem [thread:$0]  %s7181_s5, 6144, %s6171_s16, [#allocation9], %s6106_s2, %s6106_s2, %s6107_s14  }
  0x25   :  { %s6108_s21 = smov [#allocation2]   ;;  %s6109_s23 = smov [#allocation7]  }
  0x26   :  { %s24_s22 = sshll.u32 %s6108_s21, 4  ;;  %s52_s24 = sshll.u32 %s6109_s23, 4  ;;  %s25_s22 = int_to_ptr.vmem [resolvable:$true] %s24_s22  ;;  %s6205_s24 = int_to_ptr.vmem [resolvable:$true] %s52_s24 }
  0x27   :  { %s6006_s29 = scalar_lea.hbm %s7176_s0, 256 }
  0x28   :  { %p6007_p2 = scmp.ne.s32.totalorder %s7176_s0, %s6006_s29  ;;  %p6010_p3 = scmp.lt.u32.totalorder %s6006_s29, %s7176_s0 }
  0x2a   :  { %p6012_p4 = pnand %p6010_p3, %p6007_p2 }
  0x2c   :  { %6015 = shalt.err (!%p6012_p4)
}
  0x2d   :  { %s6016_s5 = scalar_lea.vmem %s25_s22, 256  ;;  %p6021_p6 = scmp.lt.s32.totalorder %s25_s22, %s25_s22 }
  0x2e   :  { %p6017_p5 = scmp.ne.s32.totalorder %s25_s22, %s6016_s5  ;;  %p6022_p7 = scmp.lt.s32.totalorder %s6016_s5, %s6016_s5 }
  0x30   :  { %p6023_p8 = por %p6022_p7, %p6021_p6 }
  0x32   :  { %p6024_p9 = pnand %p6023_p8, %p6017_p5 }
  0x34   :  { %6027 = shalt.err (!%p6024_p9)
}
  0x35   :  { %30 = dma.hbm_to_vmem [thread:$0]  %s7176_s0, 256, %s25_s22, [#allocation3], %s6104_s25, %s6104_s25, %s6105_s26  }
  0x36   :  { %s6028_s2 = scalar_lea.hbm %s7180_s4, 64 }
  0x37   :  { %p6029_p10 = scmp.ne.s32.totalorder %s7180_s4, %s6028_s2  ;;  %p6032_p11 = scmp.lt.u32.totalorder %s6028_s2, %s7180_s4 }
  0x39   :  { %p6034_p12 = pnand %p6032_p11, %p6029_p10 }
  0x3b   :  { %6037 = shalt.err (!%p6034_p12)
}
  0x3c   :  { %s6038_s23 = scalar_lea.vmem %s6205_s24, 64  ;;  %p6043_p0 = scmp.lt.s32.totalorder %s6205_s24, %s6205_s24 }
  0x3d   :  { %p6039_p13 = scmp.ne.s32.totalorder %s6205_s24, %s6038_s23  ;;  %p6044_p1 = scmp.lt.s32.totalorder %s6038_s23, %s6038_s23 }
  0x3f   :  { %p6045_p2 = por %p6044_p1, %p6043_p0 }
  0x41   :  { %p6046_p3 = pnand %p6045_p2, %p6039_p13 }
  0x43   :  { %6049 = shalt.err (!%p6046_p3)
}
  0x44   :  { %s6110_s0 = smov 16   ;;  %s6111_s22 = smov 1  }
  0x45   :  { %58 = dma.hbm_to_vmem [thread:$0]  %s7180_s4, 64, %s6205_s24, [#allocation6], %s6110_s0, %s6110_s0, %s6111_s22  }
  0x46   :  { %s6112_s29 = smov [#allocation10]   ;;  %s6050_s13 = scalar_lea.hbm %s7184_s8, 64 }
  0x47   :  { %s80_s30 = sshll.u32 %s6112_s29, 4  ;;  %p6051_p4 = scmp.ne.s32.totalorder %s7184_s8, %s6050_s13  ;;  %s81_s30 = int_to_ptr.vmem [resolvable:$true] %s80_s30 }
  0x48   :  { %p6054_p5 = scmp.lt.u32.totalorder %s6050_s13, %s7184_s8 }
  0x4a   :  { %p6056_p6 = pnand %p6054_p5, %p6051_p4 }
  0x4c   :  { %6059 = shalt.err (!%p6056_p6)
}
  0x4d   :  { %s6060_s18 = scalar_lea.vmem %s81_s30, 64  ;;  %p6065_p8 = scmp.lt.s32.totalorder %s81_s30, %s81_s30 }
  0x4e   :  { %p6061_p7 = scmp.ne.s32.totalorder %s81_s30, %s6060_s18  ;;  %p6066_p9 = scmp.lt.s32.totalorder %s6060_s18, %s6060_s18 }
  0x50   :  { %p6067_p10 = por %p6066_p9, %p6065_p8 }
  0x52   :  { %p6068_p11 = pnand %p6067_p10, %p6061_p7 }
  0x54   :  { %6071 = shalt.err (!%p6068_p11)
}
  0x55   :  { %86 = dma.hbm_to_vmem [thread:$0]  %s7184_s8, 64, %s81_s30, [#allocation9], %s6110_s0, %s6110_s0, %s6111_s22  }
  0x56   :  { %6094 = dma.done.wait [#allocation3], 256  }
  0x57   :  { %6095 = vsyncadd [#allocation3], 4294967040 }
  0x58   :  { %6096 = dma.done.wait [#allocation6], 320  }
  0x59   :  { %6097 = vsyncadd [#allocation6], 4294966976 }
  0x5a   :  { %6098 = dma.done.wait [#allocation9], 6208  }
  0x5b   :  { %6099 = vsyncadd [#allocation9], 4294961088  ;;  %v524_v0 = vld [vmem:[%s7182_s6] sm:$0xff]  ;;  %v525_v1 = vld [vmem:[%s7182_s6 + $0x8] sm:$0xff]  ;;  %vm137_vm0 = vcmask 1041409   ;;  %vm140_vm1 = vcmask 1042434  }
  0x5c   :  { %v526_v2 = vld [vmem:[%s7182_s6 + $0x10] sm:$0xff]  ;;  %vm143_vm2 = vcmask 1043459   ;;  %v5592_v3 = vpack.c.bf16 %v525_v1, %v524_v0  ;;  %v527_v4 = vld [vmem:[%s7182_s6 + $0x18] sm:$0xff]  ;;  %v113_v5 = vld [vmem:[#allocation2 + $0x2] sm:$0x1]  ;;  %vm146_vm3 = vcmask 1044484  }
  0x5d   :  { %vm149_vm4 = vcmask 1045509   ;;  %vm152_vm5 = vcmask 1046534   ;;  %v5596_v6 = vpack.c.bf16 %v527_v4, %v526_v2  ;;  %v114_v7 = vld [vmem:[#allocation2 + $0x4] sm:$0x1]  ;;  %v115_v8 = vld [vmem:[#allocation2 + $0x6] sm:$0x1] }
  0x5e   :  { %v116_v9 = vld [vmem:[#allocation2 + $0x8] sm:$0x1]  ;;  %5593 = vmatprep.subr.bf16.mxu1 %v5592_v3  ;;  %v112_v10 = vld [vmem:[#allocation2] sm:$0x1]  ;;  %v117_v11 = vld [vmem:[#allocation2 + $0xa] sm:$0x1] }
  0x5f   :  { %v118_v12 = vld [vmem:[#allocation2 + $0xc] sm:$0x1]  ;;  %5595 = vmatpush3.bf16.msra.mxu1 %v5592_v3  ;;  %v119_v13 = vld [vmem:[#allocation2 + $0xe] sm:$0x1]  ;;  %v136_v14 = vrot.slane %v113_v5, 7  ;;  %v139_v15 = vrot.slane %v114_v7, 6 }
  0x60   :  { %v142_v16 = vrot.slane %v115_v8, 5  ;;  %vm155_vm6 = vcmask 1047559   ;;  %5597 = vmatprep.subr.bf16.mxu1 %v5596_v6  ;;  %v145_v17 = vrot.slane %v116_v9, 4  ;;  %v148_v18 = vrot.slane %v117_v11, 3  ;;  %v181_v19 = vld [vmem:[#allocation5] sm:$0x1] }
  0x61   :  { %v182_v20 = vld [vmem:[#allocation5 + $0x2] sm:$0x1]  ;;  %v138_v21 = vsel %vm137_vm0, %v136_v14, %v112_v10  ;;  %v183_v22 = vld [vmem:[#allocation5 + $0x4] sm:$0x1]  ;;  %v184_v23 = vld [vmem:[#allocation5 + $0x6] sm:$0x1] }
  0x62   :  { %v185_v24 = vld [vmem:[#allocation5 + $0x8] sm:$0x1]  ;;  %v141_v25 = vsel %vm140_vm1, %v139_v15, %v138_v21  ;;  %v151_v26 = vrot.slane %v118_v12, 2  ;;  %v186_v27 = vld [vmem:[#allocation5 + $0xa] sm:$0x1]  ;;  %v495_v29 = vld [vmem:[#allocation8] sm:$0xff] }
  0x63   :  { %v187_v28 = vld [vmem:[#allocation5 + $0xc] sm:$0x1]  ;;  %5599 = vmatpush3.bf16.msra.mxu1 %v5596_v6  ;;  %v144_v30 = vsel %vm143_vm2, %v142_v16, %v141_v25  ;;  %v188_v31 = vld [vmem:[#allocation5 + $0xe] sm:$0x1]  ;;  %v205_v32 = vrot.slane %v182_v20, 7  ;;  %v207_v33 = vrot.slane %v183_v22, 6 }
  0x64   :  { %v209_v34 = vrot.slane %v184_v23, 5  ;;  %v496_v35 = vld [vmem:[#allocation8 + $0x8] sm:$0xff]  ;;  %v147_v36 = vsel %vm146_vm3, %v145_v17, %v144_v30  ;;  %v154_v37 = vrot.slane %v119_v13, 1  ;;  %v211_v38 = vrot.slane %v185_v24, 4  ;;  %v120_v39 = vld [vmem:[#allocation2 + $0x1] sm:$0x1] }
  0x65   :  { %v121_v40 = vld [vmem:[#allocation2 + $0x3] sm:$0x1]  ;;  %v150_v41 = vsel %vm149_vm4, %v148_v18, %v147_v36  ;;  %v206_v42 = vsel %vm137_vm0, %v205_v32, %v181_v19  ;;  %v213_v43 = vrot.slane %v186_v27, 3  ;;  %v122_v44 = vld [vmem:[#allocation2 + $0x5] sm:$0x1]  ;;  %v215_v49 = vrot.slane %v187_v28, 2 }
  0x66   :  { %v123_v45 = vld [vmem:[#allocation2 + $0x7] sm:$0x1]  ;;  %v166_v46 = vrot.slane %v121_v40, 7  ;;  %v153_v47 = vsel %vm152_vm5, %v151_v26, %v150_v41  ;;  %v208_v48 = vsel %vm140_vm1, %v207_v33, %v206_v42  ;;  %v124_v50 = vld [vmem:[#allocation2 + $0x9] sm:$0x1]  ;;  %v5600_v52 = vpack.c.bf16 %v496_v35, %v495_v29  ;;  %v497_v35 = vld [vmem:[#allocation8 + $0x10] sm:$0xff] }
  0x67   :  { %v125_v51 = vld [vmem:[#allocation2 + $0xb] sm:$0x1]  ;;  %v210_v53 = vsel %vm143_vm2, %v209_v34, %v208_v48  ;;  %v217_v54 = vrot.slane %v188_v31, 1  ;;  %v126_v55 = vld [vmem:[#allocation2 + $0xd] sm:$0x1]  ;;  %v168_v57 = vrot.slane %v122_v44, 6  ;;  %v6275_v0 = vsel %vm155_vm6, %v154_v37, %v153_v47 }
  0x68   :  { %v167_v56 = vsel %vm137_vm0, %v166_v46, %v120_v39  ;;  %v212_v58 = vsel %vm146_vm3, %v211_v38, %v210_v53  ;;  %v127_v59 = vld [vmem:[#allocation2 + $0xf] sm:$0x1]  ;;  %v170_v60 = vrot.slane %v123_v45, 5  ;;  %v172_v61 = vrot.slane %v124_v50, 4  ;;  %v190_v63 = vld [vmem:[#allocation5 + $0x3] sm:$0x1]  ;;  %5601 = vmatprep.subr.bf16.mxu1 %v5600_v52 }
  0x69   :  { %v174_v62 = vrot.slane %v125_v51, 3  ;;  %v214_v1 = vsel %vm149_vm4, %v213_v43, %v212_v58  ;;  %v169_v2 = vsel %vm140_vm1, %v168_v57, %v167_v56  ;;  %v189_v3 = vld [vmem:[#allocation5 + $0x1] sm:$0x1]  ;;  %v191_v4 = vld [vmem:[#allocation5 + $0x5] sm:$0x1]  ;;  %vm552_vm7 = vcmask 261120  }
  0x6a   :  { %v192_v5 = vld [vmem:[#allocation5 + $0x7] sm:$0x1]  ;;  %v216_v6 = vsel %vm152_vm5, %v215_v49, %v214_v1  ;;  %v171_v7 = vsel %vm143_vm2, %v170_v60, %v169_v2  ;;  %v176_v8 = vrot.slane %v126_v55, 2  ;;  %v193_v9 = vld [vmem:[#allocation5 + $0x9] sm:$0x1]  ;;  %v228_v14 = vrot.slane %v190_v63, 7  ;;  %vm6737_vm9 = vmpackc.low %vm552_vm7, %vm552_vm7 }
  0x6b   :  { %v194_v10 = vld [vmem:[#allocation5 + $0xb] sm:$0x1]  ;;  %v6282_v11 = vsel %vm155_vm6, %v217_v54, %v216_v6  ;;  %v173_v12 = vsel %vm146_vm3, %v172_v61, %v171_v7  ;;  %v195_v13 = vld [vmem:[#allocation5 + $0xd] sm:$0x1]  ;;  %v230_v15 = vrot.slane %v191_v4, 6  ;;  %v232_v19 = vrot.slane %v192_v5, 5 }
  0x6c   :  { %v544_v16 = vadd.f32 %v6282_v11, %v6275_v0  ;;  %v175_v17 = vsel %vm149_vm4, %v174_v62, %v173_v12  ;;  %v196_v18 = vld [vmem:[#allocation5 + $0xf] sm:$0x1]  ;;  %v234_v20 = vrot.slane %v193_v9, 4  ;;  %v178_v21 = vrot.slane %v127_v59, 1  ;;  %v6311_v40 = vld [vmem:[#allocation7] sm:$0x1] }
  0x6d   :  { %v229_v22 = vsel %vm137_vm0, %v228_v14, %v189_v3  ;;  %v236_v23 = vrot.slane %v194_v10, 3  ;;  %v177_v24 = vsel %vm152_vm5, %v176_v8, %v175_v17  ;;  %v238_v26 = vrot.slane %v195_v13, 2  ;;  %v498_v36 = vld [vmem:[#allocation8 + $0x18] sm:$0xff]  ;;  %v4815_v43 = vld [vmem:[#allocation10] ss:$0 sm:$0xff]  ;;  %s6113_s22 = smov 96  }
  0x6e   :  { %5230 = vmatprep.mubr.msk.f32.mxu1 %vm552_vm7, %v544_v16  ;;  %v231_v25 = vsel %vm140_vm1, %v230_v15, %v229_v22  ;;  %v240_v28 = vrot.slane %v196_v18, 1  ;;  %v6295_v30 = vsel %vm155_vm6, %v178_v21, %v177_v24  ;;  %v5604_v37 = vpack.c.bf16 %v498_v36, %v497_v35  ;;  %v6326_v53 = vld [vmem:[#allocation7 + $0x1] sm:$0x1]  ;;  %v6328_v54 = vld [vmem:[#allocation7 + $0x2] sm:$0x1] }
  0x6f   :  { %v233_v27 = vsel %vm143_vm2, %v232_v19, %v231_v25  ;;  %v723_v38 = vlaneseq  ;;  %v108_v41 = vmul.f32 0.35355338, %v6311_v40  ;;  %v109_v55 = vmul.f32 0.35355338, %v6326_v53  ;;  %v6332_v57 = vld [vmem:[#allocation7 + $0x3] sm:$0x1] }
  0x70   :  { %v235_v29 = vsel %vm146_vm3, %v234_v20, %v233_v27  ;;  %v110_v56 = vmul.f32 0.35355338, %v6328_v54  ;;  %v4818_v58 = vld [vmem:[%s7185_s9] ss:$0 sm:$0xff]  ;;  %v111_v60 = vmul.f32 0.35355338, %v6332_v57 }
  0x71   :  { %v237_v31 = vsel %vm149_vm4, %v236_v23, %v235_v29  ;;  %v6309_v39 = vshrl.u32 %v723_v38, 7  ;;  %vm958_vm8 = vcmask 64512   ;;  %vm1928_vm10 = vcmask 130048  }
  0x72   :  { %v239_v32 = vsel %vm152_vm5, %v238_v26, %v237_v31  ;;  %vm2457_vm11 = vcmask 523264   ;;  %vm4717_vm12 = vcmask 253952  }
  0x73   :  { %v6300_v33 = vsel %vm155_vm6, %v240_v28, %v239_v32  ;;  %v6315_v42 = vsub.s32 0, %v6309_v39 }
  0x74   :  { %v545_v34 = vadd.f32 %v6300_v33, %v6295_v30 }
  0x75   :  { %v6318_v44 = vrot.slane %v108_v41, %v6315_v42  ;;  %v6338_v59 = vrot.slane %v109_v55, %v6315_v42  ;;  %v6342_v63 = vrot.slane %v110_v56, %v6315_v42  ;;  %v6348_v2 = vrot.slane %v111_v60, %v6315_v42 }
  0x76   :  { %5231 = vmatmul.mubr.msk.f32.vlgmr.msra.gmra.mrb[0].mxu1 %vm552_vm7, %v545_v34 }
  0x77   :  { %5603 = vmatpush3.bf16.msra.mxu1 %v5600_v52  ;;  %5241 = vmatprep.mubr.msk.f32.mxu1 %vm552_vm7, %v6275_v0 }
  0x78   :  { %5605 = vmatprep.subr.bf16.mxu1 %v5604_v37 }
  0x7b   :  { %5607 = vmatpush3.bf16.msra.mxu1 %v5604_v37 }
  0x7e   :  { %5242 = vmatmul.mubr.msk.f32.vlgmr.msra.gmra.mrb[2].mxu1 %vm552_vm7, %v6295_v30 }
 0x149   :  { %v5232_v45 = vpop.f32.mrb[0].mxu1 }
 0x14a   :  { %v631_v46 = vadd.f32 %v5232_v45, %v4815_v43  ;;  %v625_v47 = vpop.f32.mrb[1].mxu1 }
 0x14b   :  { %v626_v48 = vadd.f32 %v4815_v43, %v625_v47 }
 0x14c   :  { %v729_v49 = vmul.f32 %v6318_v44, %v631_v46  ;;  %v737_v7 = vmul.f32 %v6338_v59, %v631_v46  ;;  %v745_v8 = vmul.f32 %v6342_v63, %v631_v46  ;;  %v753_v9 = vmul.f32 %v6348_v2, %v631_v46 }
 0x14d   :  { %755 = vrot.lane.b32.xlu0 %v626_v48, %s6113_s22  ;;  %v728_v50 = vmul.f32 %v6318_v44, %v626_v48  ;;  %v736_v1 = vmul.f32 %v6338_v59, %v626_v48  ;;  %v744_v5 = vmul.f32 %v6342_v63, %v626_v48  ;;  %v752_v6 = vmul.f32 %v6348_v2, %v626_v48 }
 0x14e   :  { %5254 = vmatprep.mubr.msk.f32.mxu1 %vm552_vm7, %v729_v49 }
 0x14f   :  { %5246 = vmatprep.mubr.msk.f32.mxu0 %vm552_vm7, %v728_v50 }
 0x151   :  { %857 = vrot.lane.b32.xlu0 %v631_v46, %s6113_s22  ;;  %v5243_v51 = vpop.f32.mrb[2].mxu1 }
 0x152   :  { %v711_v52 = vpop.f32.mrb[3].mxu1  ;;  %v717_v3 = vadd.f32 %v5243_v51, %v4818_v58 }
 0x153   :  { %v712_v61 = vadd.f32 %v4818_v58, %v711_v52 }
 0x1bf   :  { %v756_v62 = vpop.permute.xlu0 %755 }
 0x1c0   :  { %5244 = vmatprep.subr.msk.mxu0 %vm552_vm7, %v756_v62 }
 0x1c1   :  { %5245 = vmatpush3.xpose.msk.msra.mxu0 %vm552_vm7, %v756_v62 }
 0x1c2   :  { %5260 = vmatprep.subr.mxu0 %v712_v61 }
 0x1c3   :  { %v858_v4 = vpop.permute.xlu0 %857 }
 0x1c4   :  { %5247 = vmatmul.mubr.msk.f32.vlgmr.msra.gmra.mrb[0].mxu0 %vm552_vm7, %v736_v1  ;;  %5252 = vmatprep.subr.msk.mxu1 %vm552_vm7, %v858_v4 }
 0x1c5   :  { %5249 = vmatprep.mubr.msk.f32.mxu0 %vm552_vm7, %v744_v5  ;;  %5253 = vmatpush3.xpose.msk.msra.mxu1 %vm552_vm7, %v858_v4 }
 0x1c6   :  { %5268 = vmatprep.subr.mxu1 %v717_v3  ;;  %5261 = vmatpush3.msra.mxu0 %v712_v61 }
 0x1c8   :  { %5250 = vmatmul.mubr.msk.f32.gmra.mrb[2].mxu0 %vm552_vm7, %v752_v6  ;;  %5255 = vmatmul.mubr.msk.f32.vlgmr.msra.gmra.mrb[4].mxu1 %vm552_vm7, %v737_v7 }
 0x1c9   :  { %5257 = vmatprep.mubr.msk.f32.mxu1 %vm552_vm7, %v745_v8  ;;  %5269 = vmatpush3.msra.mxu1 %v717_v3 }
 0x1cc   :  { %5258 = vmatmul.mubr.msk.f32.gmra.mrb[6].mxu1 %vm552_vm7, %v753_v9 }
 0x297   :  { %v5248_v10 = vpop.f32.mrb[0].mxu0 }
 0x298   :  { %v837_v12 = vpop.f32.mrb[1].mxu0  ;;  %v962_v13 = vsel %vm958_vm8, %v5248_v10, -inf }
 0x299   :  { %963 = vmax.xlane.f32.xlu1 %v962_v13  ;;  %v959_v22 = vsel %vm958_vm8, %v837_v12, -inf }
 0x29b   :  { %v5251_v14 = vpop.f32.mrb[2].mxu0  ;;  %v5256_v15 = vpop.f32.mrb[4].mxu1 }
 0x29c   :  { %v847_v16 = vpop.f32.mrb[3].mxu0  ;;  %v939_v17 = vpop.f32.mrb[5].mxu1  ;;  %v974_v18 = vsel %vm958_vm8, %v5256_v15, -inf  ;;  %v968_v23 = vsel %vm958_vm8, %v5251_v14, -inf }
 0x29d   :  { %975 = vmax.xlane.f32.xlu1 %v974_v18  ;;  %v971_v19 = vsel %vm958_vm8, %v939_v17, -inf  ;;  %v965_v25 = vsel %vm958_vm8, %v847_v16, -inf }
 0x29e   :  { %972 = vmax.xlane.f32.xlu0 %v971_v19 }
 0x29f   :  { %v5259_v20 = vpop.f32.mrb[6].mxu1 }
 0x2a0   :  { %v949_v21 = vpop.f32.mrb[7].mxu1  ;;  %v980_v26 = vsel %vm958_vm8, %v5259_v20, -inf }
 0x2a1   :  { %960 = vmax.xlane.f32.xlu1 %v959_v22  ;;  %v977_v24 = vsel %vm958_vm8, %v949_v21, -inf }
 0x2a5   :  { %969 = vmax.xlane.f32.xlu1 %v968_v23 }
 0x2a9   :  { %978 = vmax.xlane.f32.xlu1 %v977_v24 }
 0x2ad   :  { %966 = vmax.xlane.f32.xlu1 %v965_v25 }
 0x2b1   :  { %981 = vmax.xlane.f32.xlu1 %v980_v26 }
 0x326   :  { %v964_v27 = vpop.xlane.xlu1 %963 }
 0x327   :  { %v984_v28 = vsub.f32 %v5248_v10, %v964_v27 }
 0x329   :  { %v993_v29 = vmul.f32 1.442695, %v984_v28 }
 0x32a   :  { %v976_v31 = vpop.xlane.xlu1 %975 }
 0x32b   :  { %5806 = vpow2.f32 %v993_v29  ;;  %v988_v32 = vsub.f32 %v5256_v15, %v976_v31  ;;  %v973_v34 = vpop.xlane.xlu0 %972 }
 0x32c   :  { %v987_v35 = vsub.f32 %v939_v17, %v973_v34 }
 0x32d   :  { %v1001_v36 = vmul.f32 1.442695, %v988_v32 }
 0x32e   :  { %v999_v37 = vmul.f32 1.442695, %v987_v35  ;;  %v961_v38 = vpop.xlane.xlu1 %960 }
 0x32f   :  { %5808 = vpow2.f32 %v1001_v36  ;;  %v983_v41 = vsub.f32 %v837_v12, %v961_v38 }
 0x330   :  { %5810 = vpow2.f32 %v999_v37 }
 0x331   :  { %v991_v43 = vmul.f32 1.442695, %v983_v41 }
 0x332   :  { %v970_v45 = vpop.xlane.xlu1 %969 }
 0x333   :  { %5812 = vpow2.f32 %v991_v43  ;;  %v986_v46 = vsub.f32 %v5251_v14, %v970_v45 }
 0x335   :  { %v5807_v47 = vpop.eup %5806  ;;  %v997_v48 = vmul.f32 1.442695, %v986_v46 }
 0x336   :  { %v979_v49 = vpop.xlane.xlu1 %978  ;;  %v1010_v50 = vsel %vm958_vm8, %v5807_v47, 0.0 }
 0x337   :  { %5814 = vpow2.f32 %v997_v48  ;;  %1011 = vadd.xlane.f32.xlu1 %v1010_v50  ;;  %v989_v52 = vsub.f32 %v949_v21, %v979_v49  ;;  %v501_v48 = vld [vmem:[#allocation8 + $0x28] sm:$0xff]  ;;  %v502_v50 = vld [vmem:[#allocation8 + $0x30] sm:$0xff] }
 0x339   :  { %v5809_v51 = vpop.eup %5808  ;;  %v1003_v1 = vmul.f32 1.442695, %v989_v52 }
 0x33a   :  { %v5811_v55 = vpop.eup %5810  ;;  %v967_v56 = vpop.xlane.xlu1 %966  ;;  %v1022_v58 = vsel %vm958_vm8, %v5809_v51, 0.0 }
 0x33b   :  { %v985_v60 = vsub.f32 %v847_v16, %v967_v56  ;;  %1023 = vadd.xlane.f32.xlu0 %v1022_v58  ;;  %v1019_v61 = vsel %vm958_vm8, %v5811_v55, 0.0  ;;  %v6393_v56 = vrot.slane %v6311_v40, %v6315_v42 }
 0x33c   :  { %1020 = vadd.xlane.f32.xlu1 %v1019_v61 }
 0x33d   :  { %v5813_v62 = vpop.eup %5812  ;;  %v995_v3 = vmul.f32 1.442695, %v985_v60 }
 0x33e   :  { %v982_v4 = vpop.xlane.xlu1 %981  ;;  %v1007_v5 = vsel %vm958_vm8, %v5813_v62, 0.0 }
 0x33f   :  { %5816 = vpow2.f32 %v995_v3  ;;  %v990_v6 = vsub.f32 %v5259_v20, %v982_v4 }
 0x340   :  { %1008 = vadd.xlane.f32.xlu1 %v1007_v5  ;;  %5818 = vpow2.f32 %v1003_v1 }
 0x341   :  { %v5815_v7 = vpop.eup %5814  ;;  %v1005_v8 = vmul.f32 1.442695, %v990_v6 }
 0x342   :  { %v1016_v9 = vsel %vm958_vm8, %v5815_v7, 0.0 }
 0x343   :  { %5820 = vpow2.f32 %v1005_v8  ;;  %1017 = vadd.xlane.f32.xlu0 %v1016_v9  ;;  %v6405_v8 = vrot.slane %v6332_v57, %v6315_v42 }
 0x349   :  { %v5817_v10 = vpop.eup %5816 }
 0x34a   :  { %v1013_v12 = vsel %vm958_vm8, %v5817_v10, 0.0  ;;  %v5819_v13 = vpop.eup %5818 }
 0x34b   :  { %1014 = vadd.xlane.f32.xlu1 %v1013_v12  ;;  %v1025_v15 = vsel %vm958_vm8, %v5819_v13, 0.0 }
 0x34d   :  { %v5821_v14 = vpop.eup %5820 }
 0x34e   :  { %v1028_v16 = vsel %vm958_vm8, %v5821_v14, 0.0 }
 0x34f   :  { %1026 = vadd.xlane.f32.xlu1 %v1025_v15  ;;  %1029 = vadd.xlane.f32.xlu0 %v1028_v16 }
 0x3c4   :  { %v1012_v17 = vpop.xlane.xlu1 %1011 }
 0x3c8   :  { %v1024_v18 = vpop.xlane.xlu0 %1023 }
 0x3c9   :  { %5822 = vrcp.f32 %v1024_v18  ;;  %v1021_v19 = vpop.xlane.xlu1 %1020 }
 0x3ca   :  { %5824 = vrcp.f32 %v1021_v19 }
 0x3cb   :  { %5826 = vrcp.f32 %v1012_v17 }
 0x3cd   :  { %v1009_v20 = vpop.xlane.xlu1 %1008 }
 0x3ce   :  { %5828 = vrcp.f32 %v1009_v20 }
 0x3d0   :  { %v1018_v23 = vpop.xlane.xlu0 %1017 }
 0x3d1   :  { %5830 = vrcp.f32 %v1018_v23 }
 0x3d3   :  { %v5823_v21 = vpop.eup %5822 }
 0x3d4   :  { %v5825_v22 = vpop.eup %5824  ;;  %v1042_v25 = vmul.f32 %v5823_v21, %v5809_v51  ;;  %v503_v51 = vld [vmem:[#allocation8 + $0x38] sm:$0xff] }
 0x3d5   :  { %v1040_v24 = vmul.f32 %v5825_v22, %v5811_v55  ;;  %v5827_v26 = vpop.eup %5826  ;;  %v5612_v52 = vpack.c.bf16 %v503_v51, %v502_v50  ;;  %v6389_v55 = vrot.slane %v6326_v53, %v6315_v42  ;;  %v6401_v53 = vrot.slane %v6328_v54, %v6315_v42  ;;  %v4840_v42 = vld [vmem:[%s7185_s9 + $0x1] ss:$0 sm:$0xff] }
 0x3d6   :  { %v1034_v31 = vmul.f32 %v5827_v26, %v5807_v47  ;;  %v500_v47 = vld [vmem:[#allocation8 + $0x20] sm:$0xff] }
 0x3d7   :  { %5270 = vmatprep.mubr.msk.f32.mxu1 %vm958_vm8, %v1040_v24  ;;  %v5608_v49 = vpack.c.bf16 %v501_v48, %v500_v47  ;;  %v510_v47 = vld [vmem:[#allocation8 + $0x60] sm:$0xff]  ;;  %v511_v48 = vld [vmem:[#allocation8 + $0x68] sm:$0xff] }
 0x3d8   :  { %v5829_v27 = vpop.eup %5828  ;;  %5271 = vmatmul.mubr.msk.f32.vlgmr.msra.gmra.mrb[8].mxu1 %vm958_vm8, %v1042_v25  ;;  %v1015_v28 = vpop.xlane.xlu1 %1014 }
 0x3d9   :  { %5832 = vrcp.f32 %v1015_v28  ;;  %v1032_v29 = vmul.f32 %v5829_v27, %v5813_v62  ;;  %5609 = vmatprep.subr.bf16.mxu0 %v5608_v49 }
 0x3db   :  { %5262 = vmatprep.mubr.msk.f32.mxu0 %vm958_vm8, %v1032_v29  ;;  %v5831_v35 = vpop.eup %5830 }
 0x3dc   :  { %v1030_v32 = vpop.xlane.xlu0 %1029  ;;  %5263 = vmatmul.mubr.msk.f32.vlgmr.msra.gmra.mrb[4].mxu0 %vm958_vm8, %v1034_v31  ;;  %v1027_v34 = vpop.xlane.xlu1 %1026  ;;  %v1038_v38 = vmul.f32 %v5831_v35, %v5815_v7 }
 0x3dd   :  { %5834 = vrcp.f32 %v1030_v32  ;;  %5611 = vmatpush3.bf16.msra.mxu0 %v5608_v49  ;;  %v243_v49 = vld [vmem:[%s7177_s1] sm:$0x1] }
 0x3de   :  { %5836 = vrcp.f32 %v1027_v34  ;;  %5613 = vmatprep.subr.bf16.mxu0 %v5612_v52 }
 0x3e1   :  { %5615 = vmatpush3.bf16.msra.mxu0 %v5612_v52  ;;  %v5624_v52 = vpack.c.bf16 %v511_v48, %v510_v47 }
 0x3e3   :  { %v5833_v36 = vpop.eup %5832  ;;  %5625 = vmatprep.subr.bf16.mxu0 %v5624_v52 }
 0x3e4   :  { %v1036_v37 = vmul.f32 %v5833_v36, %v5817_v10 }
 0x3e6   :  { %5265 = vmatprep.mubr.msk.f32.mxu0 %vm958_vm8, %v1036_v37  ;;  %v244_v37 = vld [vmem:[%s7177_s1 + $0x2] sm:$0x1] }
 0x3e7   :  { %v5835_v41 = vpop.eup %5834  ;;  %5266 = vmatmul.mubr.msk.f32.gmra.mrb[6].mxu0 %vm958_vm8, %v1038_v38  ;;  %v368_v38 = vld [vmem:[%s7179_s3 + $0x2] sm:$0x1] }
 0x3e8   :  { %v5837_v43 = vpop.eup %5836  ;;  %v1046_v45 = vmul.f32 %v5835_v41, %v5821_v14  ;;  %v245_v41 = vld [vmem:[%s7177_s1 + $0x4] sm:$0x1] }
 0x3e9   :  { %v1044_v46 = vmul.f32 %v5837_v43, %v5819_v13  ;;  %v291_v43 = vrot.slane %v244_v37, 7  ;;  %v293_v50 = vrot.slane %v245_v41, 6  ;;  %v254_v37 = vld [vmem:[%s7177_s1 + $0x16] sm:$0x1]  ;;  %v256_v41 = vld [vmem:[%s7177_s1 + $0x1a] sm:$0x1] }
 0x3eb   :  { %5273 = vmatprep.mubr.msk.f32.mxu1 %vm958_vm8, %v1044_v46  ;;  %v415_v46 = vrot.slane %v368_v38, 7  ;;  %v255_v38 = vld [vmem:[%s7177_s1 + $0x18] sm:$0x1] }
 0x3ec   :  { %5274 = vmatmul.mubr.msk.f32.gmra.mrb[10].mxu1 %vm958_vm8, %v1046_v45  ;;  %v369_v45 = vld [vmem:[%s7179_s3 + $0x4] sm:$0x1] }
 0x3ed   :  { %v417_v51 = vrot.slane %v369_v45, 6  ;;  %v257_v45 = vld [vmem:[%s7177_s1 + $0x1c] sm:$0x1] }
 0x4ab   :  { %v5272_v58 = vpop.f32.mrb[8].mxu1 }
 0x4ac   :  { %v1256_v60 = vmul.f32 %v5272_v58, %v6389_v55  ;;  %v1222_v61 = vpop.f32.mrb[9].mxu1  ;;  %v246_v58 = vld [vmem:[%s7177_s1 + $0x6] sm:$0x1] }
 0x4ad   :  { %v1248_v62 = vmul.f32 %v6393_v56, %v1222_v61  ;;  %v292_v61 = vsel %vm137_vm0, %v291_v43, %v243_v49  ;;  %v258_v49 = vld [vmem:[%s7177_s1 + $0x1e] sm:$0x1] }
 0x4af   :  { %v1258_v1 = vadd.f32 %v1256_v60, %v1248_v62  ;;  %v5264_v3 = vpop.f32.mrb[4].mxu0  ;;  %v247_v60 = vld [vmem:[%s7177_s1 + $0x8] sm:$0x1]  ;;  %v367_v62 = vld [vmem:[%s7179_s3] sm:$0x1] }
 0x4b0   :  { %v1255_v4 = vmul.f32 %v5264_v3, %v6389_v55  ;;  %v1125_v5 = vpop.f32.mrb[5].mxu0  ;;  %v294_v3 = vsel %vm140_vm1, %v293_v50, %v292_v61  ;;  %v309_v50 = vrot.slane %v254_v37, 5  ;;  %v313_v61 = vrot.slane %v256_v41, 3 }
 0x4b1   :  { %v1247_v6 = vmul.f32 %v6393_v56, %v1125_v5  ;;  %v297_v5 = vrot.slane %v247_v60, 4 }
 0x4b3   :  { %v1257_v7 = vadd.f32 %v1255_v4, %v1247_v6  ;;  %v295_v4 = vrot.slane %v246_v58, 5  ;;  %v370_v6 = vld [vmem:[%s7179_s3 + $0x6] sm:$0x1] }
 0x4ba   :  { %v5267_v40 = vpop.f32.mrb[6].mxu0 }
 0x4bb   :  { %v1135_v9 = vpop.f32.mrb[7].mxu0  ;;  %v1275_v12 = vmul.f32 %v5267_v40, %v6405_v8  ;;  %v249_v40 = vld [vmem:[%s7177_s1 + $0xc] sm:$0x1] }
 0x4bc   :  { %v1265_v10 = vmul.f32 %v6401_v53, %v1135_v9 }
 0x4be   :  { %v1267_v13 = vadd.f32 %v1265_v10, %v1257_v7  ;;  %v416_v7 = vsel %vm137_vm0, %v415_v46, %v367_v62  ;;  %v371_v10 = vld [vmem:[%s7179_s3 + $0x8] sm:$0x1]  ;;  %v315_v62 = vrot.slane %v257_v45, 2  ;;  %v383_v45 = vld [vmem:[%s7179_s3 + $0x1] sm:$0x1] }
 0x4bf   :  { %v5275_v14 = vpop.f32.mrb[10].mxu1 }
 0x4c0   :  { %v1277_v15 = vadd.f32 %v1275_v12, %v1267_v13  ;;  %v1232_v16 = vpop.f32.mrb[11].mxu1  ;;  %v1276_v54 = vmul.f32 %v5275_v14, %v6405_v8  ;;  %v418_v12 = vsel %vm140_vm1, %v417_v51, %v416_v7  ;;  %v419_v13 = vrot.slane %v370_v6, 5  ;;  %v512_v14 = vld [vmem:[#allocation8 + $0x70] sm:$0xff] }
 0x4c1   :  { %v1266_v17 = vmul.f32 %v6401_v53, %v1232_v16  ;;  %v250_v16 = vld [vmem:[%s7177_s1 + $0xe] sm:$0x1]  ;;  %v311_v51 = vrot.slane %v255_v38, 4  ;;  %v379_v6 = vld [vmem:[%s7179_s3 + $0x18] sm:$0x1] }
 0x4c2   :  { %5284 = vmatprep.mubr.msk.f32.mxu0 %vm552_vm7, %v1277_v15  ;;  %v513_v15 = vld [vmem:[#allocation8 + $0x78] sm:$0xff]  ;;  %v380_v7 = vld [vmem:[%s7179_s3 + $0x1a] sm:$0x1]  ;;  %v266_v38 = vld [vmem:[%s7177_s1 + $0xf] sm:$0x1] }
 0x4c3   :  { %v1268_v18 = vadd.f32 %v1266_v17, %v1258_v1  ;;  %v248_v1 = vld [vmem:[%s7177_s1 + $0xa] sm:$0x1]  ;;  %v296_v17 = vsel %vm143_vm2, %v295_v4, %v294_v3  ;;  %v377_v3 = vld [vmem:[%s7179_s3 + $0x14] sm:$0x1] }
 0x4c4   :  { %v299_v9 = vrot.slane %v248_v1, 3  ;;  %v376_v1 = vld [vmem:[%s7179_s3 + $0x12] sm:$0x1] }
 0x4c5   :  { %v1278_v19 = vadd.f32 %v1276_v54, %v1268_v18  ;;  %v301_v54 = vrot.slane %v249_v40, 2  ;;  %v421_v18 = vrot.slane %v371_v10, 4  ;;  %v381_v10 = vld [vmem:[%s7179_s3 + $0x1c] sm:$0x1] }
 0x4c7   :  { %5285 = vmatmul.mubr.msk.f32.vlgmr.msra.gmra.mrb[8].mxu0 %vm552_vm7, %v1278_v19  ;;  %v5628_v19 = vpack.c.bf16 %v513_v15, %v512_v14  ;;  %v382_v15 = vld [vmem:[%s7179_s3 + $0x1e] sm:$0x1] }
 0x4c8   :  { %5627 = vmatpush3.bf16.msra.mxu0 %v5624_v52  ;;  %v375_v52 = vld [vmem:[%s7179_s3 + $0x10] sm:$0x1] }
 0x4c9   :  { %5629 = vmatprep.subr.bf16.mxu0 %v5628_v19 }
 0x4cc   :  { %5631 = vmatpush3.bf16.msra.mxu0 %v5628_v19 }
 0x59a   :  { %v5286_v57 = vpop.f32.mrb[8].mxu0 }
 0x59b   :  { %v1363_v20 = vadd.f32 %v5286_v57, %v4840_v42  ;;  %v1357_v21 = vpop.f32.mrb[9].mxu0  ;;  %v303_v57 = vrot.slane %v250_v16, 1 }
 0x59c   :  { %v1358_v22 = vadd.f32 %v4840_v42, %v1357_v21  ;;  %v298_v42 = vsel %vm146_vm3, %v297_v5, %v296_v17  ;;  %v373_v21 = vld [vmem:[%s7179_s3 + $0xc] sm:$0x1]  ;;  %v378_v5 = vld [vmem:[%s7179_s3 + $0x16] sm:$0x1]  ;;  %v435_v17 = vrot.slane %v379_v6, 4 }
 0x59d   :  { %v1367_v23 = vadd.f32 %v1363_v20, %v6295_v30  ;;  %v372_v20 = vld [vmem:[%s7179_s3 + $0xa] sm:$0x1]  ;;  %v433_v16 = vrot.slane %v378_v5, 5 }
 0x59e   :  { %v1366_v24 = vadd.f32 %v1358_v22, %v6275_v0  ;;  %v420_v22 = vsel %vm143_vm2, %v419_v13, %v418_v12  ;;  %v429_v12 = vrot.slane %v376_v1, 7  ;;  %v431_v13 = vrot.slane %v377_v3, 6  ;;  %v387_v1 = vld [vmem:[%s7179_s3 + $0x9] sm:$0x1]  ;;  %v388_v3 = vld [vmem:[%s7179_s3 + $0xb] sm:$0x1] }
 0x59f   :  { %v1375_v25 = vsel %vm552_vm7, %v1367_v23, 0.0 }
 0x5a0   :  { %1376 = vadd.xlane.f32.xlu0 %v1375_v25  ;;  %v1372_v26 = vsel %vm552_vm7, %v1366_v24, 0.0  ;;  %v422_v25 = vsel %vm146_vm3, %v421_v18, %v420_v22  ;;  %v430_v19 = vsel %vm137_vm0, %v429_v12, %v375_v52  ;;  %v385_v52 = vld [vmem:[%s7179_s3 + $0x5] sm:$0x1] }
 0x5a1   :  { %1373 = vadd.xlane.f32.xlu1 %v1372_v26  ;;  %v423_v26 = vrot.slane %v372_v20, 3  ;;  %v260_v20 = vld [vmem:[%s7177_s1 + $0x3] sm:$0x1] }
 0x62d   :  { %v1377_v27 = vpop.xlane.xlu0 %1376 }
 0x62e   :  { %v1380_v28 = vmul.f32 0.03125, %v1377_v27  ;;  %v1374_v29 = vpop.xlane.xlu1 %1373  ;;  %v425_v27 = vrot.slane %v373_v21, 2  ;;  %v261_v21 = vld [vmem:[%s7177_s1 + $0x5] sm:$0x1] }
 0x62f   :  { %v1379_v31 = vmul.f32 0.03125, %v1374_v29 }
 0x630   :  { %v6420_v32 = vsub.f32 %v1367_v23, %v1380_v28  ;;  %v300_v23 = vsel %vm149_vm4, %v299_v9, %v298_v42  ;;  %v251_v28 = vld [vmem:[%s7177_s1 + $0x10] sm:$0x1]  ;;  %v317_v9 = vrot.slane %v258_v49, 1  ;;  %v437_v42 = vrot.slane %v380_v7, 3  ;;  %v389_v7 = vld [vmem:[%s7179_s3 + $0xd] sm:$0x1] }
 0x631   :  { %v6422_v34 = vsub.f32 %v1366_v24, %v1379_v31  ;;  %v374_v24 = vld [vmem:[%s7179_s3 + $0xe] sm:$0x1]  ;;  %v302_v29 = vsel %vm152_vm5, %v301_v54, %v300_v23  ;;  %v259_v54 = vld [vmem:[%s7177_s1 + $0x1] sm:$0x1]  ;;  %v432_v23 = vsel %vm140_vm1, %v431_v13, %v430_v19 }
 0x632   :  { %v1384_v35 = vmul.f32 %v6420_v32, %v6420_v32  ;;  %v427_v31 = vrot.slane %v374_v24, 1  ;;  %v262_v24 = vld [vmem:[%s7177_s1 + $0x7] sm:$0x1] }
 0x633   :  { %v1383_v0 = vmul.f32 %v6422_v34, %v6422_v34  ;;  %v341_v41 = vrot.slane %v262_v24, 5  ;;  %v271_v24 = vld [vmem:[%s7177_s1 + $0x19] sm:$0x1] }
 0x634   :  { %v1388_v30 = vsel %vm552_vm7, %v1384_v35, 0.0  ;;  %v252_v35 = vld [vmem:[%s7177_s1 + $0x12] sm:$0x1] }
 0x635   :  { %1389 = vadd.xlane.f32.xlu0 %v1388_v30  ;;  %v1385_v36 = vsel %vm552_vm7, %v1383_v0, 0.0  ;;  %v253_v0 = vld [vmem:[%s7177_s1 + $0x14] sm:$0x1]  ;;  %v6498_v30 = vsel %vm155_vm6, %v303_v57, %v302_v29  ;;  %v305_v46 = vrot.slane %v252_v35, 7  ;;  %v439_v57 = vrot.slane %v381_v10, 2 }
 0x636   :  { %1386 = vadd.xlane.f32.xlu1 %v1385_v36  ;;  %v424_v36 = vsel %vm149_vm4, %v423_v26, %v422_v25  ;;  %v307_v47 = vrot.slane %v253_v0, 6  ;;  %v263_v25 = vld [vmem:[%s7177_s1 + $0x9] sm:$0x1]  ;;  %v264_v26 = vld [vmem:[%s7177_s1 + $0xb] sm:$0x1]  ;;  %v339_v35 = vrot.slane %v261_v21, 6 }
 0x637   :  { %v426_v43 = vsel %vm152_vm5, %v425_v27, %v424_v36  ;;  %v306_v60 = vsel %vm137_vm0, %v305_v46, %v251_v28  ;;  %v434_v27 = vsel %vm143_vm2, %v433_v16, %v432_v23  ;;  %v441_v28 = vrot.slane %v382_v15, 1  ;;  %v265_v29 = vld [vmem:[%s7177_s1 + $0xd] sm:$0x1]  ;;  %v505_v0 = vld [vmem:[#allocation8 + $0x40] sm:$0xff]  ;;  %v267_v16 = vld [vmem:[%s7177_s1 + $0x11] sm:$0x1] }
 0x638   :  { %v428_v48 = vsel %vm155_vm6, %v427_v31, %v426_v43  ;;  %v308_v4 = vsel %vm140_vm1, %v307_v47, %v306_v60  ;;  %v337_v31 = vrot.slane %v260_v20, 7  ;;  %v436_v37 = vsel %vm146_vm3, %v435_v17, %v434_v27  ;;  %v506_v46 = vld [vmem:[#allocation8 + $0x48] sm:$0xff]  ;;  %v270_v20 = vld [vmem:[%s7177_s1 + $0x17] sm:$0x1] }
 0x639   :  { %v6522_v58 = vadd.f32 %v428_v48, %v6498_v30  ;;  %v310_v40 = vsel %vm143_vm2, %v309_v50, %v308_v4  ;;  %v343_v43 = vrot.slane %v263_v25, 4  ;;  %v438_v47 = vsel %vm149_vm4, %v437_v42, %v436_v37  ;;  %v268_v17 = vld [vmem:[%s7177_s1 + $0x13] sm:$0x1]  ;;  %v272_v25 = vld [vmem:[%s7177_s1 + $0x1b] sm:$0x1] }
 0x63a   :  { %v312_v14 = vsel %vm146_vm3, %v311_v51, %v310_v40  ;;  %v338_v48 = vsel %vm137_vm0, %v337_v31, %v259_v54  ;;  %v345_v49 = vrot.slane %v264_v26, 3  ;;  %v347_v50 = vrot.slane %v265_v29, 2  ;;  %v384_v51 = vld [vmem:[%s7179_s3 + $0x3] sm:$0x1]  ;;  %v390_v40 = vld [vmem:[%s7179_s3 + $0xf] sm:$0x1] }
 0x63b   :  { %5306 = vmatprep.mubr.msk.f32.mxu0 %vm552_vm7, %v6522_v58  ;;  %v314_v18 = vsel %vm149_vm4, %v313_v61, %v312_v14  ;;  %v440_v60 = vsel %vm152_vm5, %v439_v57, %v438_v47  ;;  %v340_v61 = vsel %vm140_vm1, %v339_v35, %v338_v48  ;;  %v5616_v4 = vpack.c.bf16 %v506_v46, %v505_v0  ;;  %v269_v57 = vld [vmem:[%s7177_s1 + $0x15] sm:$0x1]  ;;  %v273_v29 = vld [vmem:[%s7177_s1 + $0x1d] sm:$0x1]  ;;  %v274_v37 = vld [vmem:[%s7177_s1 + $0x1f] sm:$0x1] }
 0x63c   :  { %v316_v22 = vsel %vm152_vm5, %v315_v62, %v314_v18  ;;  %v386_v62 = vld [vmem:[%s7179_s3 + $0x7] sm:$0x1]  ;;  %v442_v5 = vsel %vm155_vm6, %v441_v28, %v440_v60  ;;  %v342_v6 = vsel %vm143_vm2, %v341_v41, %v340_v61  ;;  %v463_v10 = vrot.slane %v385_v52, 6 }
 0x63d   :  { %v6578_v36 = vsel %vm155_vm6, %v317_v9, %v316_v22  ;;  %v461_v9 = vrot.slane %v384_v51, 7  ;;  %v344_v13 = vsel %vm146_vm3, %v343_v43, %v342_v6  ;;  %v465_v14 = vrot.slane %v386_v62, 5  ;;  %5617 = vmatprep.subr.bf16.mxu1 %v5616_v4  ;;  %v394_v51 = vld [vmem:[%s7179_s3 + $0x17] sm:$0x1]  ;;  %v395_v62 = vld [vmem:[%s7179_s3 + $0x19] sm:$0x1] }
 0x63e   :  { %v6615_v12 = vadd.f32 %v442_v5, %v6578_v36  ;;  %v467_v15 = vrot.slane %v387_v1, 4  ;;  %v346_v54 = vsel %vm149_vm4, %v345_v49, %v344_v13  ;;  %v349_v18 = vrot.slane %v266_v38, 1  ;;  %5619 = vmatpush3.bf16.msra.mxu1 %v5616_v4  ;;  %v391_v49 = vld [vmem:[%s7179_s3 + $0x11] sm:$0x1]  ;;  %v396_v1 = vld [vmem:[%s7179_s3 + $0x1b] sm:$0x1] }
 0x63f   :  { %v462_v19 = vsel %vm137_vm0, %v461_v9, %v383_v45  ;;  %v469_v42 = vrot.slane %v388_v3, 3  ;;  %v348_v21 = vsel %vm152_vm5, %v347_v50, %v346_v54  ;;  %v471_v23 = vrot.slane %v389_v7, 2  ;;  %v392_v45 = vld [vmem:[%s7179_s3 + $0x13] sm:$0x1]  ;;  %v393_v50 = vld [vmem:[%s7179_s3 + $0x15] sm:$0x1] }
 0x640   :  { %5307 = vmatmul.mubr.msk.f32.vlgmr.msra.gmra.mrb[10].mxu0 %vm552_vm7, %v6615_v12  ;;  %v464_v22 = vsel %vm140_vm1, %v463_v10, %v462_v19  ;;  %v351_v26 = vrot.slane %v268_v17, 7  ;;  %v473_v28 = vrot.slane %v390_v40, 1  ;;  %v353_v31 = vrot.slane %v269_v57, 6  ;;  %v397_v5 = vld [vmem:[%s7179_s3 + $0x1d] sm:$0x1]  ;;  %v507_v40 = vld [vmem:[#allocation8 + $0x50] sm:$0xff] }
 0x641   :  { %v466_v27 = vsel %vm143_vm2, %v465_v14, %v464_v22  ;;  %v355_v35 = vrot.slane %v270_v20, 5  ;;  %v357_v41 = vrot.slane %v271_v24, 4  ;;  %v359_v43 = vrot.slane %v272_v25, 3  ;;  %v508_v9 = vld [vmem:[#allocation8 + $0x58] sm:$0xff]  ;;  %v515_v19 = vld [vmem:[#allocation8 + $0x80] sm:$0xff] }
 0x642   :  { %v468_v0 = vsel %vm146_vm3, %v467_v15, %v466_v27  ;;  %v352_v38 = vsel %vm137_vm0, %v351_v26, %v267_v16  ;;  %v6655_v46 = vsel %vm155_vm6, %v349_v18, %v348_v21  ;;  %v361_v61 = vrot.slane %v273_v29, 2  ;;  %v398_v14 = vld [vmem:[%s7179_s3 + $0x1f] sm:$0x1] }
 0x643   :  { %v470_v47 = vsel %vm149_vm4, %v469_v42, %v468_v0  ;;  %v354_v48 = vsel %vm140_vm1, %v353_v31, %v352_v38  ;;  %v475_v6 = vrot.slane %v392_v45, 7  ;;  %v477_v7 = vrot.slane %v393_v50, 6  ;;  %v516_v42 = vld [vmem:[#allocation8 + $0x88] sm:$0xff] }
 0x644   :  { %v472_v52 = vsel %vm152_vm5, %v471_v23, %v470_v47  ;;  %v356_v60 = vsel %vm143_vm2, %v355_v35, %v354_v48  ;;  %v479_v15 = vrot.slane %v394_v51, 5  ;;  %v481_v16 = vrot.slane %v395_v62, 4  ;;  %v4845_v48 = vld [vmem:[%s7185_s9 + $0x6] ss:$0 sm:$0xff] }
 0x645   :  { %v474_v3 = vsel %vm155_vm6, %v473_v28, %v472_v52  ;;  %v358_v4 = vsel %vm146_vm3, %v357_v41, %v356_v60  ;;  %v363_v17 = vrot.slane %v274_v37, 1  ;;  %v476_v54 = vsel %vm137_vm0, %v475_v6, %v391_v49  ;;  %v4846_v52 = vld [vmem:[%s7185_s9 + $0x7] ss:$0 sm:$0xff] }
 0x646   :  { %v6682_v10 = vadd.f32 %v474_v3, %v6655_v46  ;;  %v360_v13 = vsel %vm149_vm4, %v359_v43, %v358_v4  ;;  %v483_v18 = vrot.slane %v396_v1, 3  ;;  %v478_v20 = vsel %vm140_vm1, %v477_v7, %v476_v54  ;;  %v517_v3 = vld [vmem:[#allocation8 + $0x90] sm:$0xff]  ;;  %v518_v4 = vld [vmem:[#allocation8 + $0x98] sm:$0xff] }
 0x647   :  { %v362_v57 = vsel %vm152_vm5, %v361_v61, %v360_v13  ;;  %v485_v21 = vrot.slane %v397_v5, 2  ;;  %v5620_v22 = vpack.c.bf16 %v508_v9, %v507_v40  ;;  %v480_v23 = vsel %vm143_vm2, %v479_v15, %v478_v20 }
 0x648   :  { %5309 = vmatprep.mubr.msk.f32.mxu0 %vm552_vm7, %v6682_v10  ;;  %v487_v24 = vrot.slane %v398_v14, 1  ;;  %v5632_v25 = vpack.c.bf16 %v516_v42, %v515_v19  ;;  %v482_v26 = vsel %vm146_vm3, %v481_v16, %v480_v23  ;;  %v6696_v27 = vsel %vm155_vm6, %v363_v17, %v362_v57  ;;  %v4848_v42 = vld [vmem:[%s7185_s9 + $0x2] ss:$0 sm:$0xff] }
 0x649   :  { %5621 = vmatprep.subr.bf16.mxu1 %v5620_v22  ;;  %v484_v28 = vsel %vm149_vm4, %v483_v18, %v482_v26  ;;  %v5636_v6 = vpack.c.bf16 %v518_v4, %v517_v3 }
 0x64a   :  { %5623 = vmatpush3.bf16.msra.mxu1 %v5620_v22  ;;  %v486_v29 = vsel %vm152_vm5, %v485_v21, %v484_v28 }
 0x64b   :  { %5633 = vmatprep.subr.bf16.mxu1 %v5632_v25  ;;  %v488_v31 = vsel %vm155_vm6, %v487_v24, %v486_v29 }
 0x64c   :  { %v6702_v35 = vadd.f32 %v488_v31, %v6696_v27  ;;  %v4858_v31 = vld [vmem:[%s7185_s9 + $0x4] ss:$0 sm:$0xff] }
 0x64e   :  { %5310 = vmatmul.mubr.msk.f32.gmra.mrb[12].mxu0 %vm552_vm7, %v6702_v35 }
 0x6c2   :  { %v1390_v0 = vpop.xlane.xlu0 %1389 }
 0x6c3   :  { %v1392_v37 = vmul.f32 0.03125, %v1390_v0  ;;  %v1387_v38 = vpop.xlane.xlu1 %1386 }
 0x6c4   :  { %v1391_v41 = vmul.f32 0.03125, %v1387_v38 }
 0x6c5   :  { %v1394_v43 = vadd.f32 1e-05, %v1392_v37 }
 0x6c6   :  { %v1393_v45 = vadd.f32 1e-05, %v1391_v41 }
 0x6c7   :  { %5838 = vrsqrt.f32 %v1394_v43 }
 0x6c8   :  { %5840 = vrsqrt.f32 %v1393_v45 }
 0x6d1   :  { %v5839_v47 = vpop.eup %5838 }
 0x6d2   :  { %v5841_v49 = vpop.eup %5840  ;;  %v1398_v50 = vmul.f32 %v5839_v47, %v6420_v32 }
 0x6d3   :  { %v1397_v51 = vmul.f32 %v5841_v49, %v6422_v34  ;;  %v4852_v34 = vld [vmem:[%s7185_s9 + $0x3] ss:$0 sm:$0xff] }
 0x6d4   :  { %v1406_v60 = vmul.f32 %v4845_v48, %v1398_v50 }
 0x6d5   :  { %v1405_v61 = vmul.f32 %v4845_v48, %v1397_v51 }
 0x6d6   :  { %v6714_v62 = vadd.f32 %v4846_v52, %v1406_v60 }
 0x6d7   :  { %v6716_v1 = vadd.f32 %v4846_v52, %v1405_v61 }
 0x6d8   :  { %v1416_v32 = vadd.f32 %v6714_v62, %v6300_v33 }
 0x6d9   :  { %v1415_v5 = vadd.f32 %v6716_v1, %v6282_v11 }
 0x6db   :  { %5295 = vmatprep.mubr.msk.f32.mxu1 %vm552_vm7, %v1415_v5 }
 0x6dc   :  { %5296 = vmatmul.mubr.msk.f32.vlgmr.msra.gmra.mrb[12].mxu1 %vm552_vm7, %v1416_v32 }
 0x6dd   :  { %5635 = vmatpush3.bf16.msra.mxu1 %v5632_v25  ;;  %5320 = vmatprep.mubr.msk.f32.mxu1 %vm552_vm7, %v6498_v30 }
 0x6de   :  { %5637 = vmatprep.subr.bf16.mxu1 %v5636_v6 }
 0x6e1   :  { %5639 = vmatpush3.bf16.msra.mxu1 %v5636_v6 }
 0x6e4   :  { %5321 = vmatmul.mubr.msk.f32.vlgmr.msra.gmra.mrb[14].mxu1 %vm552_vm7, %v6578_v36 }
 0x6e5   :  { %5323 = vmatprep.mubr.msk.f32.mxu1 %vm552_vm7, %v6655_v46 }
 0x6e8   :  { %5324 = vmatmul.mubr.msk.f32.gmra.mrb[16].mxu1 %vm552_vm7, %v6696_v27 }
 0x713   :  { %v5308_v7 = vpop.f32.mrb[10].mxu0 }
 0x714   :  { %v1598_v40 = vadd.f32 %v5308_v7, %v4852_v34  ;;  %v1592_v9 = vpop.f32.mrb[11].mxu0 }
 0x715   :  { %v1593_v13 = vadd.f32 %v4852_v34, %v1592_v9 }
 0x717   :  { %v5640_v15 = vpack.c.bf16 %v1598_v40, %v1593_v13 }
 0x719   :  { %5642 = vmatprep.subr.msk.bf16.mxu0 %vm6737_vm9, %v5640_v15 }
 0x71a   :  { %5645 = vmatpush3.bf16.xpose.msk.msra.mxu0 %vm6737_vm9, %v5640_v15 }
 0x721   :  { %v5311_v16 = vpop.f32.mrb[12].mxu0 }
 0x722   :  { %v1608_v17 = vadd.f32 %v5311_v16, %v4852_v34  ;;  %v1602_v54 = vpop.f32.mrb[13].mxu0 }
 0x723   :  { %v1603_v18 = vadd.f32 %v4852_v34, %v1602_v54 }
 0x725   :  { %v5646_v19 = vpack.c.bf16 %v1608_v17, %v1603_v18 }
 0x727   :  { %5648 = vmatprep.subr.msk.bf16.mxu1 %vm6737_vm9, %v5646_v19 }
 0x728   :  { %5651 = vmatpush3.bf16.xpose.msk.msra.mxu1 %vm6737_vm9, %v5646_v19 }
 0x7af   :  { %v5297_v57 = vpop.f32.mrb[12].mxu1 }
 0x7b0   :  { %v1503_v20 = vadd.f32 %v5297_v57, %v4848_v42  ;;  %v1497_v21 = vpop.f32.mrb[13].mxu1 }
 0x7b1   :  { %v1498_v22 = vadd.f32 %v4848_v42, %v1497_v21 }
 0x7b2   :  { %v1717_v23 = vmul.f32 %v1503_v20, %v6338_v59  ;;  %v1715_v24 = vmul.f32 %v1503_v20, %v6318_v44  ;;  %v1719_v28 = vmul.f32 %v1503_v20, %v6342_v63  ;;  %v1721_v0 = vmul.f32 %v1503_v20, %v6348_v2 }
 0x7b3   :  { %v1716_v25 = vmul.f32 %v1498_v22, %v6338_v59  ;;  %v1714_v26 = vmul.f32 %v1498_v22, %v6318_v44  ;;  %v1718_v29 = vmul.f32 %v1498_v22, %v6342_v63  ;;  %v1720_v38 = vmul.f32 %v1498_v22, %v6348_v2 }
 0x7b4   :  { %5340 = vmatprep.mubr.msk.f32.mxu1 %vm552_vm7, %v1715_v24 }
 0x7b5   :  { %5330 = vmatprep.mubr.msk.f32.mxu0 %vm552_vm7, %v1714_v26  ;;  %5341 = vmatmul.mubr.msk.f32.vlgmr.msra.gmra.mrb[18].mxu1 %vm552_vm7, %v1717_v23 }
 0x7b6   :  { %5331 = vmatmul.mubr.msk.f32.vlgmr.msra.gmra.mrb[14].mxu0 %vm552_vm7, %v1716_v25  ;;  %5343 = vmatprep.mubr.msk.f32.mxu1 %vm552_vm7, %v1719_v28 }
 0x7b7   :  { %5333 = vmatprep.mubr.msk.f32.mxu0 %vm552_vm7, %v1718_v29  ;;  %v5322_v37 = vpop.f32.mrb[14].mxu1 }
 0x7b8   :  { %v1699_v41 = vadd.f32 %v5322_v37, %v4858_v31  ;;  %v1693_v43 = vpop.f32.mrb[15].mxu1 }
 0x7b9   :  { %5344 = vmatmul.mubr.msk.f32.gmra.mrb[20].mxu1 %vm552_vm7, %v1721_v0  ;;  %v1694_v45 = vadd.f32 %v4858_v31, %v1693_v43 }
 0x7ba   :  { %5334 = vmatmul.mubr.msk.f32.gmra.mrb[16].mxu0 %vm552_vm7, %v1720_v38 }
 0x7bb   :  { %v5652_v47 = vpack.c.bf16 %v1699_v41, %v1694_v45  ;;  %v5325_v48 = vpop.f32.mrb[16].mxu1 }
 0x7bc   :  { %v1709_v49 = vadd.f32 %v5325_v48, %v4858_v31  ;;  %v1703_v50 = vpop.f32.mrb[17].mxu1 }
 0x7bd   :  { %v1704_v51 = vadd.f32 %v4858_v31, %v1703_v50  ;;  %5653 = vmatprep.subr.bf16.mxu0 %v5652_v47 }
 0x7be   :  { %5655 = vmatpush3.bf16.msra.mxu0 %v5652_v47 }
 0x7bf   :  { %v5656_v52 = vpack.c.bf16 %v1709_v49, %v1704_v51 }
 0x7c1   :  { %5657 = vmatprep.subr.bf16.mxu1 %v5656_v52 }
 0x7c2   :  { %5659 = vmatpush3.bf16.msra.mxu1 %v5656_v52 }
 0x888   :  { %v5342_v60 = vpop.f32.mrb[18].mxu1 }
 0x889   :  { %v5332_v61 = vpop.f32.mrb[14].mxu0  ;;  %v1909_v3 = vpop.f32.mrb[19].mxu1  ;;  %v1944_v4 = vsel %vm1928_vm10, %v5342_v60, -inf }
 0x88a   :  { %1945 = vmax.xlane.f32.xlu0 %v1944_v4  ;;  %v1806_v5 = vpop.f32.mrb[15].mxu0  ;;  %v1941_v32 = vsel %vm1928_vm10, %v1909_v3, -inf  ;;  %v1932_v40 = vsel %vm1928_vm10, %v5332_v61, -inf }
 0x88b   :  { %1942 = vmax.xlane.f32.xlu1 %v1941_v32  ;;  %v1929_v13 = vsel %vm1928_vm10, %v1806_v5, -inf }
 0x88c   :  { %v5345_v6 = vpop.f32.mrb[20].mxu1 }
 0x88d   :  { %v5335_v34 = vpop.f32.mrb[16].mxu0  ;;  %v1919_v7 = vpop.f32.mrb[21].mxu1  ;;  %v1950_v17 = vsel %vm1928_vm10, %v5345_v6, -inf }
 0x88e   :  { %1933 = vmax.xlane.f32.xlu0 %v1932_v40  ;;  %v1816_v9 = vpop.f32.mrb[17].mxu0  ;;  %v1938_v15 = vsel %vm1928_vm10, %v5335_v34, -inf  ;;  %v1947_v54 = vsel %vm1928_vm10, %v1919_v7, -inf }
 0x88f   :  { %1930 = vmax.xlane.f32.xlu1 %v1929_v13  ;;  %v1935_v16 = vsel %vm1928_vm10, %v1816_v9, -inf }
 0x892   :  { %1939 = vmax.xlane.f32.xlu0 %v1938_v15 }
 0x893   :  { %1936 = vmax.xlane.f32.xlu1 %v1935_v16 }
 0x896   :  { %1951 = vmax.xlane.f32.xlu0 %v1950_v17 }
 0x897   :  { %1948 = vmax.xlane.f32.xlu1 %v1947_v54 }
 0x917   :  { %v1946_v18 = vpop.xlane.xlu0 %1945 }
 0x918   :  { %v1958_v19 = vsub.f32 %v5342_v60, %v1946_v18  ;;  %v1943_v42 = vpop.xlane.xlu1 %1942 }
 0x919   :  { %v1957_v57 = vsub.f32 %v1909_v3, %v1943_v42 }
 0x91a   :  { %v1971_v20 = vmul.f32 1.442695, %v1958_v19 }
 0x91b   :  { %v1969_v21 = vmul.f32 1.442695, %v1957_v57  ;;  %v1934_v22 = vpop.xlane.xlu0 %1933 }
 0x91c   :  { %5842 = vpow2.f32 %v1971_v20  ;;  %v1954_v23 = vsub.f32 %v5332_v61, %v1934_v22  ;;  %v1931_v24 = vpop.xlane.xlu1 %1930 }
 0x91d   :  { %5844 = vpow2.f32 %v1969_v21  ;;  %v1953_v25 = vsub.f32 %v1806_v5, %v1931_v24 }
 0x91e   :  { %v1963_v26 = vmul.f32 1.442695, %v1954_v23 }
 0x91f   :  { %v1961_v28 = vmul.f32 1.442695, %v1953_v25  ;;  %v1940_v29 = vpop.xlane.xlu0 %1939 }
 0x920   :  { %5846 = vpow2.f32 %v1963_v26  ;;  %v1956_v31 = vsub.f32 %v5335_v34, %v1940_v29  ;;  %v1937_v0 = vpop.xlane.xlu1 %1936 }
 0x921   :  { %5848 = vpow2.f32 %v1961_v28  ;;  %v1955_v37 = vsub.f32 %v1816_v9, %v1937_v0 }
 0x922   :  { %v1967_v38 = vmul.f32 1.442695, %v1956_v31 }
 0x923   :  { %v1965_v41 = vmul.f32 1.442695, %v1955_v37  ;;  %v1952_v43 = vpop.xlane.xlu0 %1951 }
 0x924   :  { %5850 = vpow2.f32 %v1967_v38  ;;  %v1960_v45 = vsub.f32 %v5345_v6, %v1952_v43  ;;  %v1949_v47 = vpop.xlane.xlu1 %1948 }
 0x925   :  { %5852 = vpow2.f32 %v1965_v41  ;;  %v1959_v48 = vsub.f32 %v1919_v7, %v1949_v47 }
 0x926   :  { %v5843_v49 = vpop.eup %5842  ;;  %v1975_v50 = vmul.f32 1.442695, %v1960_v45 }
 0x927   :  { %v5845_v51 = vpop.eup %5844  ;;  %v1973_v52 = vmul.f32 1.442695, %v1959_v48  ;;  %v1992_v60 = vsel %vm1928_vm10, %v5843_v49, 0.0 }
 0x928   :  { %5854 = vpow2.f32 %v1975_v50  ;;  %1993 = vadd.xlane.f32.xlu0 %v1992_v60  ;;  %v1989_v61 = vsel %vm1928_vm10, %v5845_v51, 0.0  ;;  %v521_v50 = vld [vmem:[#allocation8 + $0xa8] sm:$0xff]  ;;  %v523_v60 = vld [vmem:[#allocation8 + $0xb8] sm:$0xff] }
 0x929   :  { %5856 = vpow2.f32 %v1973_v52  ;;  %1990 = vadd.xlane.f32.xlu1 %v1989_v61  ;;  %v522_v52 = vld [vmem:[#allocation8 + $0xb0] sm:$0xff] }
 0x92a   :  { %v5847_v3 = vpop.eup %5846  ;;  %v5664_v61 = vpack.c.bf16 %v523_v60, %v522_v52  ;;  %v4812_v60 = vld [vmem:[%s7182_s6 + $0x28] sm:$0xff] }
 0x92b   :  { %v5849_v4 = vpop.eup %5848  ;;  %v1980_v5 = vsel %vm1928_vm10, %v5847_v3, 0.0 }
 0x92c   :  { %1981 = vadd.xlane.f32.xlu0 %v1980_v5  ;;  %v1977_v32 = vsel %vm1928_vm10, %v5849_v4, 0.0 }
 0x92d   :  { %1978 = vadd.xlane.f32.xlu1 %v1977_v32 }
 0x92e   :  { %v5851_v6 = vpop.eup %5850 }
 0x92f   :  { %v5853_v34 = vpop.eup %5852  ;;  %v1986_v7 = vsel %vm1928_vm10, %v5851_v6, 0.0 }
 0x930   :  { %1987 = vadd.xlane.f32.xlu0 %v1986_v7  ;;  %v1983_v40 = vsel %vm1928_vm10, %v5853_v34, 0.0 }
 0x931   :  { %1984 = vadd.xlane.f32.xlu1 %v1983_v40 }
 0x932   :  { %v5855_v9 = vpop.eup %5854 }
 0x933   :  { %v5857_v13 = vpop.eup %5856  ;;  %v1998_v15 = vsel %vm1928_vm10, %v5855_v9, 0.0 }
 0x934   :  { %1999 = vadd.xlane.f32.xlu0 %v1998_v15  ;;  %v1995_v16 = vsel %vm1928_vm10, %v5857_v13, 0.0 }
 0x935   :  { %1996 = vadd.xlane.f32.xlu1 %v1995_v16 }
 0x9b5   :  { %v1994_v17 = vpop.xlane.xlu0 %1993 }
 0x9b6   :  { %5858 = vrcp.f32 %v1994_v17  ;;  %v1991_v54 = vpop.xlane.xlu1 %1990 }
 0x9b7   :  { %5860 = vrcp.f32 %v1991_v54 }
 0x9b9   :  { %v1982_v18 = vpop.xlane.xlu0 %1981 }
 0x9ba   :  { %5862 = vrcp.f32 %v1982_v18  ;;  %v1979_v19 = vpop.xlane.xlu1 %1978 }
 0x9bb   :  { %5864 = vrcp.f32 %v1979_v19 }
 0x9bd   :  { %v1988_v42 = vpop.xlane.xlu0 %1987 }
 0x9be   :  { %5866 = vrcp.f32 %v1988_v42  ;;  %v1985_v57 = vpop.xlane.xlu1 %1984 }
 0x9bf   :  { %5868 = vrcp.f32 %v1985_v57 }
 0x9c0   :  { %v5859_v20 = vpop.eup %5858 }
 0x9c1   :  { %v5861_v21 = vpop.eup %5860  ;;  %v2000_v22 = vpop.xlane.xlu0 %1999  ;;  %v2012_v25 = vmul.f32 %v5859_v20, %v5843_v49  ;;  %v520_v49 = vld [vmem:[#allocation8 + $0xa0] sm:$0xff] }
 0x9c2   :  { %5870 = vrcp.f32 %v2000_v22  ;;  %v1997_v23 = vpop.xlane.xlu1 %1996  ;;  %v2010_v24 = vmul.f32 %v5861_v21, %v5845_v51  ;;  %v5660_v51 = vpack.c.bf16 %v521_v50, %v520_v49 }
 0x9c3   :  { %5872 = vrcp.f32 %v1997_v23 }
 0x9c4   :  { %v5863_v26 = vpop.eup %5862  ;;  %5360 = vmatprep.mubr.msk.f32.mxu1 %vm1928_vm10, %v2010_v24  ;;  %5661 = vmatprep.subr.bf16.mxu0 %v5660_v51  ;;  %v4884_v24 = vld [vmem:[%s7185_s9 + $0x5] ss:$0 sm:$0xff] }
 0x9c5   :  { %v5865_v28 = vpop.eup %5864  ;;  %5361 = vmatmul.mubr.msk.f32.vlgmr.msra.gmra.mrb[22].mxu1 %vm1928_vm10, %v2012_v25  ;;  %v2004_v31 = vmul.f32 %v5863_v26, %v5847_v3 }
 0x9c6   :  { %v2002_v29 = vmul.f32 %v5865_v28, %v5849_v4 }
 0x9c8   :  { %v5867_v0 = vpop.eup %5866  ;;  %5350 = vmatprep.mubr.msk.f32.mxu0 %vm1928_vm10, %v2002_v29 }
 0x9c9   :  { %v5869_v37 = vpop.eup %5868  ;;  %5351 = vmatmul.mubr.msk.f32.vlgmr.msra.gmra.mrb[18].mxu0 %vm1928_vm10, %v2004_v31  ;;  %v2008_v41 = vmul.f32 %v5867_v0, %v5851_v6 }
 0x9ca   :  { %v2006_v38 = vmul.f32 %v5869_v37, %v5853_v34  ;;  %5663 = vmatpush3.bf16.msra.mxu0 %v5660_v51 }
 0x9cb   :  { %5665 = vmatprep.subr.bf16.mxu0 %v5664_v61 }
 0x9cc   :  { %v5871_v43 = vpop.eup %5870  ;;  %5353 = vmatprep.mubr.msk.f32.mxu0 %vm1928_vm10, %v2006_v38 }
 0x9cd   :  { %v5873_v45 = vpop.eup %5872  ;;  %5354 = vmatmul.mubr.msk.f32.gmra.mrb[20].mxu0 %vm1928_vm10, %v2008_v41  ;;  %v2016_v48 = vmul.f32 %v5871_v43, %v5855_v9 }
 0x9ce   :  { %v2014_v47 = vmul.f32 %v5873_v45, %v5857_v13  ;;  %5667 = vmatpush3.bf16.msra.mxu0 %v5664_v61 }
 0x9d0   :  { %5363 = vmatprep.mubr.msk.f32.mxu1 %vm1928_vm10, %v2014_v47 }
 0x9d1   :  { %5364 = vmatmul.mubr.msk.f32.gmra.mrb[24].mxu1 %vm1928_vm10, %v2016_v48 }
 0xa98   :  { %v5362_v3 = vpop.f32.mrb[22].mxu1 }
 0xa99   :  { %v2214_v4 = vmul.f32 %v5362_v3, %v6389_v55  ;;  %v2192_v5 = vpop.f32.mrb[23].mxu1  ;;  %v4813_v3 = vld [vmem:[%s7182_s6 + $0x30] sm:$0xff] }
 0xa9a   :  { %v2212_v32 = vmul.f32 %v2192_v5, %v6393_v56 }
 0xa9c   :  { %v2216_v6 = vadd.f32 %v2214_v4, %v2212_v32  ;;  %v5352_v34 = vpop.f32.mrb[18].mxu0  ;;  %v4814_v4 = vld [vmem:[%s7182_s6 + $0x38] sm:$0xff]  ;;  %v536_v32 = vld [vmem:[%s7183_s7] sm:$0xff] }
 0xa9d   :  { %v2213_v7 = vmul.f32 %v5352_v34, %v6389_v55  ;;  %v2095_v40 = vpop.f32.mrb[19].mxu0  ;;  %v5672_v5 = vpack.c.bf16 %v4814_v4, %v4813_v3  ;;  %v538_v34 = vld [vmem:[%s7183_s7 + $0x10] sm:$0xff] }
 0xa9e   :  { %v2211_v9 = vmul.f32 %v2095_v40, %v6393_v56  ;;  %v539_v40 = vld [vmem:[%s7183_s7 + $0x18] sm:$0xff] }
 0xaa0   :  { %v2215_v13 = vadd.f32 %v2213_v7, %v2211_v9  ;;  %v5355_v15 = vpop.f32.mrb[20].mxu0  ;;  %v5680_v9 = vpack.c.bf16 %v539_v40, %v538_v34 }
 0xaa1   :  { %v2105_v16 = vpop.f32.mrb[21].mxu0  ;;  %v2221_v54 = vmul.f32 %v5355_v15, %v6405_v8  ;;  %v541_v15 = vld [vmem:[%s7183_s7 + $0x28] sm:$0xff] }
 0xaa2   :  { %v2217_v17 = vmul.f32 %v2105_v16, %v6401_v53 }
 0xaa4   :  { %v2219_v18 = vadd.f32 %v2217_v17, %v2215_v13  ;;  %v5365_v19 = vpop.f32.mrb[24].mxu1  ;;  %v540_v13 = vld [vmem:[%s7183_s7 + $0x20] sm:$0xff] }
 0xaa5   :  { %v2202_v42 = vpop.f32.mrb[25].mxu1  ;;  %v2222_v21 = vmul.f32 %v5365_v19, %v6405_v8  ;;  %v5684_v16 = vpack.c.bf16 %v541_v15, %v540_v13 }
 0xaa6   :  { %v2223_v57 = vadd.f32 %v2221_v54, %v2219_v18  ;;  %v2218_v20 = vmul.f32 %v2202_v42, %v6401_v53 }
 0xaa8   :  { %v2220_v22 = vadd.f32 %v2218_v20, %v2216_v6  ;;  %5374 = vmatprep.mubr.msk.f32.mxu0 %vm552_vm7, %v2223_v57  ;;  %v537_v6 = vld [vmem:[%s7183_s7 + $0x8] sm:$0xff] }
 0xaa9   :  { %v5676_v7 = vpack.c.bf16 %v537_v6, %v536_v32 }
 0xaaa   :  { %v2224_v23 = vadd.f32 %v2222_v21, %v2220_v22  ;;  %v4889_v21 = vld [vmem:[%s7185_s9 + $0x8] ss:$0 sm:$0xff] }
 0xaab   :  { %5677 = vmatprep.subr.bf16.mxu0 %v5676_v7 }
 0xaac   :  { %5375 = vmatmul.mubr.msk.f32.vlgmr.msra.gmra.mrb[22].mxu0 %vm552_vm7, %v2224_v23 }
 0xaad   :  { %5679 = vmatpush3.bf16.msra.mxu0 %v5676_v7 }
 0xaae   :  { %5681 = vmatprep.subr.bf16.mxu0 %v5680_v9 }
 0xab1   :  { %5683 = vmatpush3.bf16.msra.mxu0 %v5680_v9 }
 0xab2   :  { %5685 = vmatprep.subr.bf16.mxu0 %v5684_v16 }
 0xab5   :  { %5687 = vmatpush3.bf16.msra.mxu0 %v5684_v16 }
 0xb7f   :  { %v5376_v25 = vpop.f32.mrb[22].mxu0 }
 0xb80   :  { %v2309_v26 = vadd.f32 %v5376_v25, %v4884_v24  ;;  %v2303_v28 = vpop.f32.mrb[23].mxu0  ;;  %v4890_v25 = vld [vmem:[%s7185_s9 + $0x9] ss:$0 sm:$0xff] }
 0xb81   :  { %v2304_v29 = vadd.f32 %v4884_v24, %v2303_v28 }
 0xb82   :  { %v2313_v31 = vadd.f32 %v2309_v26, %v6714_v62 }
 0xb83   :  { %v2312_v0 = vadd.f32 %v2304_v29, %v6716_v1  ;;  %v4811_v1 = vld [vmem:[%s7182_s6 + $0x20] sm:$0xff] }
 0xb84   :  { %v2321_v37 = vsel %vm552_vm7, %v2313_v31, 0.0  ;;  %v5668_v61 = vpack.c.bf16 %v4812_v60, %v4811_v1 }
 0xb85   :  { %2322 = vadd.xlane.f32.xlu0 %v2321_v37  ;;  %v2318_v38 = vsel %vm552_vm7, %v2312_v0, 0.0  ;;  %v543_v37 = vld [vmem:[%s7183_s7 + $0x38] sm:$0xff] }
 0xb86   :  { %2319 = vadd.xlane.f32.xlu1 %v2318_v38  ;;  %5669 = vmatprep.subr.bf16.mxu1 %v5668_v61 }
 0xb87   :  { %5671 = vmatpush3.bf16.msra.mxu1 %v5668_v61 }
 0xb88   :  { %5673 = vmatprep.subr.bf16.mxu1 %v5672_v5 }
 0xb8b   :  { %5675 = vmatpush3.bf16.msra.mxu1 %v5672_v5 }
 0xc12   :  { %v2323_v41 = vpop.xlane.xlu0 %2322 }
 0xc13   :  { %v2325_v43 = vmul.f32 0.03125, %v2323_v41  ;;  %v2320_v45 = vpop.xlane.xlu1 %2319  ;;  %v4891_v41 = vld [vmem:[#allocation10 + $0x1] ss:$0 sm:$0xff] }
 0xc14   :  { %v2324_v47 = vmul.f32 0.03125, %v2320_v45 }
 0xc15   :  { %v2327_v48 = vsub.f32 %v2313_v31, %v2325_v43 }
 0xc16   :  { %v2326_v49 = vsub.f32 %v2312_v0, %v2324_v47  ;;  %v542_v0 = vld [vmem:[%s7183_s7 + $0x30] sm:$0xff] }
 0xc17   :  { %v2329_v50 = vmul.f32 %v2327_v48, %v2327_v48  ;;  %v5688_v38 = vpack.c.bf16 %v543_v37, %v542_v0  ;;  %v4900_v37 = vld [vmem:[%s7185_s9 + $0xa] ss:$0 sm:$0xff] }
 0xc18   :  { %v2328_v51 = vmul.f32 %v2326_v49, %v2326_v49 }
 0xc19   :  { %v2333_v52 = vsel %vm552_vm7, %v2329_v50, 0.0  ;;  %5689 = vmatprep.subr.bf16.mxu0 %v5688_v38 }
 0xc1a   :  { %2334 = vadd.xlane.f32.xlu0 %v2333_v52  ;;  %v2330_v62 = vsel %vm552_vm7, %v2328_v51, 0.0  ;;  %5691 = vmatpush3.bf16.msra.mxu0 %v5688_v38  ;;  %v4895_v51 = vld [vmem:[%s7185_s9 + $0xc] ss:$0 sm:$0xff] }
 0xc1b   :  { %2331 = vadd.xlane.f32.xlu1 %v2330_v62 }
 0xca7   :  { %v2335_v17 = vpop.xlane.xlu0 %2334 }
 0xca8   :  { %v2337_v54 = vmul.f32 0.03125, %v2335_v17  ;;  %v2332_v18 = vpop.xlane.xlu1 %2331 }
 0xca9   :  { %v2336_v19 = vmul.f32 0.03125, %v2332_v18  ;;  %v4903_v18 = vld [vmem:[%s7182_s6 + $0x48] sm:$0xff] }
 0xcaa   :  { %v2339_v42 = vadd.f32 1e-05, %v2337_v54  ;;  %v4902_v54 = vld [vmem:[%s7182_s6 + $0x40] sm:$0xff] }
 0xcab   :  { %v2338_v57 = vadd.f32 1e-05, %v2336_v19  ;;  %v5692_v19 = vpack.c.bf16 %v4903_v18, %v4902_v54 }
 0xcac   :  { %5874 = vrsqrt.f32 %v2339_v42  ;;  %v4904_v42 = vld [vmem:[%s7182_s6 + $0x50] sm:$0xff] }
 0xcad   :  { %5876 = vrsqrt.f32 %v2338_v57  ;;  %5693 = vmatprep.subr.bf16.mxu1 %v5692_v19  ;;  %v4905_v57 = vld [vmem:[%s7182_s6 + $0x58] sm:$0xff] }
 0xcb6   :  { %v5875_v20 = vpop.eup %5874 }
 0xcb7   :  { %v5877_v22 = vpop.eup %5876  ;;  %v2343_v23 = vmul.f32 %v5875_v20, %v2327_v48  ;;  %v5696_v20 = vpack.c.bf16 %v4905_v57, %v4904_v42 }
 0xcb8   :  { %v2342_v24 = vmul.f32 %v5877_v22, %v2326_v49  ;;  %v2589_v22 = vld [vmem:[#allocation8 + $0xc8] sm:$0xff] }
 0xcb9   :  { %v2351_v26 = vmul.f32 %v4889_v21, %v2343_v23 }
 0xcba   :  { %v2350_v28 = vmul.f32 %v4889_v21, %v2342_v24  ;;  %v2588_v21 = vld [vmem:[#allocation8 + $0xc0] sm:$0xff] }
 0xcbb   :  { %v2359_v31 = vadd.f32 %v4890_v25, %v2351_v26  ;;  %v5700_v23 = vpack.c.bf16 %v2589_v22, %v2588_v21 }
 0xcbc   :  { %v2358_v29 = vadd.f32 %v4890_v25, %v2350_v28 }
 0xcbe   :  { %5385 = vmatprep.mubr.msk.f32.mxu1 %vm552_vm7, %v2358_v29 }
 0xcbf   :  { %5386 = vmatmul.mubr.msk.f32.vlgmr.msra.gmra.mrb[26].mxu1 %vm552_vm7, %v2359_v31 }
 0xcc0   :  { %5695 = vmatpush3.bf16.msra.mxu1 %v5692_v19 }
 0xcc1   :  { %5697 = vmatprep.subr.bf16.mxu1 %v5696_v20 }
 0xcc4   :  { %5699 = vmatpush3.bf16.msra.mxu1 %v5696_v20 }
 0xcc5   :  { %5701 = vmatprep.subr.bf16.mxu1 %v5700_v23 }
 0xd92   :  { %v5387_v43 = vpop.f32.mrb[26].mxu1 }
 0xd93   :  { %v2444_v45 = vadd.f32 %v5387_v43, %v4891_v41  ;;  %v2438_v47 = vpop.f32.mrb[27].mxu1 }
 0xd94   :  { %v2439_v48 = vadd.f32 %v4891_v41, %v2438_v47 }
 0xd95   :  { %v2448_v50 = vmax.f32 %v2444_v45, 0.0  ;;  %v4901_v45 = vld [vmem:[%s7185_s9 + $0xb] ss:$0 sm:$0xff] }
 0xd96   :  { %v2447_v49 = vmax.f32 %v2439_v48, 0.0 }
 0xd98   :  { %5404 = vmatprep.mubr.msk.f32.mxu0 %vm2457_vm11, %v2447_v49 }
 0xd99   :  { %5405 = vmatmul.mubr.msk.f32.vlgmr.msra.gmra.mrb[24].mxu0 %vm2457_vm11, %v2448_v50 }
 0xe6c   :  { %v5406_v52 = vpop.f32.mrb[24].mxu0 }
 0xe6d   :  { %v2536_v62 = vadd.f32 %v5406_v52, %v4895_v51  ;;  %v2530_v1 = vpop.f32.mrb[25].mxu0  ;;  %v2591_v52 = vld [vmem:[#allocation8 + $0xd8] sm:$0xff] }
 0xe6e   :  { %v2531_v60 = vadd.f32 %v4895_v51, %v2530_v1  ;;  %v2590_v51 = vld [vmem:[#allocation8 + $0xd0] sm:$0xff] }
 0xe6f   :  { %v2540_v61 = vadd.f32 %v2536_v62, %v2359_v31 }
 0xe70   :  { %v2539_v3 = vadd.f32 %v2531_v60, %v2358_v29  ;;  %v5704_v60 = vpack.c.bf16 %v2591_v52, %v2590_v51 }
 0xe71   :  { %v2548_v4 = vsel %vm552_vm7, %v2540_v61, 0.0 }
 0xe72   :  { %2549 = vadd.xlane.f32.xlu0 %v2548_v4  ;;  %v2545_v5 = vsel %vm552_vm7, %v2539_v3, 0.0 }
 0xe73   :  { %2546 = vadd.xlane.f32.xlu1 %v2545_v5 }
 0xeff   :  { %v2550_v32 = vpop.xlane.xlu0 %2549 }
 0xf00   :  { %v2552_v6 = vmul.f32 0.03125, %v2550_v32  ;;  %v2547_v34 = vpop.xlane.xlu1 %2546 }
 0xf01   :  { %v2551_v7 = vmul.f32 0.03125, %v2547_v34 }
 0xf02   :  { %v2554_v40 = vsub.f32 %v2540_v61, %v2552_v6  ;;  %v4918_v61 = vld [vmem:[#allocation10 + $0x2] ss:$0 sm:$0xff] }
 0xf03   :  { %v2553_v9 = vsub.f32 %v2539_v3, %v2551_v7 }
 0xf04   :  { %v2556_v13 = vmul.f32 %v2554_v40, %v2554_v40 }
 0xf05   :  { %v2555_v15 = vmul.f32 %v2553_v9, %v2553_v9 }
 0xf06   :  { %v2560_v16 = vsel %vm552_vm7, %v2556_v13, 0.0 }
 0xf07   :  { %2561 = vadd.xlane.f32.xlu0 %v2560_v16  ;;  %v2557_v17 = vsel %vm552_vm7, %v2555_v15, 0.0 }
 0xf08   :  { %2558 = vadd.xlane.f32.xlu1 %v2557_v17 }
 0xf94   :  { %v2562_v24 = vpop.xlane.xlu0 %2561 }
 0xf95   :  { %v2564_v25 = vmul.f32 0.03125, %v2562_v24  ;;  %v2559_v26 = vpop.xlane.xlu1 %2558 }
 0xf96   :  { %v2563_v28 = vmul.f32 0.03125, %v2559_v26 }
 0xf97   :  { %v2566_v29 = vadd.f32 1e-05, %v2564_v25 }
 0xf98   :  { %v2565_v31 = vadd.f32 1e-05, %v2563_v28 }
 0xf99   :  { %5878 = vrsqrt.f32 %v2566_v29 }
 0xf9a   :  { %5880 = vrsqrt.f32 %v2565_v31 }
 0xfa3   :  { %v5879_v0 = vpop.eup %5878 }
 0xfa4   :  { %v5881_v38 = vpop.eup %5880  ;;  %v2570_v41 = vmul.f32 %v5879_v0, %v2554_v40 }
 0xfa5   :  { %v2569_v43 = vmul.f32 %v5881_v38, %v2553_v9  ;;  %v4922_v9 = vld [vmem:[%s7185_s9 + $0xd] ss:$0 sm:$0xff] }
 0xfa6   :  { %v2578_v47 = vmul.f32 %v4900_v37, %v2570_v41 }
 0xfa7   :  { %v2577_v48 = vmul.f32 %v4900_v37, %v2569_v43 }
 0xfa8   :  { %v6885_v49 = vadd.f32 %v4901_v45, %v2578_v47 }
 0xfa9   :  { %v6887_v50 = vadd.f32 %v4901_v45, %v2577_v48 }
 0xfaa   :  { %v2641_v1 = vadd.f32 %v6885_v49, %v6300_v33 }
 0xfab   :  { %v2640_v62 = vadd.f32 %v6887_v50, %v6282_v11 }
 0xfad   :  { %5415 = vmatprep.mubr.msk.f32.mxu1 %vm552_vm7, %v2640_v62 }
 0xfae   :  { %5416 = vmatmul.mubr.msk.f32.vlgmr.msra.gmra.mrb[28].mxu1 %vm552_vm7, %v2641_v1 }
 0xfaf   :  { %5703 = vmatpush3.bf16.msra.mxu1 %v5700_v23  ;;  %5426 = vmatprep.mubr.msk.f32.mxu1 %vm552_vm7, %v6887_v50 }
 0xfb0   :  { %5705 = vmatprep.subr.bf16.mxu1 %v5704_v60 }
 0xfb3   :  { %5707 = vmatpush3.bf16.msra.mxu1 %v5704_v60 }
 0xfb6   :  { %5427 = vmatmul.mubr.msk.f32.vlgmr.msra.gmra.mrb[30].mxu1 %vm552_vm7, %v6885_v49 }
0x1081   :  { %v5417_v3 = vpop.f32.mrb[28].mxu1 }
0x1082   :  { %v2726_v4 = vadd.f32 %v5417_v3, %v4918_v61  ;;  %v2720_v5 = vpop.f32.mrb[29].mxu1 }
0x1083   :  { %v2721_v32 = vadd.f32 %v4918_v61, %v2720_v5 }
0x1084   :  { %2931 = vrot.lane.b32.xlu0 %v2726_v4, %s6113_s22  ;;  %v2821_v6 = vmul.f32 %v2726_v4, %v6318_v44  ;;  %v2823_v54 = vmul.f32 %v2726_v4, %v6338_v59  ;;  %v2825_v19 = vmul.f32 %v2726_v4, %v6342_v63  ;;  %v2827_v57 = vmul.f32 %v2726_v4, %v6348_v2 }
0x1085   :  { %2829 = vrot.lane.b32.xlu1 %v2721_v32, %s6113_s22  ;;  %v2820_v34 = vmul.f32 %v2721_v32, %v6318_v44  ;;  %v2822_v18 = vmul.f32 %v2721_v32, %v6338_v59  ;;  %v2824_v42 = vmul.f32 %v2721_v32, %v6342_v63  ;;  %v2826_v20 = vmul.f32 %v2721_v32, %v6348_v2 }
0x1086   :  { %5439 = vmatprep.mubr.msk.f32.mxu1 %vm552_vm7, %v2821_v6 }
0x1087   :  { %5431 = vmatprep.mubr.msk.f32.mxu0 %vm552_vm7, %v2820_v34 }
0x1089   :  { %v5428_v7 = vpop.f32.mrb[30].mxu1 }
0x108a   :  { %v2809_v40 = vpop.f32.mrb[31].mxu1  ;;  %v2815_v15 = vadd.f32 %v5428_v7, %v4922_v9 }
0x108b   :  { %v2810_v17 = vadd.f32 %v4922_v9, %v2809_v40 }
0x10f6   :  { %v2932_v13 = vpop.permute.xlu0 %2931 }
0x10f7   :  { %5437 = vmatprep.subr.msk.mxu1 %vm552_vm7, %v2932_v13  ;;  %v2830_v16 = vpop.permute.xlu1 %2829 }
0x10f8   :  { %5429 = vmatprep.subr.msk.mxu0 %vm552_vm7, %v2830_v16  ;;  %5438 = vmatpush3.xpose.msk.msra.mxu1 %vm552_vm7, %v2932_v13 }
0x10f9   :  { %5430 = vmatpush3.xpose.msk.msra.mxu0 %vm552_vm7, %v2830_v16  ;;  %5453 = vmatprep.subr.mxu1 %v2815_v15 }
0x10fa   :  { %5445 = vmatprep.subr.mxu0 %v2810_v17 }
0x10fb   :  { %5440 = vmatmul.mubr.msk.f32.vlgmr.msra.gmra.mrb[32].mxu1 %vm552_vm7, %v2823_v54 }
0x10fc   :  { %5432 = vmatmul.mubr.msk.f32.vlgmr.msra.gmra.mrb[26].mxu0 %vm552_vm7, %v2822_v18  ;;  %5442 = vmatprep.mubr.msk.f32.mxu1 %vm552_vm7, %v2825_v19 }
0x10fd   :  { %5454 = vmatpush3.msra.mxu1 %v2815_v15  ;;  %5434 = vmatprep.mubr.msk.f32.mxu0 %vm552_vm7, %v2824_v42 }
0x10fe   :  { %5446 = vmatpush3.msra.mxu0 %v2810_v17 }
0x10ff   :  { %5443 = vmatmul.mubr.msk.f32.gmra.mrb[34].mxu1 %vm552_vm7, %v2827_v57 }
0x1100   :  { %5435 = vmatmul.mubr.msk.f32.gmra.mrb[28].mxu0 %vm552_vm7, %v2826_v20 }
0x11ce   :  { %v5441_v21 = vpop.f32.mrb[32].mxu1 }
0x11cf   :  { %v5433_v22 = vpop.f32.mrb[26].mxu0  ;;  %v3013_v23 = vpop.f32.mrb[33].mxu1  ;;  %v3047_v24 = vsel %vm958_vm8, %v5441_v21, -inf }
0x11d0   :  { %3048 = vmax.xlane.f32.xlu0 %v3047_v24  ;;  %v2911_v25 = vpop.f32.mrb[27].mxu0  ;;  %v3044_v26 = vsel %vm958_vm8, %v3013_v23, -inf  ;;  %v3035_v0 = vsel %vm958_vm8, %v5433_v22, -inf }
0x11d1   :  { %3045 = vmax.xlane.f32.xlu1 %v3044_v26  ;;  %v3032_v38 = vsel %vm958_vm8, %v2911_v25, -inf }
0x11d2   :  { %v5444_v28 = vpop.f32.mrb[34].mxu1 }
0x11d3   :  { %v5436_v29 = vpop.f32.mrb[28].mxu0  ;;  %v3023_v31 = vpop.f32.mrb[35].mxu1  ;;  %v3053_v45 = vsel %vm958_vm8, %v5444_v28, -inf }
0x11d4   :  { %3036 = vmax.xlane.f32.xlu0 %v3035_v0  ;;  %v2921_v37 = vpop.f32.mrb[29].mxu0  ;;  %v3041_v41 = vsel %vm958_vm8, %v5436_v29, -inf  ;;  %v3050_v47 = vsel %vm958_vm8, %v3023_v31, -inf }
0x11d5   :  { %3033 = vmax.xlane.f32.xlu1 %v3032_v38  ;;  %v3038_v43 = vsel %vm958_vm8, %v2921_v37, -inf }
0x11d8   :  { %3042 = vmax.xlane.f32.xlu0 %v3041_v41 }
0x11d9   :  { %3039 = vmax.xlane.f32.xlu1 %v3038_v43 }
0x11dc   :  { %3054 = vmax.xlane.f32.xlu0 %v3053_v45 }
0x11dd   :  { %3051 = vmax.xlane.f32.xlu1 %v3050_v47 }
0x125d   :  { %v3049_v48 = vpop.xlane.xlu0 %3048 }
0x125e   :  { %v3061_v51 = vsub.f32 %v5441_v21, %v3049_v48  ;;  %v3046_v52 = vpop.xlane.xlu1 %3045 }
0x125f   :  { %v3060_v62 = vsub.f32 %v3013_v23, %v3046_v52 }
0x1260   :  { %v3074_v1 = vmul.f32 1.442695, %v3061_v51 }
0x1261   :  { %v3072_v60 = vmul.f32 1.442695, %v3060_v62  ;;  %v3037_v61 = vpop.xlane.xlu0 %3036 }
0x1262   :  { %5882 = vpow2.f32 %v3074_v1  ;;  %v3057_v3 = vsub.f32 %v5433_v22, %v3037_v61  ;;  %v3034_v4 = vpop.xlane.xlu1 %3033 }
0x1263   :  { %5884 = vpow2.f32 %v3072_v60  ;;  %v3056_v5 = vsub.f32 %v2911_v25, %v3034_v4 }
0x1264   :  { %v3066_v32 = vmul.f32 1.442695, %v3057_v3 }
0x1265   :  { %v3064_v6 = vmul.f32 1.442695, %v3056_v5  ;;  %v3043_v34 = vpop.xlane.xlu0 %3042 }
0x1266   :  { %5886 = vpow2.f32 %v3066_v32  ;;  %v3059_v7 = vsub.f32 %v5436_v29, %v3043_v34  ;;  %v3040_v40 = vpop.xlane.xlu1 %3039 }
0x1267   :  { %5888 = vpow2.f32 %v3064_v6  ;;  %v3058_v9 = vsub.f32 %v2921_v37, %v3040_v40 }
0x1268   :  { %v3070_v13 = vmul.f32 1.442695, %v3059_v7 }
0x1269   :  { %v3068_v15 = vmul.f32 1.442695, %v3058_v9  ;;  %v3055_v16 = vpop.xlane.xlu0 %3054 }
0x126a   :  { %5890 = vpow2.f32 %v3070_v13  ;;  %v3063_v17 = vsub.f32 %v5444_v28, %v3055_v16  ;;  %v3052_v54 = vpop.xlane.xlu1 %3051 }
0x126b   :  { %5892 = vpow2.f32 %v3068_v15  ;;  %v3062_v18 = vsub.f32 %v3023_v31, %v3052_v54 }
0x126c   :  { %v5883_v19 = vpop.eup %5882  ;;  %v3078_v42 = vmul.f32 1.442695, %v3063_v17 }
0x126d   :  { %v5885_v57 = vpop.eup %5884  ;;  %v3076_v20 = vmul.f32 1.442695, %v3062_v18  ;;  %v3095_v21 = vsel %vm958_vm8, %v5883_v19, 0.0 }
0x126e   :  { %5894 = vpow2.f32 %v3078_v42  ;;  %3096 = vadd.xlane.f32.xlu0 %v3095_v21  ;;  %v3092_v22 = vsel %vm958_vm8, %v5885_v57, 0.0  ;;  %v2594_v42 = vld [vmem:[#allocation8 + $0xe8] sm:$0xff]  ;;  %v2596_v21 = vld [vmem:[#allocation8 + $0xf8] sm:$0xff] }
0x126f   :  { %5896 = vpow2.f32 %v3076_v20  ;;  %3093 = vadd.xlane.f32.xlu1 %v3092_v22  ;;  %v2595_v20 = vld [vmem:[#allocation8 + $0xf0] sm:$0xff] }
0x1270   :  { %v5887_v23 = vpop.eup %5886  ;;  %v5712_v22 = vpack.c.bf16 %v2596_v21, %v2595_v20  ;;  %v2604_v20 = vld [vmem:[#allocation8 + $0x128] sm:$0xff] }
0x1271   :  { %v5889_v24 = vpop.eup %5888  ;;  %v3083_v25 = vsel %vm958_vm8, %v5887_v23, 0.0 }
0x1272   :  { %3084 = vadd.xlane.f32.xlu0 %v3083_v25  ;;  %v3080_v26 = vsel %vm958_vm8, %v5889_v24, 0.0 }
0x1273   :  { %3081 = vadd.xlane.f32.xlu1 %v3080_v26 }
0x1274   :  { %v5891_v28 = vpop.eup %5890 }
0x1275   :  { %v5893_v29 = vpop.eup %5892  ;;  %v3089_v31 = vsel %vm958_vm8, %v5891_v28, 0.0 }
0x1276   :  { %3090 = vadd.xlane.f32.xlu0 %v3089_v31  ;;  %v3086_v0 = vsel %vm958_vm8, %v5893_v29, 0.0 }
0x1277   :  { %3087 = vadd.xlane.f32.xlu1 %v3086_v0 }
0x1278   :  { %v5895_v37 = vpop.eup %5894 }
0x1279   :  { %v5897_v38 = vpop.eup %5896  ;;  %v3101_v41 = vsel %vm958_vm8, %v5895_v37, 0.0 }
0x127a   :  { %3102 = vadd.xlane.f32.xlu0 %v3101_v41  ;;  %v3098_v43 = vsel %vm958_vm8, %v5897_v38, 0.0 }
0x127b   :  { %3099 = vadd.xlane.f32.xlu1 %v3098_v43 }
0x12fb   :  { %v3097_v45 = vpop.xlane.xlu0 %3096 }
0x12fc   :  { %5898 = vrcp.f32 %v3097_v45  ;;  %v3094_v47 = vpop.xlane.xlu1 %3093 }
0x12fd   :  { %5900 = vrcp.f32 %v3094_v47 }
0x12ff   :  { %v3085_v48 = vpop.xlane.xlu0 %3084 }
0x1300   :  { %5902 = vrcp.f32 %v3085_v48  ;;  %v3082_v51 = vpop.xlane.xlu1 %3081 }
0x1301   :  { %5904 = vrcp.f32 %v3082_v51 }
0x1303   :  { %v3091_v52 = vpop.xlane.xlu0 %3090 }
0x1304   :  { %5906 = vrcp.f32 %v3091_v52  ;;  %v3088_v62 = vpop.xlane.xlu1 %3087 }
0x1305   :  { %5908 = vrcp.f32 %v3088_v62 }
0x1306   :  { %v5899_v1 = vpop.eup %5898 }
0x1307   :  { %v5901_v60 = vpop.eup %5900  ;;  %v3103_v61 = vpop.xlane.xlu0 %3102  ;;  %v3115_v5 = vmul.f32 %v5899_v1, %v5883_v19  ;;  %v2593_v19 = vld [vmem:[#allocation8 + $0xe0] sm:$0xff] }
0x1308   :  { %5910 = vrcp.f32 %v3103_v61  ;;  %v3100_v3 = vpop.xlane.xlu1 %3099  ;;  %v3113_v4 = vmul.f32 %v5901_v60, %v5885_v57  ;;  %v5708_v57 = vpack.c.bf16 %v2594_v42, %v2593_v19 }
0x1309   :  { %5912 = vrcp.f32 %v3100_v3 }
0x130a   :  { %v5903_v32 = vpop.eup %5902  ;;  %5455 = vmatprep.mubr.msk.f32.mxu1 %vm958_vm8, %v3113_v4  ;;  %5709 = vmatprep.subr.bf16.mxu0 %v5708_v57  ;;  %v4944_v4 = vld [vmem:[%s7185_s9 + $0xe] ss:$0 sm:$0xff] }
0x130b   :  { %v5905_v6 = vpop.eup %5904  ;;  %5456 = vmatmul.mubr.msk.f32.vlgmr.msra.gmra.mrb[36].mxu1 %vm958_vm8, %v3115_v5  ;;  %v3107_v7 = vmul.f32 %v5903_v32, %v5887_v23 }
0x130c   :  { %v3105_v34 = vmul.f32 %v5905_v6, %v5889_v24 }
0x130e   :  { %v5907_v40 = vpop.eup %5906  ;;  %5447 = vmatprep.mubr.msk.f32.mxu0 %vm958_vm8, %v3105_v34 }
0x130f   :  { %v5909_v9 = vpop.eup %5908  ;;  %5448 = vmatmul.mubr.msk.f32.vlgmr.msra.gmra.mrb[30].mxu0 %vm958_vm8, %v3107_v7  ;;  %v3111_v15 = vmul.f32 %v5907_v40, %v5891_v28 }
0x1310   :  { %v3109_v13 = vmul.f32 %v5909_v9, %v5893_v29  ;;  %5711 = vmatpush3.bf16.msra.mxu0 %v5708_v57 }
0x1311   :  { %5713 = vmatprep.subr.bf16.mxu0 %v5712_v22 }
0x1312   :  { %v5911_v16 = vpop.eup %5910  ;;  %5450 = vmatprep.mubr.msk.f32.mxu0 %vm958_vm8, %v3109_v13 }
0x1313   :  { %v5913_v17 = vpop.eup %5912  ;;  %5451 = vmatmul.mubr.msk.f32.gmra.mrb[32].mxu0 %vm958_vm8, %v3111_v15  ;;  %v3119_v18 = vmul.f32 %v5911_v16, %v5895_v37 }
0x1314   :  { %v3117_v54 = vmul.f32 %v5913_v17, %v5897_v38  ;;  %5715 = vmatpush3.bf16.msra.mxu0 %v5712_v22  ;;  %v2605_v22 = vld [vmem:[#allocation8 + $0x130] sm:$0xff] }
0x1316   :  { %5458 = vmatprep.mubr.msk.f32.mxu1 %vm958_vm8, %v3117_v54 }
0x1317   :  { %5459 = vmatmul.mubr.msk.f32.gmra.mrb[38].mxu1 %vm958_vm8, %v3119_v18 }
0x13de   :  { %v5457_v23 = vpop.f32.mrb[36].mxu1 }
0x13df   :  { %v3317_v24 = vmul.f32 %v5457_v23, %v6389_v55  ;;  %v3295_v25 = vpop.f32.mrb[37].mxu1  ;;  %v2606_v23 = vld [vmem:[#allocation8 + $0x138] sm:$0xff] }
0x13e0   :  { %v3315_v26 = vmul.f32 %v3295_v25, %v6393_v56  ;;  %v2598_v25 = vld [vmem:[#allocation8 + $0x100] sm:$0xff] }
0x13e2   :  { %v3319_v28 = vadd.f32 %v3317_v24, %v3315_v26  ;;  %v5449_v29 = vpop.f32.mrb[30].mxu0  ;;  %v5728_v24 = vpack.c.bf16 %v2606_v23, %v2605_v22  ;;  %v2599_v26 = vld [vmem:[#allocation8 + $0x108] sm:$0xff] }
0x13e3   :  { %v3316_v31 = vmul.f32 %v5449_v29, %v6389_v55  ;;  %v3198_v0 = vpop.f32.mrb[31].mxu0  ;;  %v2600_v29 = vld [vmem:[#allocation8 + $0x110] sm:$0xff]  ;;  %v4962_v22 = vld [vmem:[%s7185_s9 + $0x11] ss:$0 sm:$0xff] }
0x13e4   :  { %v3314_v37 = vmul.f32 %v3198_v0, %v6393_v56 }
0x13e6   :  { %v3318_v38 = vadd.f32 %v3316_v31, %v3314_v37  ;;  %v5452_v41 = vpop.f32.mrb[32].mxu0  ;;  %v2601_v31 = vld [vmem:[#allocation8 + $0x118] sm:$0xff]  ;;  %v2608_v37 = vld [vmem:[#allocation8 + $0x140] sm:$0xff] }
0x13e7   :  { %v3208_v43 = vpop.f32.mrb[33].mxu0  ;;  %v3324_v47 = vmul.f32 %v5452_v41, %v6405_v8  ;;  %v5720_v0 = vpack.c.bf16 %v2601_v31, %v2600_v29 }
0x13e8   :  { %v3320_v45 = vmul.f32 %v3208_v43, %v6401_v53 }
0x13ea   :  { %v3322_v48 = vadd.f32 %v3320_v45, %v3318_v38  ;;  %v5460_v51 = vpop.f32.mrb[38].mxu1  ;;  %v2609_v38 = vld [vmem:[#allocation8 + $0x148] sm:$0xff] }
0x13eb   :  { %v3305_v52 = vpop.f32.mrb[39].mxu1  ;;  %v3325_v60 = vmul.f32 %v5460_v51, %v6405_v8  ;;  %v5732_v41 = vpack.c.bf16 %v2609_v38, %v2608_v37  ;;  %v4949_v51 = vld [vmem:[%s7185_s9 + $0x13] ss:$0 sm:$0xff] }
0x13ec   :  { %v3326_v62 = vadd.f32 %v3324_v47, %v3322_v48  ;;  %v3321_v1 = vmul.f32 %v3305_v52, %v6401_v53 }
0x13ee   :  { %v3323_v61 = vadd.f32 %v3321_v1, %v3319_v28  ;;  %5469 = vmatprep.mubr.msk.f32.mxu0 %vm552_vm7, %v3326_v62  ;;  %v5716_v28 = vpack.c.bf16 %v2599_v26, %v2598_v25 }
0x13f0   :  { %v3327_v3 = vadd.f32 %v3325_v60, %v3323_v61  ;;  %5717 = vmatprep.subr.bf16.mxu1 %v5716_v28  ;;  %v4950_v60 = vld [vmem:[%s7185_s9 + $0x14] ss:$0 sm:$0xff] }
0x13f1   :  { %5719 = vmatpush3.bf16.msra.mxu1 %v5716_v28 }
0x13f2   :  { %5470 = vmatmul.mubr.msk.f32.vlgmr.msra.gmra.mrb[34].mxu0 %vm552_vm7, %v3327_v3  ;;  %5721 = vmatprep.subr.bf16.mxu1 %v5720_v0 }
0x13f3   :  { %5491 = vmatprep.mubr.msk.f32.mxu0 %vm552_vm7, %v6522_v58 }
0x13f5   :  { %5723 = vmatpush3.bf16.msra.mxu1 %v5720_v0 }
0x13f6   :  { %5733 = vmatprep.subr.bf16.mxu1 %v5732_v41 }
0x14c5   :  { %v5471_v5 = vpop.f32.mrb[34].mxu0 }
0x14c6   :  { %v3412_v32 = vadd.f32 %v5471_v5, %v4944_v4  ;;  %v3406_v6 = vpop.f32.mrb[35].mxu0 }
0x14c7   :  { %v3407_v34 = vadd.f32 %v4944_v4, %v3406_v6  ;;  %v2611_v6 = vld [vmem:[#allocation8 + $0x158] sm:$0xff] }
0x14c8   :  { %v3416_v7 = vadd.f32 %v3412_v32, %v6885_v49  ;;  %v2610_v32 = vld [vmem:[#allocation8 + $0x150] sm:$0xff] }
0x14c9   :  { %v3415_v40 = vadd.f32 %v3407_v34, %v6887_v50  ;;  %v2603_v50 = vld [vmem:[#allocation8 + $0x120] sm:$0xff] }
0x14ca   :  { %v3424_v9 = vsel %vm552_vm7, %v3416_v7, 0.0  ;;  %v5724_v21 = vpack.c.bf16 %v2604_v20, %v2603_v50 }
0x14cb   :  { %3425 = vadd.xlane.f32.xlu0 %v3424_v9  ;;  %v3421_v13 = vsel %vm552_vm7, %v3415_v40, 0.0 }
0x14cc   :  { %3422 = vadd.xlane.f32.xlu1 %v3421_v13  ;;  %5725 = vmatprep.subr.bf16.mxu0 %v5724_v21 }
0x14cd   :  { %5727 = vmatpush3.bf16.msra.mxu0 %v5724_v21 }
0x14ce   :  { %5729 = vmatprep.subr.bf16.mxu0 %v5728_v24 }
0x14d1   :  { %5731 = vmatpush3.bf16.msra.mxu0 %v5728_v24 }
0x14d4   :  { %5492 = vmatmul.mubr.msk.f32.vlgmr.msra.gmra.mrb[36].mxu0 %vm552_vm7, %v6615_v12 }
0x14d5   :  { %5494 = vmatprep.mubr.msk.f32.mxu0 %vm552_vm7, %v6682_v10 }
0x14d8   :  { %5495 = vmatmul.mubr.msk.f32.gmra.mrb[38].mxu0 %vm552_vm7, %v6702_v35 }
0x1558   :  { %v3426_v15 = vpop.xlane.xlu0 %3425 }
0x1559   :  { %v3428_v58 = vmul.f32 0.03125, %v3426_v15  ;;  %v3423_v16 = vpop.xlane.xlu1 %3422 }
0x155a   :  { %v3427_v17 = vmul.f32 0.03125, %v3423_v16 }
0x155b   :  { %v3430_v54 = vsub.f32 %v3416_v7, %v3428_v58 }
0x155c   :  { %v3429_v18 = vsub.f32 %v3415_v40, %v3427_v17  ;;  %v5736_v40 = vpack.c.bf16 %v2611_v6, %v2610_v32 }
0x155d   :  { %v3432_v19 = vmul.f32 %v3430_v54, %v3430_v54 }
0x155e   :  { %v3431_v42 = vmul.f32 %v3429_v18, %v3429_v18 }
0x155f   :  { %v3436_v57 = vsel %vm552_vm7, %v3432_v19, 0.0 }
0x1560   :  { %3437 = vadd.xlane.f32.xlu0 %v3436_v57  ;;  %v3433_v49 = vsel %vm552_vm7, %v3431_v42, 0.0 }
0x1561   :  { %3434 = vadd.xlane.f32.xlu1 %v3433_v49 }
0x15ed   :  { %v3438_v12 = vpop.xlane.xlu0 %3437 }
0x15ee   :  { %v3440_v43 = vmul.f32 0.03125, %v3438_v12  ;;  %v3435_v10 = vpop.xlane.xlu1 %3434 }
0x15ef   :  { %v3439_v45 = vmul.f32 0.03125, %v3435_v10 }
0x15f0   :  { %v3442_v47 = vadd.f32 1e-05, %v3440_v43 }
0x15f1   :  { %v3441_v48 = vadd.f32 1e-05, %v3439_v45 }
0x15f2   :  { %5914 = vrsqrt.f32 %v3442_v47 }
0x15f3   :  { %5916 = vrsqrt.f32 %v3441_v48 }
0x15fc   :  { %v5915_v35 = vpop.eup %5914 }
0x15fd   :  { %v5917_v52 = vpop.eup %5916  ;;  %v3446_v62 = vmul.f32 %v5915_v35, %v3430_v54 }
0x15fe   :  { %v3445_v1 = vmul.f32 %v5917_v52, %v3429_v18 }
0x15ff   :  { %v3454_v61 = vmul.f32 %v4949_v51, %v3446_v62 }
0x1600   :  { %v3453_v3 = vmul.f32 %v4949_v51, %v3445_v1 }
0x1601   :  { %v6981_v4 = vadd.f32 %v4950_v60, %v3454_v61 }
0x1602   :  { %v6983_v5 = vadd.f32 %v4950_v60, %v3453_v3 }
0x1603   :  { %v3464_v7 = vadd.f32 %v6981_v4, %v6300_v33  ;;  %v5493_v33 = vpop.f32.mrb[36].mxu0 }
0x1604   :  { %v3463_v34 = vadd.f32 %v6983_v5, %v6282_v11  ;;  %v4956_v11 = vld [vmem:[%s7185_s9 + $0x10] ss:$0 sm:$0xff]  ;;  %v3628_v13 = vpop.f32.mrb[37].mxu0 }
0x1605   :  { %v3634_v9 = vadd.f32 %v5493_v33, %v4956_v11  ;;  %v3629_v15 = vadd.f32 %v4956_v11, %v3628_v13  ;;  %v5496_v58 = vpop.f32.mrb[38].mxu0 }
0x1606   :  { %5480 = vmatprep.mubr.msk.f32.mxu1 %vm552_vm7, %v3463_v34  ;;  %v3644_v16 = vadd.f32 %v5496_v58, %v4956_v11  ;;  %v3638_v17 = vpop.f32.mrb[39].mxu0 }
0x1607   :  { %5481 = vmatmul.mubr.msk.f32.vlgmr.msra.gmra.mrb[40].mxu1 %vm552_vm7, %v3464_v7  ;;  %v3639_v54 = vadd.f32 %v4956_v11, %v3638_v17 }
0x1608   :  { %5735 = vmatpush3.bf16.msra.mxu1 %v5732_v41  ;;  %5505 = vmatprep.mubr.msk.f32.mxu1 %vm552_vm7, %v6498_v30  ;;  %v5740_v30 = vpack.c.bf16 %v3634_v9, %v3629_v15 }
0x1609   :  { %5737 = vmatprep.subr.bf16.mxu1 %v5736_v40 }
0x160a   :  { %5742 = vmatprep.subr.msk.bf16.mxu0 %vm6737_vm9, %v5740_v30 }
0x160b   :  { %5745 = vmatpush3.bf16.xpose.msk.msra.mxu0 %vm6737_vm9, %v5740_v30 }
0x160c   :  { %5739 = vmatpush3.bf16.msra.mxu1 %v5736_v40 }
0x160f   :  { %5506 = vmatmul.mubr.msk.f32.vlgmr.msra.gmra.mrb[42].mxu1 %vm552_vm7, %v6578_v36  ;;  %v5746_v36 = vpack.c.bf16 %v3644_v16, %v3639_v54 }
0x1610   :  { %5508 = vmatprep.mubr.msk.f32.mxu1 %vm552_vm7, %v6655_v46  ;;  %v4952_v46 = vld [vmem:[%s7185_s9 + $0xf] ss:$0 sm:$0xff] }
0x1611   :  { %5748 = vmatprep.subr.msk.bf16.mxu1 %vm6737_vm9, %v5746_v36 }
0x1613   :  { %5509 = vmatmul.mubr.msk.f32.gmra.mrb[44].mxu1 %vm552_vm7, %v6696_v27 }
0x1615   :  { %5751 = vmatpush3.bf16.xpose.msk.msra.mxu1 %vm6737_vm9, %v5746_v36 }
0x16da   :  { %v5482_v27 = vpop.f32.mrb[40].mxu1 }
0x16db   :  { %v3551_v18 = vadd.f32 %v5482_v27, %v4952_v46  ;;  %v3545_v19 = vpop.f32.mrb[41].mxu1 }
0x16dc   :  { %v3546_v42 = vadd.f32 %v4952_v46, %v3545_v19 }
0x16dd   :  { %v3745_v57 = vmul.f32 %v3551_v18, %v6338_v59  ;;  %v3743_v49 = vmul.f32 %v3551_v18, %v6318_v44  ;;  %v3747_v14 = vmul.f32 %v3551_v18, %v6342_v63 }
0x16de   :  { %v3744_v50 = vmul.f32 %v3546_v42, %v6338_v59  ;;  %v3742_v20 = vmul.f32 %v3546_v42, %v6318_v44  ;;  %v3746_v21 = vmul.f32 %v3546_v42, %v6342_v63  ;;  %v3749_v44 = vmul.f32 %v3551_v18, %v6348_v2 }
0x16df   :  { %5525 = vmatprep.mubr.msk.f32.mxu1 %vm552_vm7, %v3743_v49  ;;  %v3748_v23 = vmul.f32 %v3546_v42, %v6348_v2 }
0x16e0   :  { %5515 = vmatprep.mubr.msk.f32.mxu0 %vm552_vm7, %v3742_v20  ;;  %5526 = vmatmul.mubr.msk.f32.vlgmr.msra.gmra.mrb[46].mxu1 %vm552_vm7, %v3745_v57 }
0x16e1   :  { %5516 = vmatmul.mubr.msk.f32.vlgmr.msra.gmra.mrb[40].mxu0 %vm552_vm7, %v3744_v50  ;;  %5528 = vmatprep.mubr.msk.f32.mxu1 %vm552_vm7, %v3747_v14 }
0x16e2   :  { %5518 = vmatprep.mubr.msk.f32.mxu0 %vm552_vm7, %v3746_v21  ;;  %v5507_v59 = vpop.f32.mrb[42].mxu1 }
0x16e3   :  { %v3727_v24 = vadd.f32 %v5507_v59, %v4962_v22  ;;  %v3721_v25 = vpop.f32.mrb[43].mxu1 }
0x16e4   :  { %5529 = vmatmul.mubr.msk.f32.gmra.mrb[48].mxu1 %vm552_vm7, %v3749_v44  ;;  %v3722_v63 = vadd.f32 %v4962_v22, %v3721_v25 }
0x16e5   :  { %5519 = vmatmul.mubr.msk.f32.gmra.mrb[42].mxu0 %vm552_vm7, %v3748_v23 }
0x16e6   :  { %v5752_v26 = vpack.c.bf16 %v3727_v24, %v3722_v63  ;;  %v5510_v28 = vpop.f32.mrb[44].mxu1 }
0x16e7   :  { %v3737_v29 = vadd.f32 %v5510_v28, %v4962_v22  ;;  %v3731_v31 = vpop.f32.mrb[45].mxu1 }
0x16e8   :  { %v3732_v0 = vadd.f32 %v4962_v22, %v3731_v31  ;;  %5753 = vmatprep.subr.bf16.mxu0 %v5752_v26 }
0x16e9   :  { %5755 = vmatpush3.bf16.msra.mxu0 %v5752_v26 }
0x16ea   :  { %v5756_v37 = vpack.c.bf16 %v3737_v29, %v3732_v0 }
0x16ec   :  { %5757 = vmatprep.subr.bf16.mxu1 %v5756_v37 }
0x16ed   :  { %5759 = vmatpush3.bf16.msra.mxu1 %v5756_v37 }
0x17b3   :  { %v5527_v38 = vpop.f32.mrb[46].mxu1 }
0x17b4   :  { %v5517_v41 = vpop.f32.mrb[40].mxu0  ;;  %v3937_v2 = vpop.f32.mrb[47].mxu1  ;;  %v3971_v12 = vsel %vm1928_vm10, %v5527_v38, -inf }
0x17b5   :  { %3972 = vmax.xlane.f32.xlu0 %v3971_v12  ;;  %v3834_v43 = vpop.f32.mrb[41].mxu0  ;;  %v3968_v10 = vsel %vm1928_vm10, %v3937_v2, -inf  ;;  %v3959_v35 = vsel %vm1928_vm10, %v5517_v41, -inf }
0x17b6   :  { %3969 = vmax.xlane.f32.xlu1 %v3968_v10  ;;  %v3956_v52 = vsel %vm1928_vm10, %v3834_v43, -inf }
0x17b7   :  { %v5530_v45 = vpop.f32.mrb[48].mxu1 }
0x17b8   :  { %v5520_v47 = vpop.f32.mrb[42].mxu0  ;;  %v3947_v48 = vpop.f32.mrb[49].mxu1  ;;  %v3977_v60 = vsel %vm1928_vm10, %v5530_v45, -inf }
0x17b9   :  { %3960 = vmax.xlane.f32.xlu0 %v3959_v35  ;;  %v3844_v51 = vpop.f32.mrb[43].mxu0  ;;  %v3965_v62 = vsel %vm1928_vm10, %v5520_v47, -inf  ;;  %v3974_v61 = vsel %vm1928_vm10, %v3947_v48, -inf }
0x17ba   :  { %3957 = vmax.xlane.f32.xlu1 %v3956_v52  ;;  %v3962_v1 = vsel %vm1928_vm10, %v3844_v51, -inf }
0x17bd   :  { %3966 = vmax.xlane.f32.xlu0 %v3965_v62 }
0x17be   :  { %3963 = vmax.xlane.f32.xlu1 %v3962_v1 }
0x17c1   :  { %3978 = vmax.xlane.f32.xlu0 %v3977_v60 }
0x17c2   :  { %3975 = vmax.xlane.f32.xlu1 %v3974_v61 }
0x1842   :  { %v3973_v3 = vpop.xlane.xlu0 %3972 }
0x1843   :  { %v3985_v32 = vsub.f32 %v5527_v38, %v3973_v3  ;;  %v3970_v6 = vpop.xlane.xlu1 %3969 }
0x1844   :  { %v3984_v34 = vsub.f32 %v3937_v2, %v3970_v6 }
0x1845   :  { %v3998_v7 = vmul.f32 1.442695, %v3985_v32 }
0x1846   :  { %v3996_v40 = vmul.f32 1.442695, %v3984_v34  ;;  %v3961_v11 = vpop.xlane.xlu0 %3960 }
0x1847   :  { %5918 = vpow2.f32 %v3998_v7  ;;  %v3981_v33 = vsub.f32 %v5517_v41, %v3961_v11  ;;  %v3958_v9 = vpop.xlane.xlu1 %3957 }
0x1848   :  { %5920 = vpow2.f32 %v3996_v40  ;;  %v3980_v13 = vsub.f32 %v3834_v43, %v3958_v9  ;;  %v2614_v9 = vld [vmem:[#allocation8 + $0x168] sm:$0xff] }
0x1849   :  { %v3990_v15 = vmul.f32 1.442695, %v3981_v33  ;;  %v2613_v33 = vld [vmem:[#allocation8 + $0x160] sm:$0xff] }
0x184a   :  { %v3988_v30 = vmul.f32 1.442695, %v3980_v13  ;;  %v3967_v58 = vpop.xlane.xlu0 %3966  ;;  %v5760_v13 = vpack.c.bf16 %v2614_v9, %v2613_v33 }
0x184b   :  { %5922 = vpow2.f32 %v3990_v15  ;;  %v3983_v16 = vsub.f32 %v5520_v47, %v3967_v58  ;;  %v3964_v17 = vpop.xlane.xlu1 %3963  ;;  %v2615_v15 = vld [vmem:[#allocation8 + $0x170] sm:$0xff] }
0x184c   :  { %5924 = vpow2.f32 %v3988_v30  ;;  %v3982_v54 = vsub.f32 %v3844_v51, %v3964_v17  ;;  %5761 = vmatprep.subr.bf16.mxu0 %v5760_v13  ;;  %v2616_v30 = vld [vmem:[#allocation8 + $0x178] sm:$0xff] }
0x184d   :  { %v3994_v36 = vmul.f32 1.442695, %v3983_v16  ;;  %v5764_v58 = vpack.c.bf16 %v2616_v30, %v2615_v15 }
0x184e   :  { %v3992_v46 = vmul.f32 1.442695, %v3982_v54  ;;  %v3979_v27 = vpop.xlane.xlu0 %3978 }
0x184f   :  { %5926 = vpow2.f32 %v3994_v36  ;;  %v3987_v18 = vsub.f32 %v5530_v45, %v3979_v27  ;;  %v3976_v19 = vpop.xlane.xlu1 %3975 }
0x1850   :  { %5928 = vpow2.f32 %v3992_v46  ;;  %v3986_v42 = vsub.f32 %v3947_v48, %v3976_v19 }
0x1851   :  { %v5919_v57 = vpop.eup %5918  ;;  %v4002_v49 = vmul.f32 1.442695, %v3987_v18 }
0x1852   :  { %v5921_v50 = vpop.eup %5920  ;;  %v4000_v20 = vmul.f32 1.442695, %v3986_v42  ;;  %v4019_v14 = vsel %vm1928_vm10, %v5919_v57, 0.0 }
0x1853   :  { %5930 = vpow2.f32 %v4002_v49  ;;  %4020 = vadd.xlane.f32.xlu0 %v4019_v14  ;;  %v4016_v21 = vsel %vm1928_vm10, %v5921_v50, 0.0 }
0x1854   :  { %5932 = vpow2.f32 %v4000_v20  ;;  %4017 = vadd.xlane.f32.xlu1 %v4016_v21 }
0x1855   :  { %v5923_v22 = vpop.eup %5922 }
0x1856   :  { %v5925_v44 = vpop.eup %5924  ;;  %v4007_v59 = vsel %vm1928_vm10, %v5923_v22, 0.0 }
0x1857   :  { %4008 = vadd.xlane.f32.xlu0 %v4007_v59  ;;  %v4004_v23 = vsel %vm1928_vm10, %v5925_v44, 0.0 }
0x1858   :  { %4005 = vadd.xlane.f32.xlu1 %v4004_v23 }
0x1859   :  { %v5927_v24 = vpop.eup %5926 }
0x185a   :  { %v5929_v25 = vpop.eup %5928  ;;  %v4013_v63 = vsel %vm1928_vm10, %v5927_v24, 0.0 }
0x185b   :  { %4014 = vadd.xlane.f32.xlu0 %v4013_v63  ;;  %v4010_v26 = vsel %vm1928_vm10, %v5929_v25, 0.0 }
0x185c   :  { %4011 = vadd.xlane.f32.xlu1 %v4010_v26 }
0x185d   :  { %v5931_v28 = vpop.eup %5930 }
0x185e   :  { %v5933_v29 = vpop.eup %5932  ;;  %v4025_v31 = vsel %vm1928_vm10, %v5931_v28, 0.0 }
0x185f   :  { %4026 = vadd.xlane.f32.xlu0 %v4025_v31  ;;  %v4022_v0 = vsel %vm1928_vm10, %v5933_v29, 0.0 }
0x1860   :  { %4023 = vadd.xlane.f32.xlu1 %v4022_v0 }
0x18e0   :  { %v4021_v37 = vpop.xlane.xlu0 %4020 }
0x18e1   :  { %5934 = vrcp.f32 %v4021_v37  ;;  %v4018_v38 = vpop.xlane.xlu1 %4017 }
0x18e2   :  { %5936 = vrcp.f32 %v4018_v38 }
0x18e4   :  { %v4009_v41 = vpop.xlane.xlu0 %4008 }
0x18e5   :  { %5938 = vrcp.f32 %v4009_v41  ;;  %v4006_v2 = vpop.xlane.xlu1 %4005 }
0x18e6   :  { %5940 = vrcp.f32 %v4006_v2 }
0x18e8   :  { %v4015_v12 = vpop.xlane.xlu0 %4014 }
0x18e9   :  { %5942 = vrcp.f32 %v4015_v12  ;;  %v4012_v43 = vpop.xlane.xlu1 %4011 }
0x18ea   :  { %5944 = vrcp.f32 %v4012_v43 }
0x18eb   :  { %v5935_v10 = vpop.eup %5934 }
0x18ec   :  { %v5937_v45 = vpop.eup %5936  ;;  %v4027_v47 = vpop.xlane.xlu0 %4026  ;;  %v4039_v51 = vmul.f32 %v5935_v10, %v5919_v57 }
0x18ed   :  { %5946 = vrcp.f32 %v4027_v47  ;;  %v4024_v48 = vpop.xlane.xlu1 %4023  ;;  %v4037_v35 = vmul.f32 %v5937_v45, %v5921_v50 }
0x18ee   :  { %5948 = vrcp.f32 %v4024_v48  ;;  %v4907_v48 = vld [vmem:[%s7182_s6 + $0x68] sm:$0xff] }
0x18ef   :  { %v5939_v52 = vpop.eup %5938  ;;  %5545 = vmatprep.mubr.msk.f32.mxu1 %vm1928_vm10, %v4037_v35 }
0x18f0   :  { %v5941_v62 = vpop.eup %5940  ;;  %5546 = vmatmul.mubr.msk.f32.vlgmr.msra.gmra.mrb[50].mxu1 %vm1928_vm10, %v4039_v51  ;;  %v4031_v60 = vmul.f32 %v5939_v52, %v5923_v22  ;;  %v4908_v51 = vld [vmem:[%s7182_s6 + $0x70] sm:$0xff]  ;;  %v4909_v52 = vld [vmem:[%s7182_s6 + $0x78] sm:$0xff] }
0x18f1   :  { %v4029_v1 = vmul.f32 %v5941_v62, %v5925_v44  ;;  %v5772_v62 = vpack.c.bf16 %v4909_v52, %v4908_v51  ;;  %v5004_v52 = vld [vmem:[%s7185_s9 + $0x17] ss:$0 sm:$0xff] }
0x18f3   :  { %v5943_v61 = vpop.eup %5942  ;;  %5535 = vmatprep.mubr.msk.f32.mxu0 %vm1928_vm10, %v4029_v1  ;;  %v4910_v1 = vld [vmem:[%s7183_s7 + $0x40] sm:$0xff] }
0x18f4   :  { %v5945_v3 = vpop.eup %5944  ;;  %5536 = vmatmul.mubr.msk.f32.vlgmr.msra.gmra.mrb[44].mxu0 %vm1928_vm10, %v4031_v60  ;;  %v4035_v6 = vmul.f32 %v5943_v61, %v5927_v24  ;;  %v4911_v60 = vld [vmem:[%s7183_s7 + $0x48] sm:$0xff]  ;;  %v4912_v61 = vld [vmem:[%s7183_s7 + $0x50] sm:$0xff] }
0x18f5   :  { %v4033_v32 = vmul.f32 %v5945_v3, %v5929_v25  ;;  %5763 = vmatpush3.bf16.msra.mxu0 %v5760_v13  ;;  %v5776_v3 = vpack.c.bf16 %v4911_v60, %v4910_v1  ;;  %v5005_v60 = vld [vmem:[%s7185_s9 + $0x18] ss:$0 sm:$0xff] }
0x18f6   :  { %5765 = vmatprep.subr.bf16.mxu0 %v5764_v58 }
0x18f7   :  { %v5947_v34 = vpop.eup %5946  ;;  %5538 = vmatprep.mubr.msk.f32.mxu0 %vm1928_vm10, %v4033_v32  ;;  %v4913_v32 = vld [vmem:[%s7183_s7 + $0x58] sm:$0xff] }
0x18f8   :  { %v5949_v7 = vpop.eup %5948  ;;  %5539 = vmatmul.mubr.msk.f32.gmra.mrb[46].mxu0 %vm1928_vm10, %v4035_v6  ;;  %v4043_v11 = vmul.f32 %v5947_v34, %v5931_v28  ;;  %v5780_v6 = vpack.c.bf16 %v4913_v32, %v4912_v61  ;;  %v4914_v34 = vld [vmem:[%s7183_s7 + $0x60] sm:$0xff] }
0x18f9   :  { %v4041_v40 = vmul.f32 %v5949_v7, %v5933_v29  ;;  %5767 = vmatpush3.bf16.msra.mxu0 %v5764_v58  ;;  %v4915_v7 = vld [vmem:[%s7183_s7 + $0x68] sm:$0xff] }
0x18fa   :  { %5777 = vmatprep.subr.bf16.mxu0 %v5776_v3 }
0x18fb   :  { %5548 = vmatprep.mubr.msk.f32.mxu1 %vm1928_vm10, %v4041_v40  ;;  %v5784_v40 = vpack.c.bf16 %v4915_v7, %v4914_v34 }
0x18fc   :  { %5549 = vmatmul.mubr.msk.f32.gmra.mrb[52].mxu1 %vm1928_vm10, %v4043_v11 }
0x19c3   :  { %v5547_v16 = vpop.f32.mrb[50].mxu1 }
0x19c4   :  { %v4241_v17 = vmul.f32 %v5547_v16, %v6389_v55  ;;  %v4219_v54 = vpop.f32.mrb[51].mxu1  ;;  %v4993_v16 = vld [vmem:[%s7185_s9 + $0x15] ss:$0 sm:$0xff] }
0x19c5   :  { %v4239_v36 = vmul.f32 %v4219_v54, %v6393_v56 }
0x19c7   :  { %v4243_v46 = vadd.f32 %v4241_v17, %v4239_v36  ;;  %v5537_v27 = vpop.f32.mrb[44].mxu0 }
0x19c8   :  { %v4240_v18 = vmul.f32 %v5537_v27, %v6389_v55  ;;  %v4122_v19 = vpop.f32.mrb[45].mxu0 }
0x19c9   :  { %v4238_v42 = vmul.f32 %v4122_v19, %v6393_v56  ;;  %v4988_v56 = vld [vmem:[%s7185_s9 + $0x12] ss:$0 sm:$0xff] }
0x19cb   :  { %v4242_v57 = vadd.f32 %v4240_v18, %v4238_v42  ;;  %v5540_v49 = vpop.f32.mrb[46].mxu0 }
0x19cc   :  { %v4132_v50 = vpop.f32.mrb[47].mxu0  ;;  %v4248_v14 = vmul.f32 %v5540_v49, %v6405_v8  ;;  %v4917_v49 = vld [vmem:[%s7183_s7 + $0x78] sm:$0xff] }
0x19cd   :  { %v4244_v20 = vmul.f32 %v4132_v50, %v6401_v53 }
0x19cf   :  { %v4246_v21 = vadd.f32 %v4244_v20, %v4242_v57  ;;  %v5550_v22 = vpop.f32.mrb[52].mxu1  ;;  %v4916_v57 = vld [vmem:[%s7183_s7 + $0x70] sm:$0xff]  ;;  %v4995_v20 = vld [vmem:[#allocation10 + $0x3] ss:$0 sm:$0xff] }
0x19d0   :  { %v4229_v44 = vpop.f32.mrb[53].mxu1  ;;  %v4249_v24 = vmul.f32 %v5550_v22, %v6405_v8  ;;  %v5788_v50 = vpack.c.bf16 %v4917_v49, %v4916_v57  ;;  %v6114_v57 = vmov 1966171168  }
0x19d1   :  { %v4250_v59 = vadd.f32 %v4248_v14, %v4246_v21  ;;  %v4245_v23 = vmul.f32 %v4229_v44, %v6401_v53  ;;  %v4662_v49 = vunpack.c.l.s4 %v6114_v57 }
0x19d3   :  { %v4247_v25 = vadd.f32 %v4245_v23, %v4243_v46  ;;  %5559 = vmatprep.mubr.msk.f32.mxu0 %vm552_vm7, %v4250_v59  ;;  %v4994_v46 = vld [vmem:[%s7185_s9 + $0x16] ss:$0 sm:$0xff] }
0x19d5   :  { %v4251_v55 = vadd.f32 %v4249_v24, %v4247_v25  ;;  %v4999_v24 = vld [vmem:[%s7185_s9 + $0x19] ss:$0 sm:$0xff] }
0x19d7   :  { %5560 = vmatmul.mubr.msk.f32.vlgmr.msra.gmra.mrb[48].mxu0 %vm552_vm7, %v4251_v55 }
0x19d8   :  { %5779 = vmatpush3.bf16.msra.mxu0 %v5776_v3 }
0x19d9   :  { %5781 = vmatprep.subr.bf16.mxu0 %v5780_v6 }
0x19dc   :  { %5783 = vmatpush3.bf16.msra.mxu0 %v5780_v6 }
0x19dd   :  { %5785 = vmatprep.subr.bf16.mxu0 %v5784_v40 }
0x19e0   :  { %5787 = vmatpush3.bf16.msra.mxu0 %v5784_v40 }
0x19e1   :  { %5789 = vmatprep.subr.bf16.mxu0 %v5788_v50 }
0x19e4   :  { %5791 = vmatpush3.bf16.msra.mxu0 %v5788_v50  ;;  %v4663_v50 = vunpack.c.0.s8 %v4662_v49 }
0x1aaa   :  { %v5561_v63 = vpop.f32.mrb[48].mxu0 }
0x1aab   :  { %v4336_v26 = vadd.f32 %v5561_v63, %v4988_v56  ;;  %v4330_v28 = vpop.f32.mrb[49].mxu0 }
0x1aac   :  { %v4331_v29 = vadd.f32 %v4988_v56, %v4330_v28 }
0x1aad   :  { %v4340_v31 = vadd.f32 %v4336_v26, %v6981_v4 }
0x1aae   :  { %v4339_v53 = vadd.f32 %v4331_v29, %v6983_v5  ;;  %v4906_v5 = vld [vmem:[%s7182_s6 + $0x60] sm:$0xff] }
0x1aaf   :  { %v4348_v8 = vsel %vm552_vm7, %v4340_v31, 0.0  ;;  %v5768_v35 = vpack.c.bf16 %v4907_v48, %v4906_v5 }
0x1ab0   :  { %4349 = vadd.xlane.f32.xlu0 %v4348_v8  ;;  %v4345_v0 = vsel %vm552_vm7, %v4339_v53, 0.0 }
0x1ab1   :  { %4346 = vadd.xlane.f32.xlu1 %v4345_v0  ;;  %5769 = vmatprep.subr.bf16.mxu1 %v5768_v35 }
0x1ab2   :  { %5771 = vmatpush3.bf16.msra.mxu1 %v5768_v35 }
0x1ab3   :  { %5773 = vmatprep.subr.bf16.mxu1 %v5772_v62 }
0x1ab6   :  { %5775 = vmatpush3.bf16.msra.mxu1 %v5772_v62 }
0x1b3d   :  { %v4350_v37 = vpop.xlane.xlu0 %4349 }
0x1b3e   :  { %v4352_v38 = vmul.f32 0.03125, %v4350_v37  ;;  %v4347_v41 = vpop.xlane.xlu1 %4346 }
0x1b3f   :  { %v4351_v2 = vmul.f32 0.03125, %v4347_v41 }
0x1b40   :  { %v4354_v12 = vsub.f32 %v4340_v31, %v4352_v38 }
0x1b41   :  { %v4353_v43 = vsub.f32 %v4339_v53, %v4351_v2 }
0x1b42   :  { %v4356_v10 = vmul.f32 %v4354_v12, %v4354_v12 }
0x1b43   :  { %v4355_v45 = vmul.f32 %v4353_v43, %v4353_v43 }
0x1b44   :  { %v4360_v47 = vsel %vm552_vm7, %v4356_v10, 0.0 }
0x1b45   :  { %4361 = vadd.xlane.f32.xlu0 %v4360_v47  ;;  %v4357_v4 = vsel %vm552_vm7, %v4355_v45, 0.0 }
0x1b46   :  { %4358 = vadd.xlane.f32.xlu1 %v4357_v4 }
0x1bd2   :  { %v4362_v11 = vpop.xlane.xlu0 %4361 }
0x1bd3   :  { %v4364_v33 = vmul.f32 0.03125, %v4362_v11  ;;  %v4359_v9 = vpop.xlane.xlu1 %4358 }
0x1bd4   :  { %v4363_v13 = vmul.f32 0.03125, %v4359_v9 }
0x1bd5   :  { %v4366_v15 = vadd.f32 1e-05, %v4364_v33 }
0x1bd6   :  { %v4365_v30 = vadd.f32 1e-05, %v4363_v13 }
0x1bd7   :  { %5950 = vrsqrt.f32 %v4366_v15 }
0x1bd8   :  { %5952 = vrsqrt.f32 %v4365_v30 }
0x1be1   :  { %v5951_v58 = vpop.eup %5950 }
0x1be2   :  { %v5953_v17 = vpop.eup %5952  ;;  %v4370_v54 = vmul.f32 %v5951_v58, %v4354_v12 }
0x1be3   :  { %v4369_v36 = vmul.f32 %v5953_v17, %v4353_v43 }
0x1be4   :  { %v4378_v27 = vmul.f32 %v4993_v16, %v4370_v54 }
0x1be5   :  { %v4377_v18 = vmul.f32 %v4993_v16, %v4369_v36 }
0x1be6   :  { %v4386_v42 = vadd.f32 %v4994_v46, %v4378_v27 }
0x1be7   :  { %v4385_v19 = vadd.f32 %v4994_v46, %v4377_v18 }
0x1be9   :  { %5570 = vmatprep.mubr.msk.f32.mxu1 %vm552_vm7, %v4385_v19 }
0x1bea   :  { %5571 = vmatmul.mubr.msk.f32.vlgmr.msra.gmra.mrb[54].mxu1 %vm552_vm7, %v4386_v42 }
0x1cbd   :  { %v5572_v14 = vpop.f32.mrb[54].mxu1 }
0x1cbe   :  { %v4471_v21 = vadd.f32 %v5572_v14, %v4995_v20  ;;  %v4465_v22 = vpop.f32.mrb[55].mxu1  ;;  %v5008_v14 = vld [vmem:[%s7185_s9 + $0x1a] ss:$0 sm:$0xff] }
0x1cbf   :  { %v4466_v44 = vadd.f32 %v4995_v20, %v4465_v22 }
0x1cc0   :  { %v4475_v23 = vmax.f32 %v4471_v21, 0.0 }
0x1cc1   :  { %v4474_v59 = vmax.f32 %v4466_v44, 0.0  ;;  %v5009_v44 = vld [vmem:[%s7185_s9 + $0x1b] ss:$0 sm:$0xff]  ;;  %s6115_s9 = smov [#allocation11]  }
0x1cc2   :  { %s4797_s22 = sshll.u32 %s6115_s9, 4  ;;  %s4798_s22 = int_to_ptr.vmem [resolvable:$true] %s4797_s22 }
0x1cc3   :  { %5589 = vmatprep.mubr.msk.f32.mxu0 %vm2457_vm11, %v4474_v59  ;;  %s6072_s13 = scalar_lea.vmem %s4798_s22, 256  ;;  %p6077_p13 = scmp.lt.s32.totalorder %s4798_s22, %s4798_s22 }
0x1cc4   :  { %5590 = vmatmul.mubr.msk.f32.vlgmr.msra.gmra.mrb[50].mxu0 %vm2457_vm11, %v4475_v23  ;;  %v4666_v23 = vsub.s32 %v4663_v50, %v6309_v39  ;;  %p6073_p12 = scmp.ne.s32.totalorder %s4798_s22, %s6072_s13  ;;  %p6078_p0 = scmp.lt.s32.totalorder %s6072_s13, %s6072_s13 }
0x1cc6   :  { %p6079_p1 = por %p6078_p0, %p6077_p13 }
0x1cc8   :  { %p6080_p2 = pnand %p6079_p1, %p6073_p12 }
0x1d97   :  { %v5591_v25 = vpop.f32.mrb[50].mxu0 }
0x1d98   :  { %v4562_v55 = vadd.f32 %v5591_v25, %v4999_v24  ;;  %v4556_v56 = vpop.f32.mrb[51].mxu0 }
0x1d99   :  { %v4557_v63 = vadd.f32 %v4999_v24, %v4556_v56 }
0x1d9a   :  { %v4566_v26 = vadd.f32 %v4562_v55, %v4386_v42 }
0x1d9b   :  { %v4565_v28 = vadd.f32 %v4557_v63, %v4385_v19 }
0x1d9c   :  { %v4574_v29 = vsel %vm552_vm7, %v4566_v26, 0.0 }
0x1d9d   :  { %4575 = vadd.xlane.f32.xlu0 %v4574_v29  ;;  %v4571_v31 = vsel %vm552_vm7, %v4565_v28, 0.0 }
0x1d9e   :  { %4572 = vadd.xlane.f32.xlu1 %v4571_v31 }
0x1e2a   :  { %v4576_v53 = vpop.xlane.xlu0 %4575 }
0x1e2b   :  { %v4578_v8 = vmul.f32 0.03125, %v4576_v53  ;;  %v4573_v0 = vpop.xlane.xlu1 %4572 }
0x1e2c   :  { %v4577_v37 = vmul.f32 0.03125, %v4573_v0 }
0x1e2d   :  { %v4580_v38 = vsub.f32 %v4566_v26, %v4578_v8 }
0x1e2e   :  { %v4579_v41 = vsub.f32 %v4565_v28, %v4577_v37 }
0x1e2f   :  { %v4582_v2 = vmul.f32 %v4580_v38, %v4580_v38 }
0x1e30   :  { %v4581_v12 = vmul.f32 %v4579_v41, %v4579_v41 }
0x1e31   :  { %v4586_v43 = vsel %vm552_vm7, %v4582_v2, 0.0 }
0x1e32   :  { %4587 = vadd.xlane.f32.xlu0 %v4586_v43  ;;  %v4583_v10 = vsel %vm552_vm7, %v4581_v12, 0.0 }
0x1e33   :  { %4584 = vadd.xlane.f32.xlu1 %v4583_v10 }
0x1ebf   :  { %v4588_v45 = vpop.xlane.xlu0 %4587 }
0x1ec0   :  { %v4590_v47 = vmul.f32 0.03125, %v4588_v45  ;;  %v4585_v4 = vpop.xlane.xlu1 %4584 }
0x1ec1   :  { %v4589_v5 = vmul.f32 0.03125, %v4585_v4 }
0x1ec2   :  { %v4592_v48 = vadd.f32 1e-05, %v4590_v47 }
0x1ec3   :  { %v4591_v35 = vadd.f32 1e-05, %v4589_v5 }
0x1ec4   :  { %5954 = vrsqrt.f32 %v4592_v48 }
0x1ec5   :  { %5956 = vrsqrt.f32 %v4591_v35 }
0x1ece   :  { %v5955_v51 = vpop.eup %5954 }
0x1ecf   :  { %v5957_v62 = vpop.eup %5956  ;;  %v4596_v1 = vmul.f32 %v5955_v51, %v4580_v38 }
0x1ed0   :  { %v4595_v61 = vmul.f32 %v5957_v62, %v4579_v41 }
0x1ed1   :  { %v4604_v3 = vmul.f32 %v5004_v52, %v4596_v1 }
0x1ed2   :  { %v4603_v32 = vmul.f32 %v5004_v52, %v4595_v61 }
0x1ed3   :  { %v4612_v6 = vadd.f32 %v5005_v60, %v4604_v3 }
0x1ed4   :  { %v4611_v34 = vadd.f32 %v5005_v60, %v4603_v32 }
0x1ed5   :  { %v4620_v7 = vsel %vm552_vm7, %v4612_v6, 0.0 }
0x1ed6   :  { %4621 = vadd.xlane.f32.xlu0 %v4620_v7  ;;  %v4617_v40 = vsel %vm552_vm7, %v4611_v34, 0.0 }
0x1ed7   :  { %4618 = vadd.xlane.f32.xlu1 %v4617_v40 }
0x1f63   :  { %v4622_v11 = vpop.xlane.xlu0 %4621 }
0x1f64   :  { %v4624_v33 = vmul.f32 0.03125, %v4622_v11  ;;  %v4619_v9 = vpop.xlane.xlu1 %4618 }
0x1f65   :  { %v4623_v13 = vmul.f32 0.03125, %v4619_v9 }
0x1f66   :  { %v4626_v15 = vsub.f32 %v4612_v6, %v4624_v33 }
0x1f67   :  { %v4625_v30 = vsub.f32 %v4611_v34, %v4623_v13 }
0x1f68   :  { %v4628_v58 = vmul.f32 %v4626_v15, %v4626_v15 }
0x1f69   :  { %v4627_v16 = vmul.f32 %v4625_v30, %v4625_v30 }
0x1f6a   :  { %v4632_v17 = vsel %vm552_vm7, %v4628_v58, 0.0 }
0x1f6b   :  { %4633 = vadd.xlane.f32.xlu0 %v4632_v17  ;;  %v4629_v54 = vsel %vm552_vm7, %v4627_v16, 0.0 }
0x1f6c   :  { %4630 = vadd.xlane.f32.xlu1 %v4629_v54 }
0x1ff8   :  { %v4634_v36 = vpop.xlane.xlu0 %4633 }
0x1ff9   :  { %v4636_v46 = vmul.f32 0.03125, %v4634_v36  ;;  %v4631_v27 = vpop.xlane.xlu1 %4630 }
0x1ffa   :  { %v4635_v18 = vmul.f32 0.03125, %v4631_v27 }
0x1ffb   :  { %v4638_v19 = vadd.f32 1e-05, %v4636_v46 }
0x1ffc   :  { %v4637_v42 = vadd.f32 1e-05, %v4635_v18 }
0x1ffd   :  { %5958 = vrsqrt.f32 %v4638_v19 }
0x1ffe   :  { %5960 = vrsqrt.f32 %v4637_v42 }
0x2007   :  { %v5959_v20 = vpop.eup %5958 }
0x2008   :  { %v5961_v21 = vpop.eup %5960  ;;  %v4642_v22 = vmul.f32 %v5959_v20, %v4626_v15 }
0x2009   :  { %v4641_v59 = vmul.f32 %v5961_v21, %v4625_v30 }
0x200a   :  { %v4650_v24 = vmul.f32 %v5008_v14, %v4642_v22 }
0x200b   :  { %v4649_v25 = vmul.f32 %v5008_v14, %v4641_v59 }
0x200c   :  { %v4658_v55 = vadd.f32 %v5009_v44, %v4650_v24 }
0x200d   :  { %v4657_v56 = vadd.f32 %v5009_v44, %v4649_v25 }
0x200e   :  { %v4727_v63 = vcombine.high %v4658_v55, %v4658_v55  ;;  %v4734_v26 = vrot.slane %v4658_v55, %v4666_v23 }
0x200f   :  { %v4660_v28 = vcombine.high %v4657_v56, %v4657_v56  ;;  %v4667_v29 = vrot.slane %v4657_v56, %v4666_v23 }
0x2010   :  { %v4741_v31 = vrot.slane %v4727_v63, %v4666_v23  ;;  %v4742_v53 = vcombine.high %v4734_v26, %v4734_v26  ;;  %v4750_v8 = vrot.slane %v4734_v26, %v4666_v23 }
0x2011   :  { %v4674_v0 = vrot.slane %v4660_v28, %v4666_v23  ;;  %v4675_v37 = vcombine.high %v4667_v29, %v4667_v29  ;;  %v4683_v38 = vrot.slane %v4667_v29, %v4666_v23 }
0x2012   :  { %v4743_v41 = vcombine.high %v4741_v31, %v4741_v31  ;;  %v4757_v2 = vrot.slane %v4741_v31, %v4666_v23  ;;  %v4764_v12 = vrot.slane %v4742_v53, %v4666_v23  ;;  %v4772_v43 = vcombine.high %v4750_v8, %v4750_v8  ;;  %4784 = vst.msk [vmem:[#allocation11 + $0x1] sm:$0x1] %vm4717_vm12, %v4750_v8 }
0x2013   :  { %v4676_v39 = vcombine.high %v4674_v0, %v4674_v0  ;;  %v4690_v10 = vrot.slane %v4674_v0, %v4666_v23  ;;  %v4697_v45 = vrot.slane %v4675_v37, %v4666_v23  ;;  %v4705_v47 = vcombine.high %v4683_v38, %v4683_v38  ;;  %4718 = vst.msk [vmem:[#allocation11] sm:$0x1] %vm4717_vm12, %v4683_v38 }
0x2014   :  { %v4771_v4 = vrot.slane %v4743_v41, %v4666_v23  ;;  %v4773_v5 = vcombine.high %v4757_v2, %v4757_v2  ;;  %v4774_v48 = vcombine.high %v4764_v12, %v4764_v12  ;;  %4785 = vst.msk [vmem:[#allocation11 + $0x3] sm:$0x1] %vm4717_vm12, %v4764_v12  ;;  %4786 = vst.msk [vmem:[#allocation11 + $0x5] sm:$0x1] %vm4717_vm12, %v4772_v43 }
0x2015   :  { %4788 = vst.msk [vmem:[#allocation11 + $0x9] sm:$0x1] %vm4717_vm12, %v4757_v2  ;;  %v4704_v35 = vrot.slane %v4676_v39, %v4666_v23  ;;  %v4706_v51 = vcombine.high %v4690_v10, %v4690_v10  ;;  %v4707_v52 = vcombine.high %v4697_v45, %v4697_v45  ;;  %4719 = vst.msk [vmem:[#allocation11 + $0x2] sm:$0x1] %vm4717_vm12, %v4697_v45 }
0x2016   :  { %4720 = vst.msk [vmem:[#allocation11 + $0x4] sm:$0x1] %vm4717_vm12, %v4705_v47  ;;  %4722 = vst.msk [vmem:[#allocation11 + $0x8] sm:$0x1] %vm4717_vm12, %v4690_v10  ;;  %v4775_v62 = vcombine.high %v4771_v4, %v4771_v4 }
0x2017   :  { %4787 = vst.msk [vmem:[#allocation11 + $0x7] sm:$0x1] %vm4717_vm12, %v4774_v48  ;;  %4789 = vst.msk [vmem:[#allocation11 + $0xb] sm:$0x1] %vm4717_vm12, %v4771_v4  ;;  %v4708_v1 = vcombine.high %v4704_v35, %v4704_v35 }
0x2018   :  { %4790 = vst.msk [vmem:[#allocation11 + $0xd] sm:$0x1] %vm4717_vm12, %v4773_v5  ;;  %4721 = vst.msk [vmem:[#allocation11 + $0x6] sm:$0x1] %vm4717_vm12, %v4707_v52 }
0x2019   :  { %4723 = vst.msk [vmem:[#allocation11 + $0xa] sm:$0x1] %vm4717_vm12, %v4704_v35  ;;  %4724 = vst.msk [vmem:[#allocation11 + $0xc] sm:$0x1] %vm4717_vm12, %v4706_v51 }
0x201a   :  { %4791 = vst.msk [vmem:[#allocation11 + $0xf] sm:$0x1] %vm4717_vm12, %v4775_v62  ;;  %4725 = vst.msk [vmem:[#allocation11 + $0xe] sm:$0x1] %vm4717_vm12, %v4708_v1 }
0x201b   :  { %6083 = shalt.err (!%p6080_p2)
}
0x201c   :  { %s6084_s6 = scalar_lea.hbm %s7186_s10, 256 }
0x201d   :  { %p6085_p3 = scmp.ne.s32.totalorder %s7186_s10, %s6084_s6  ;;  %p6088_p4 = scmp.lt.u32.totalorder %s6084_s6, %s7186_s10 }
0x201f   :  { %p6090_p5 = pnand %p6088_p4, %p6085_p3 }
0x2021   :  { %6093 = shalt.err (!%p6090_p5)
}
0x2022   :  { %4803 = dma.vmem_to_hbm [thread:$0]  %s4798_s22, 256, %s7186_s10, [#allocation4], %s6104_s25, %s6104_s25, %s6105_s26  }
0x2023   :  { %6100 = dma.done.wait [#allocation4], 256  }
0x2024   :  { %6101 = vsyncadd [#allocation4], 4294967040 }
0x2025   :  { %4807 = vsyncpa [#allocation3], 1 }
0x2026   :  { %4808 = vsyncpa [#allocation6], 1 }
0x2027   :  { %4809 = vsyncpa [#allocation9], 1 }
0x2028   :  { %4810 = vsyncpa [#allocation4], 1 }

</bundles_post_ra>
